<compile_context>
chip_gen: v6e
topology: v6e:2x2x1
jax: 0.10.0
libtpu: 0.0.40
codegen_flags: <defaults>
</compile_context>

<pallas_src>
import functools

import jax
import jax.numpy as jnp
from jax.experimental import pallas as pl
from jax.experimental.pallas import tpu as pltpu


def _round_up(x, m):
    return (x + m - 1) // m * m


_VMEM_LIMIT = 32 * 1024 * 1024    # valid on v5e/v6e/v7x; usage here is < 3 MiB
_LANE = 128


# ---------------------------------------------------------------------------
# Kernel 1: Conv2d(C, 64, 3, stride=2, pad=1) + ReLU as ONE K=9*C GEMM.
# ---------------------------------------------------------------------------
def _down_conv_kernel(x_ref, w_ref, b_ref, o_ref):
    # Single well-shaped dot: (OC, 9C) @ (9C, 128)  ->  lane-dense (OC, 128).
    acc = jnp.dot(w_ref[...], x_ref[...], preferred_element_type=jnp.float32)
    o_ref[...] = jnp.maximum(acc + b_ref[...], 0.0)


def down_conv_relu(img, w2d, bias_col):
    """Returns activations flattened PyTorch-style: (B, OC*OH*OW)."""
    B, C, H, W = img.shape
    OC = w2d.shape[0]
    OH, OW = H // 2, W // 2
    n_pos = B * OH * OW
    n_lane = _round_up(n_pos, _LANE)            # lane-dense output width

    # Wrapper-side im2col (18 KB here): lane order b*OH*OW + p*OW + q, so the
    # kernel output has no garbage columns and needs no in-kernel relayout.
    xpad = jnp.pad(img, ((0, 0), (0, 0), (1, 1), (1, 1)))
    cols = jnp.stack([xpad[:, :, di:di + 2 * OH:2, dj:dj + 2 * OW:2]
                      for di in range(3) for dj in range(3)], axis=0)
    patches = cols.transpose(0, 2, 1, 3, 4).reshape(9 * C, n_pos)
    if n_lane != n_pos:
        patches = jnp.pad(patches, ((0, 0), (0, n_lane - n_pos)))

    # Scaling guard: whole-input blocks; if B*H*W grows, add a lane-grid axis
    # (512-1024 lane tiles) instead of growing this monolithic block (v7x has
    # only 64 MiB VMEM).
    assert 9 * C * n_lane * 4 < 4 * 1024 * 1024

    out = pl.pallas_call(
        _down_conv_kernel,
        out_shape=jax.ShapeDtypeStruct((OC, n_lane), jnp.float32),
        grid=(1,),
        in_specs=[
            pl.BlockSpec((9 * C, n_lane), lambda i: (0, 0)),
            pl.BlockSpec((OC, 9 * C), lambda i: (0, 0)),
            pl.BlockSpec((OC, 1), lambda i: (0, 0)),
        ],
        out_specs=pl.BlockSpec((OC, n_lane), lambda i: (0, 0)),
        compiler_params=pltpu.CompilerParams(
            dimension_semantics=("arbitrary",),
            vmem_limit_bytes=_VMEM_LIMIT),
        cost_estimate=pl.CostEstimate(
            flops=2 * OC * 9 * C * n_lane,
            transcendentals=0,
            bytes_accessed=4 * (9 * C * n_lane + OC * 9 * C + OC + OC * n_lane)),
    )(patches, w2d, bias_col)

    # D[oc, b*OH*OW + j] -> flat[b, oc*OH*OW + j]  (== PyTorch out.view(B,-1)).
    flat = out[:, :n_pos].reshape(OC, B, OH * OW)
    return flat.transpose(1, 0, 2).reshape(B, OC * OH * OW)


# ---------------------------------------------------------------------------
# Kernel 2: Linear(down_dim,32) -> BN(32,eps=0.8)+ReLU -> Linear(32,down_dim)
#           -> BN(eps=1e-5)+ReLU, fused, single grid step.
# ---------------------------------------------------------------------------
def _fc_stack_kernel(x_ref, we_ref, be_ref, g1_ref, bb1_ref,
                     wf_ref, bf_ref, g2_ref, bb2_ref,
                     out_ref, emb_ref, *, eps1, eps2):
    x = x_ref[...]
    emb = jnp.dot(x, we_ref[...], preferred_element_type=jnp.float32) + be_ref[...]
    emb_ref[...] = emb                           # written exactly once (grid=1)
    mu1 = jnp.mean(emb, axis=0, keepdims=True)
    var1 = jnp.mean(jnp.square(emb - mu1), axis=0, keepdims=True)
    h = (emb - mu1) * jax.lax.rsqrt(var1 + eps1) * g1_ref[...] + bb1_ref[...]
    h = jnp.maximum(h, 0.0)

    # M=2, N=down_dim keeps the (B, down_dim) output lane-dense; the
    # transposed (M=32, N=2) variant would force lane-sparse stores.
    y = jnp.dot(h, wf_ref[...], preferred_element_type=jnp.float32) + bf_ref[...]
    mu2 = jnp.mean(y, axis=0, keepdims=True)
    var2 = jnp.mean(jnp.square(y - mu2), axis=0, keepdims=True)
    z = (y - mu2) * jax.lax.rsqrt(var2 + eps2) * g2_ref[...] + bb2_ref[...]
    out_ref[...] = jnp.maximum(z, 0.0)


def fc_stack(flat, p):
    B, down_dim = flat.shape
    kernel = functools.partial(_fc_stack_kernel, eps1=0.8, eps2=1e-5)
    fc_out, emb = pl.pallas_call(
        kernel,
        out_shape=(jax.ShapeDtypeStruct((B, down_dim), jnp.float32),
                   jax.ShapeDtypeStruct((B, 32), jnp.float32)),
        grid=(1,),
        in_specs=[
            pl.BlockSpec((B, down_dim), lambda i: (0, 0)),     # flat
            pl.BlockSpec((down_dim, 32), lambda i: (0, 0)),    # w_emb (pre-T)
            pl.BlockSpec((1, 32), lambda i: (0, 0)),           # b_emb
            pl.BlockSpec((1, 32), lambda i: (0, 0)),           # gamma1
            pl.BlockSpec((1, 32), lambda i: (0, 0)),           # beta1
            pl.BlockSpec((32, down_dim), lambda i: (0, 0)),    # w_fc (pre-T)
            pl.BlockSpec((1, down_dim), lambda i: (0, 0)),     # b_fc
            pl.BlockSpec((1, down_dim), lambda i: (0, 0)),     # gamma2
            pl.BlockSpec((1, down_dim), lambda i: (0, 0)),     # beta2
        ],
        out_specs=(pl.BlockSpec((B, down_dim), lambda i: (0, 0)),
                   pl.BlockSpec((B, 32), lambda i: (0, 0))),
        compiler_params=pltpu.CompilerParams(
            dimension_semantics=("arbitrary",),
            vmem_limit_bytes=_VMEM_LIMIT),
        cost_estimate=pl.CostEstimate(
            flops=4 * B * 32 * down_dim,
            transcendentals=2 * (32 + down_dim),
            bytes_accessed=4 * (2 * B * down_dim + 2 * 32 * down_dim
                                + 3 * down_dim + 4 * 32 + B * 32)),
    )(flat, p["w_emb_t"], p["b_emb"], p["g1"], p["bt1"],
      p["w_fc_t"], p["b_fc"], p["g2"], p["bt2"])
    return fc_out, emb


# ---------------------------------------------------------------------------
# Kernel 3: Upsample(2x nearest) + Conv2d(64, C, 3, 1, 1), all 4 output-parity
# classes in one grid step, lane-dense (16, 256) output.
# ---------------------------------------------------------------------------
def _up_conv_kernel(fp_ref, w_ref, b_ref, o_ref, *, row_w, n_lane):
    fp = fp_ref[...]                              # (64, padded)
    n_rows = o_ref.shape[0]                       # 4 classes * out_channels
    acc = jnp.zeros((n_rows, n_lane), jnp.float32)
    for r in range(3):
        for s in range(3):
            t = r * row_w + s                     # static lane offset
            acc += jnp.dot(w_ref[r * 3 + s], fp[:, t:t + n_lane],
                           preferred_element_type=jnp.float32)
    o_ref[...] = acc + b_ref[...]


def upsample_conv(fc_out, w_big, bias_col):
    B = fc_out.shape[0]
    n_taps, n_rows, CF = w_big.shape              # (9, 4*OCC, 64)
    OCC = n_rows // 4
    FH = FW = int(round((fc_out.shape[1] // CF) ** 0.5))
    PH, PW = FH + 2, FW + 2                       # 1-padded low-res dims
    n_pos = B * PH * PW
    n_lane = _round_up(n_pos, _LANE)              # lane-dense output width
    pad_w = _round_up(n_lane + 2 * PW + 2, _LANE)
    # Invariant: every static tap slice [t, t+n_lane) stays inside fp.
    assert pad_w >= n_lane + 2 * PW + 2
    assert CF * pad_w * 4 < 8 * 1024 * 1024       # scaling guard (see kernel 1)

    # 1x-traffic layout prep: channel-major, spatially 1-padded feature map.
    feat = fc_out.reshape(B, CF, FH, FW).transpose(1, 0, 2, 3)
    fp = jnp.pad(feat, ((0, 0), (0, 0), (1, 1), (1, 1))).reshape(CF, n_pos)
    fp = jnp.pad(fp, ((0, 0), (0, pad_w - n_pos)))

    kernel = functools.partial(_up_conv_kernel, row_w=PW, n_lane=n_lane)
    out = pl.pallas_call(
        kernel,
        out_shape=jax.ShapeDtypeStruct((n_rows, n_lane), jnp.float32),
        grid=(1,),
        in_specs=[
            pl.BlockSpec((CF, pad_w), lambda i: (0, 0)),
            pl.BlockSpec((n_taps, n_rows, CF), lambda i: (0, 0, 0)),
            pl.BlockSpec((n_rows, 1), lambda i: (0, 0)),
        ],
        out_specs=pl.BlockSpec((n_rows, n_lane), lambda i: (0, 0)),
        compiler_params=pltpu.CompilerParams(
            dimension_semantics=("arbitrary",),
            vmem_limit_bytes=_VMEM_LIMIT),
        cost_estimate=pl.CostEstimate(
            flops=2 * n_taps * n_rows * CF * n_lane,
            transcendentals=0,
            bytes_accessed=4 * (CF * pad_w + n_taps * n_rows * CF
                                + n_rows + n_rows * n_lane)),
    )(fp, w_big, bias_col)

    # Interleave the 4 output-parity classes back into NCHW; drop garbage lanes.
    out = out[:, :n_pos].reshape(2, 2, OCC, B, PH, PW)[:, :, :, :, :FH, :FW]
    return out.transpose(3, 2, 4, 0, 5, 1).reshape(B, OCC, 2 * FH, 2 * FW)


# ---------------------------------------------------------------------------
# One-time parameter layout prep (keeps all .T / reshapes off the hot path)
# ---------------------------------------------------------------------------
def prepare_params(params):
    w_down = params["w_down"]                      # (64, C, 3, 3)
    oc_d, c_in = w_down.shape[:2]
    w_up = params["w_up"]                          # (C_out, 64, 3, 3)
    oc_u, c_feat = w_up.shape[:2]

    # Down conv as a single (OC, 9*C) GEMM LHS; column order (di*3+dj)*C + c.
    w_down2d = w_down.transpose(0, 2, 3, 1).reshape(oc_d, 9 * c_in)

    # Up path: fold the 2x nearest upsample into per-output-parity effective
    # 3x3 kernels on the 1-padded low-res feature map.
    M = jnp.array([[[1, 0, 0], [0, 1, 0], [0, 1, 0]],
                   [[0, 1, 0], [0, 1, 0], [0, 0, 1]]], jnp.float32)
    w_eff = jnp.einsum("xdr,yes,ocde->xyrsoc", M, M, w_up,
                       precision=jax.lax.Precision.HIGHEST)
    w_eff = w_eff.reshape(4, 9, oc_u, c_feat)
    # Stack the 4 parity classes into the GEMM M dimension: (9, 4*OCC, CF).
    w_up_big = w_eff.transpose(1, 0, 2, 3).reshape(9, 4 * oc_u, c_feat)
    b_up_big = jnp.tile(params["b_up"], 4).reshape(4 * oc_u, 1)

    return {
        "w_down2d": w_down2d,
        "b_down": params["b_down"].reshape(oc_d, 1),
        "w_emb_t": params["w_emb"].T,              # (down_dim, 32)
        "b_emb": params["b_emb"].reshape(1, -1),
        "g1": params["gamma1"].reshape(1, -1),
        "bt1": params["beta1"].reshape(1, -1),
        "w_fc_t": params["w_fc"].T,                # (32, down_dim)
        "b_fc": params["b_fc"].reshape(1, -1),
        "g2": params["gamma2"].reshape(1, -1),
        "bt2": params["beta2"].reshape(1, -1),
        "w_up_big": w_up_big,
        "b_up_big": b_up_big,
    }


def discriminator_forward(img, prepped):
    flat = down_conv_relu(img, prepped["w_down2d"], prepped["b_down"])
    fc_out, embedding = fc_stack(flat, prepped)
    out_img = upsample_conv(fc_out, prepped["w_up_big"], prepped["b_up_big"])
    return out_img, embedding


# ---------------------------------------------------------------------------
# Pure-JAX reference of the PyTorch module (for in-script verification)
# ---------------------------------------------------------------------------
def reference_forward(img, params):
    B = img.shape[0]
    hp = jax.lax.Precision.HIGHEST

    def bn_train(v, g, b, eps):
        mu = v.mean(0, keepdims=True)
        var = ((v - mu) ** 2).mean(0, keepdims=True)   # biased, training mode
        return (v - mu) * jax.lax.rsqrt(var + eps) * g + b

    x = jax.lax.conv_general_dilated(
        img, params["w_down"], (2, 2), ((1, 1), (1, 1)),
        dimension_numbers=("NCHW", "OIHW", "NCHW"), precision=hp)
    x = jnp.maximum(x + params["b_down"][None, :, None, None], 0.0)
    flat = x.reshape(B, -1)
    emb = jnp.dot(flat, params["w_emb"].T, precision=hp) + params["b_emb"]
    h = jnp.maximum(bn_train(emb, params["gamma1"], params["beta1"], 0.8), 0.0)
    y = jnp.dot(h, params["w_fc"].T, precision=hp) + params["b_fc"]
    z = jnp.maximum(bn_train(y, params["gamma2"], params["beta2"], 1e-5), 0.0)
    feat = z.reshape(B, 64, img.shape[2] // 2, img.shape[3] // 2)
    up = jnp.repeat(jnp.repeat(feat, 2, axis=2), 2, axis=3)
    out = jax.lax.conv_general_dilated(
        up, params["w_up"], (1, 1), ((1, 1), (1, 1)),
        dimension_numbers=("NCHW", "OIHW", "NCHW"), precision=hp)
    return out + params["b_up"][None, :, None, None], emb


# ---------------------------------------------------------------------------
# Main
# ---------------------------------------------------------------------------
if __name__ == "__main__":
    B, CHANNELS, IMG_SIZE = 2, 4, 16
    down_size = IMG_SIZE // 2
    down_dim = 64 * down_size * down_size          # 4096

    key = jax.random.PRNGKey(0)
    ks = jax.random.split(key, 13)
    img = jax.random.normal(ks[0], (B, CHANNELS, IMG_SIZE, IMG_SIZE), jnp.float32)

    params = {
        "w_down": 0.1 * jax.random.normal(ks[1], (64, CHANNELS, 3, 3), jnp.float32),
        "b_down": 0.1 * jax.random.normal(ks[2], (64,), jnp.float32),
        "w_emb": 0.02 * jax.random.normal(ks[3], (32, down_dim), jnp.float32),
        "b_emb": 0.02 * jax.random.normal(ks[4], (32,), jnp.float32),
        "w_fc": 0.1 * jax.random.normal(ks[5], (down_dim, 32), jnp.float32),
        "b_fc": 0.1 * jax.random.normal(ks[6], (down_dim,), jnp.float32),
        "gamma1": 1.0 + 0.1 * jax.random.normal(ks[9], (32,), jnp.float32),
        "beta1": 0.1 * jax.random.normal(ks[10], (32,), jnp.float32),
        "gamma2": 1.0 + 0.1 * jax.random.normal(ks[11], (down_dim,), jnp.float32),
        "beta2": 0.1 * jax.random.normal(ks[12], (down_dim,), jnp.float32),
        "w_up": 0.05 * jax.random.normal(ks[7], (CHANNELS, 64, 3, 3), jnp.float32),
        "b_up": 0.05 * jax.random.normal(ks[8], (CHANNELS,), jnp.float32),
    }

    prepped = prepare_params(params)               # one-time layout prep
    fwd = jax.jit(discriminator_forward)
    out_img, embedding = fwd(img, prepped)
    jax.block_until_ready((out_img, embedding))

    assert out_img.shape == (B, CHANNELS, IMG_SIZE, IMG_SIZE), out_img.shape
    assert embedding.shape == (B, 32), embedding.shape
    assert out_img.dtype == jnp.float32 and embedding.dtype == jnp.float32

    # Cross-check against the pure-JAX reference of the PyTorch module.
    ref_out, ref_emb = jax.jit(reference_forward)(img, params)
    emb_err = float(jnp.max(jnp.abs(embedding - ref_emb)))
    out_err = float(jnp.max(jnp.abs(out_img - ref_out)))
    assert emb_err < 1e-2, f"embedding mismatch: max abs err {emb_err}"
    assert out_err < 5e-2, f"output mismatch: max abs err {out_err}"

    print("KERNEL_OK")
</pallas_src>

<mosaic_0001>
module attributes {stable_mosaic.version = 11 : i64} {
  func.func @_down_conv_kernel(%arg0: i32, %arg1: memref<36x128xf32, #tpu.memory_space<vmem>>, %arg2: memref<64x36xf32, #tpu.memory_space<vmem>>, %arg3: memref<64x1xf32, #tpu.memory_space<vmem>>, %arg4: memref<64x128xf32, #tpu.memory_space<vmem>>) attributes {dimension_semantics = [#tpu.dimension_semantics<arbitrary>], iteration_bounds = array<i64: 1>, scalar_prefetch = 0 : i64, scratch_operands = 0 : i64, tpu.core_type = #tpu.core_type<tc>, window_params = [{pipeline_mode = #tpu.pipeline_mode<synchronous>, transform_indices = @transform_0, window_bounds = array<i64: 36, 128>}, {pipeline_mode = #tpu.pipeline_mode<synchronous>, transform_indices = @transform_1, window_bounds = array<i64: 64, 36>}, {pipeline_mode = #tpu.pipeline_mode<synchronous>, transform_indices = @transform_2, window_bounds = array<i64: 64, 1>}, {pipeline_mode = #tpu.pipeline_mode<synchronous>, transform_indices = @transform_3, window_bounds = array<i64: 64, 128>}]} {
    %c0 = arith.constant 0 : index
    %c0_0 = arith.constant 0 : index
    %0 = vector.load %arg2[%c0, %c0_0] : memref<64x36xf32, #tpu.memory_space<vmem>>, vector<64x36xf32>
    %c0_1 = arith.constant 0 : index
    %c0_2 = arith.constant 0 : index
    %1 = vector.load %arg1[%c0_1, %c0_2] : memref<36x128xf32, #tpu.memory_space<vmem>>, vector<36x128xf32>
    %cst = arith.constant dense<0.000000e+00> : vector<64x128xf32>
    %2 = tpu.matmul %0, %1, %cst {dimension_numbers = #tpu.dot_dimension_numbers<[1], [0], [0], [1], [0, 0, 1, 1], [], []>} : vector<64x36xf32>, vector<36x128xf32>, vector<64x128xf32> -> vector<64x128xf32>
    %c0_3 = arith.constant 0 : index
    %c0_4 = arith.constant 0 : index
    %3 = vector.load %arg3[%c0_3, %c0_4] : memref<64x1xf32, #tpu.memory_space<vmem>>, vector<64x1xf32>
    %4 = vector.broadcast %3 : vector<64x1xf32> to vector<64x128xf32>
    %5 = arith.addf %2, %4 : vector<64x128xf32>
    %cst_5 = arith.constant 0.000000e+00 : f32
    %6 = vector.broadcast %cst_5 : f32 to vector<64x128xf32>
    %7 = arith.maximumf %5, %6 : vector<64x128xf32>
    %c0_6 = arith.constant 0 : index
    %c0_7 = arith.constant 0 : index
    %8 = vector.load %arg4[%c0_6, %c0_7] : memref<64x128xf32, #tpu.memory_space<vmem>>, vector<64x128xf32>
    tpu.vector_store %arg4[%c0_6, %c0_7], %7 {strides = array<i32>} : memref<64x128xf32, #tpu.memory_space<vmem>>, vector<64x128xf32>,
    return
  }
  func.func @transform_0(%arg0: i32) -> (i32, i32) {
    %c0_i32 = arith.constant 0 : i32
    %c0_i32_0 = arith.constant 0 : i32
    %c0_i32_1 = arith.constant 0 : i32
    return %c0_i32, %c0_i32_0 : i32, i32
  }
  func.func @transform_1(%arg0: i32) -> (i32, i32) {
    %c0_i32 = arith.constant 0 : i32
    %c0_i32_0 = arith.constant 0 : i32
    %c0_i32_1 = arith.constant 0 : i32
    return %c0_i32, %c0_i32_0 : i32, i32
  }
  func.func @transform_2(%arg0: i32) -> (i32, i32) {
    %c0_i32 = arith.constant 0 : i32
    %c0_i32_0 = arith.constant 0 : i32
    %c0_i32_1 = arith.constant 0 : i32
    return %c0_i32, %c0_i32_0 : i32, i32
  }
  func.func @transform_3(%arg0: i32) -> (i32, i32) {
    %c0_i32 = arith.constant 0 : i32
    %c0_i32_0 = arith.constant 0 : i32
    %c0_i32_1 = arith.constant 0 : i32
    return %c0_i32, %c0_i32_0 : i32, i32
  }
}

module attributes {stable_mosaic.version = 11 : i64} {
  func.func @_fc_stack_kernel(%arg0: i32, %arg1: memref<2x4096xf32, #tpu.memory_space<vmem>>, %arg2: memref<4096x32xf32, #tpu.memory_space<vmem>>, %arg3: memref<1x32xf32, #tpu.memory_space<vmem>>, %arg4: memref<1x32xf32, #tpu.memory_space<vmem>>, %arg5: memref<1x32xf32, #tpu.memory_space<vmem>>, %arg6: memref<32x4096xf32, #tpu.memory_space<vmem>>, %arg7: memref<1x4096xf32, #tpu.memory_space<vmem>>, %arg8: memref<1x4096xf32, #tpu.memory_space<vmem>>, %arg9: memref<1x4096xf32, #tpu.memory_space<vmem>>, %arg10: memref<2x4096xf32, #tpu.memory_space<vmem>>, %arg11: memref<2x32xf32, #tpu.memory_space<vmem>>) attributes {dimension_semantics = [#tpu.dimension_semantics<arbitrary>], iteration_bounds = array<i64: 1>, scalar_prefetch = 0 : i64, scratch_operands = 0 : i64, tpu.core_type = #tpu.core_type<tc>, window_params = [{pipeline_mode = #tpu.pipeline_mode<synchronous>, transform_indices = @transform_0, window_bounds = array<i64: 2, 4096>}, {pipeline_mode = #tpu.pipeline_mode<synchronous>, transform_indices = @transform_1, window_bounds = array<i64: 4096, 32>}, {pipeline_mode = #tpu.pipeline_mode<synchronous>, transform_indices = @transform_2, window_bounds = array<i64: 1, 32>}, {pipeline_mode = #tpu.pipeline_mode<synchronous>, transform_indices = @transform_3, window_bounds = array<i64: 1, 32>}, {pipeline_mode = #tpu.pipeline_mode<synchronous>, transform_indices = @transform_4, window_bounds = array<i64: 1, 32>}, {pipeline_mode = #tpu.pipeline_mode<synchronous>, transform_indices = @transform_5, window_bounds = array<i64: 32, 4096>}, {pipeline_mode = #tpu.pipeline_mode<synchronous>, transform_indices = @transform_6, window_bounds = array<i64: 1, 4096>}, {pipeline_mode = #tpu.pipeline_mode<synchronous>, transform_indices = @transform_7, window_bounds = array<i64: 1, 4096>}, {pipeline_mode = #tpu.pipeline_mode<synchronous>, transform_indices = @transform_8, window_bounds = array<i64: 1, 4096>}, {pipeline_mode = #tpu.pipeline_mode<synchronous>, transform_indices = @transform_9, window_bounds = array<i64: 2, 4096>}, {pipeline_mode = #tpu.pipeline_mode<synchronous>, transform_indices = @transform_10, window_bounds = array<i64: 2, 32>}]} {
    %c0 = arith.constant 0 : index
    %c0_0 = arith.constant 0 : index
    %0 = vector.load %arg1[%c0, %c0_0] : memref<2x4096xf32, #tpu.memory_space<vmem>>, vector<2x4096xf32>
    %c0_1 = arith.constant 0 : index
    %c0_2 = arith.constant 0 : index
    %1 = vector.load %arg2[%c0_1, %c0_2] : memref<4096x32xf32, #tpu.memory_space<vmem>>, vector<4096x32xf32>
    %cst = arith.constant dense<0.000000e+00> : vector<2x32xf32>
    %2 = tpu.matmul %0, %1, %cst {dimension_numbers = #tpu.dot_dimension_numbers<[1], [0], [0], [1], [0, 0, 1, 1], [], []>} : vector<2x4096xf32>, vector<4096x32xf32>, vector<2x32xf32> -> vector<2x32xf32>
    %c0_3 = arith.constant 0 : index
    %c0_4 = arith.constant 0 : index
    %3 = vector.load %arg3[%c0_3, %c0_4] : memref<1x32xf32, #tpu.memory_space<vmem>>, vector<1x32xf32>
    %4 = vector.broadcast %3 : vector<1x32xf32> to vector<2x32xf32>
    %5 = arith.addf %2, %4 : vector<2x32xf32>
    %c0_5 = arith.constant 0 : index
    %c0_6 = arith.constant 0 : index
    %6 = vector.load %arg11[%c0_5, %c0_6] : memref<2x32xf32, #tpu.memory_space<vmem>>, vector<2x32xf32>
    tpu.vector_store %arg11[%c0_5, %c0_6], %5 {strides = array<i32>} : memref<2x32xf32, #tpu.memory_space<vmem>>, vector<2x32xf32>,
    %cst_7 = arith.constant dense<0.000000e+00> : vector<32xf32>
    %7 = vector.multi_reduction <add>, %5, %cst_7 [0] : vector<2x32xf32> to vector<32xf32>
    %8 = vector.shape_cast %7 : vector<32xf32> to vector<1x32xf32>
    %cst_8 = arith.constant 2.000000e+00 : f32
    %9 = vector.broadcast %cst_8 : f32 to vector<1x32xf32>
    %10 = arith.divf %8, %9 : vector<1x32xf32>
    %11 = vector.broadcast %10 : vector<1x32xf32> to vector<2x32xf32>
    %12 = arith.subf %5, %11 : vector<2x32xf32>
    %13 = arith.mulf %12, %12 : vector<2x32xf32>
    %cst_9 = arith.constant dense<0.000000e+00> : vector<32xf32>
    %14 = vector.multi_reduction <add>, %13, %cst_9 [0] : vector<2x32xf32> to vector<32xf32>
    %15 = vector.shape_cast %14 : vector<32xf32> to vector<1x32xf32>
    %cst_10 = arith.constant 2.000000e+00 : f32
    %16 = vector.broadcast %cst_10 : f32 to vector<1x32xf32>
    %17 = arith.divf %15, %16 : vector<1x32xf32>
    %18 = vector.broadcast %10 : vector<1x32xf32> to vector<2x32xf32>
    %19 = arith.subf %5, %18 : vector<2x32xf32>
    %cst_11 = arith.constant 8.000000e-01 : f32
    %20 = vector.broadcast %cst_11 : f32 to vector<1x32xf32>
    %21 = arith.addf %17, %20 : vector<1x32xf32>
    %22 = math.rsqrt %21 : vector<1x32xf32>
    %23 = vector.broadcast %22 : vector<1x32xf32> to vector<2x32xf32>
    %24 = arith.mulf %19, %23 : vector<2x32xf32>
    %c0_12 = arith.constant 0 : index
    %c0_13 = arith.constant 0 : index
    %25 = vector.load %arg4[%c0_12, %c0_13] : memref<1x32xf32, #tpu.memory_space<vmem>>, vector<1x32xf32>
    %26 = vector.broadcast %25 : vector<1x32xf32> to vector<2x32xf32>
    %27 = arith.mulf %24, %26 : vector<2x32xf32>
    %c0_14 = arith.constant 0 : index
    %c0_15 = arith.constant 0 : index
    %28 = vector.load %arg5[%c0_14, %c0_15] : memref<1x32xf32, #tpu.memory_space<vmem>>, vector<1x32xf32>
    %29 = vector.broadcast %28 : vector<1x32xf32> to vector<2x32xf32>
    %30 = arith.addf %27, %29 : vector<2x32xf32>
    %cst_16 = arith.constant 0.000000e+00 : f32
    %31 = vector.broadcast %cst_16 : f32 to vector<2x32xf32>
    %32 = arith.maximumf %30, %31 : vector<2x32xf32>
    %c0_17 = arith.constant 0 : index
    %c0_18 = arith.constant 0 : index
    %33 = vector.load %arg6[%c0_17, %c0_18] : memref<32x4096xf32, #tpu.memory_space<vmem>>, vector<32x4096xf32>
    %cst_19 = arith.constant dense<0.000000e+00> : vector<2x4096xf32>
    %34 = tpu.matmul %32, %33, %cst_19 {dimension_numbers = #tpu.dot_dimension_numbers<[1], [0], [0], [1], [0, 0, 1, 1], [], []>} : vector<2x32xf32>, vector<32x4096xf32>, vector<2x4096xf32> -> vector<2x4096xf32>
    %c0_20 = arith.constant 0 : index
    %c0_21 = arith.constant 0 : index
    %35 = vector.load %arg7[%c0_20, %c0_21] : memref<1x4096xf32, #tpu.memory_space<vmem>>, vector<1x4096xf32>
    %36 = vector.broadcast %35 : vector<1x4096xf32> to vector<2x4096xf32>
    %37 = arith.addf %34, %36 : vector<2x4096xf32>
    %cst_22 = arith.constant dense<0.000000e+00> : vector<4096xf32>
    %38 = vector.multi_reduction <add>, %37, %cst_22 [0] : vector<2x4096xf32> to vector<4096xf32>
    %39 = vector.shape_cast %38 : vector<4096xf32> to vector<1x4096xf32>
    %cst_23 = arith.constant 2.000000e+00 : f32
    %40 = vector.broadcast %cst_23 : f32 to vector<1x4096xf32>
    %41 = arith.divf %39, %40 : vector<1x4096xf32>
    %42 = vector.broadcast %41 : vector<1x4096xf32> to vector<2x4096xf32>
    %43 = arith.subf %37, %42 : vector<2x4096xf32>
    %44 = arith.mulf %43, %43 : vector<2x4096xf32>
    %cst_24 = arith.constant dense<0.000000e+00> : vector<4096xf32>
    %45 = vector.multi_reduction <add>, %44, %cst_24 [0] : vector<2x4096xf32> to vector<4096xf32>
    %46 = vector.shape_cast %45 : vector<4096xf32> to vector<1x4096xf32>
    %cst_25 = arith.constant 2.000000e+00 : f32
    %47 = vector.broadcast %cst_25 : f32 to vector<1x4096xf32>
    %48 = arith.divf %46, %47 : vector<1x4096xf32>
    %49 = vector.broadcast %41 : vector<1x4096xf32> to vector<2x4096xf32>
    %50 = arith.subf %37, %49 : vector<2x4096xf32>
    %cst_26 = arith.constant 9.99999974E-6 : f32
    %51 = vector.broadcast %cst_26 : f32 to vector<1x4096xf32>
    %52 = arith.addf %48, %51 : vector<1x4096xf32>
    %53 = math.rsqrt %52 : vector<1x4096xf32>
    %54 = vector.broadcast %53 : vector<1x4096xf32> to vector<2x4096xf32>
    %55 = arith.mulf %50, %54 : vector<2x4096xf32>
    %c0_27 = arith.constant 0 : index
    %c0_28 = arith.constant 0 : index
    %56 = vector.load %arg8[%c0_27, %c0_28] : memref<1x4096xf32, #tpu.memory_space<vmem>>, vector<1x4096xf32>
    %57 = vector.broadcast %56 : vector<1x4096xf32> to vector<2x4096xf32>
    %58 = arith.mulf %55, %57 : vector<2x4096xf32>
    %c0_29 = arith.constant 0 : index
    %c0_30 = arith.constant 0 : index
    %59 = vector.load %arg9[%c0_29, %c0_30] : memref<1x4096xf32, #tpu.memory_space<vmem>>, vector<1x4096xf32>
    %60 = vector.broadcast %59 : vector<1x4096xf32> to vector<2x4096xf32>
    %61 = arith.addf %58, %60 : vector<2x4096xf32>
    %cst_31 = arith.constant 0.000000e+00 : f32
    %62 = vector.broadcast %cst_31 : f32 to vector<2x4096xf32>
    %63 = arith.maximumf %61, %62 : vector<2x4096xf32>
    %c0_32 = arith.constant 0 : index
    %c0_33 = arith.constant 0 : index
    %64 = vector.load %arg10[%c0_32, %c0_33] : memref<2x4096xf32, #tpu.memory_space<vmem>>, vector<2x4096xf32>
    tpu.vector_store %arg10[%c0_32, %c0_33], %63 {strides = array<i32>} : memref<2x4096xf32, #tpu.memory_space<vmem>>, vector<2x4096xf32>,
    return
  }
  func.func @transform_0(%arg0: i32) -> (i32, i32) {
    %c0_i32 = arith.constant 0 : i32
    %c0_i32_0 = arith.constant 0 : i32
    %c0_i32_1 = arith.constant 0 : i32
    return %c0_i32, %c0_i32_0 : i32, i32
  }
  func.func @transform_1(%arg0: i32) -> (i32, i32) {
    %c0_i32 = arith.constant 0 : i32
    %c0_i32_0 = arith.constant 0 : i32
    %c0_i32_1 = arith.constant 0 : i32
    return %c0_i32, %c0_i32_0 : i32, i32
  }
  func.func @transform_2(%arg0: i32) -> (i32, i32) {
    %c0_i32 = arith.constant 0 : i32
    %c0_i32_0 = arith.constant 0 : i32
    %c0_i32_1 = arith.constant 0 : i32
    return %c0_i32, %c0_i32_0 : i32, i32
  }
  func.func @transform_3(%arg0: i32) -> (i32, i32) {
    %c0_i32 = arith.constant 0 : i32
    %c0_i32_0 = arith.constant 0 : i32
    %c0_i32_1 = arith.constant 0 : i32
    return %c0_i32, %c0_i32_0 : i32, i32
  }
  func.func @transform_4(%arg0: i32) -> (i32, i32) {
    %c0_i32 = arith.constant 0 : i32
    %c0_i32_0 = arith.constant 0 : i32
    %c0_i32_1 = arith.constant 0 : i32
    return %c0_i32, %c0_i32_0 : i32, i32
  }
  func.func @transform_5(%arg0: i32) -> (i32, i32) {
    %c0_i32 = arith.constant 0 : i32
    %c0_i32_0 = arith.constant 0 : i32
    %c0_i32_1 = arith.constant 0 : i32
    return %c0_i32, %c0_i32_0 : i32, i32
  }
  func.func @transform_6(%arg0: i32) -> (i32, i32) {
    %c0_i32 = arith.constant 0 : i32
    %c0_i32_0 = arith.constant 0 : i32
    %c0_i32_1 = arith.constant 0 : i32
    return %c0_i32, %c0_i32_0 : i32, i32
  }
  func.func @transform_7(%arg0: i32) -> (i32, i32) {
    %c0_i32 = arith.constant 0 : i32
    %c0_i32_0 = arith.constant 0 : i32
    %c0_i32_1 = arith.constant 0 : i32
    return %c0_i32, %c0_i32_0 : i32, i32
  }
  func.func @transform_8(%arg0: i32) -> (i32, i32) {
    %c0_i32 = arith.constant 0 : i32
    %c0_i32_0 = arith.constant 0 : i32
    %c0_i32_1 = arith.constant 0 : i32
    return %c0_i32, %c0_i32_0 : i32, i32
  }
  func.func @transform_9(%arg0: i32) -> (i32, i32) {
    %c0_i32 = arith.constant 0 : i32
    %c0_i32_0 = arith.constant 0 : i32
    %c0_i32_1 = arith.constant 0 : i32
    return %c0_i32, %c0_i32_0 : i32, i32
  }
  func.func @transform_10(%arg0: i32) -> (i32, i32) {
    %c0_i32 = arith.constant 0 : i32
    %c0_i32_0 = arith.constant 0 : i32
    %c0_i32_1 = arith.constant 0 : i32
    return %c0_i32, %c0_i32_0 : i32, i32
  }
}

module attributes {stable_mosaic.version = 11 : i64} {
  func.func @_up_conv_kernel(%arg0: i32, %arg1: memref<64x384xf32, #tpu.memory_space<vmem>>, %arg2: memref<9x16x64xf32, #tpu.memory_space<vmem>>, %arg3: memref<16x1xf32, #tpu.memory_space<vmem>>, %arg4: memref<16x256xf32, #tpu.memory_space<vmem>>) attributes {dimension_semantics = [#tpu.dimension_semantics<arbitrary>], iteration_bounds = array<i64: 1>, scalar_prefetch = 0 : i64, scratch_operands = 0 : i64, tpu.core_type = #tpu.core_type<tc>, window_params = [{pipeline_mode = #tpu.pipeline_mode<synchronous>, transform_indices = @transform_0, window_bounds = array<i64: 64, 384>}, {pipeline_mode = #tpu.pipeline_mode<synchronous>, transform_indices = @transform_1, window_bounds = array<i64: 9, 16, 64>}, {pipeline_mode = #tpu.pipeline_mode<synchronous>, transform_indices = @transform_2, window_bounds = array<i64: 16, 1>}, {pipeline_mode = #tpu.pipeline_mode<synchronous>, transform_indices = @transform_3, window_bounds = array<i64: 16, 256>}]} {
    %c0 = arith.constant 0 : index
    %c0_0 = arith.constant 0 : index
    %0 = vector.load %arg1[%c0, %c0_0] : memref<64x384xf32, #tpu.memory_space<vmem>>, vector<64x384xf32>
    %cst = arith.constant 0.000000e+00 : f32
    %1 = vector.broadcast %cst : f32 to vector<16x256xf32>
    %c0_1 = arith.constant 0 : index
    %c0_2 = arith.constant 0 : index
    %c0_3 = arith.constant 0 : index
    %2 = vector.load %arg2[%c0_1, %c0_2, %c0_3] : memref<9x16x64xf32, #tpu.memory_space<vmem>>, vector<1x16x64xf32>
    %3 = vector.shape_cast %2 : vector<1x16x64xf32> to vector<16x64xf32>
    %4 = vector.extract_strided_slice %0 {offsets = [0, 0], sizes = [64, 256], strides = [1, 1]} : vector<64x384xf32> to vector<64x256xf32>
    %cst_4 = arith.constant dense<0.000000e+00> : vector<16x256xf32>
    %5 = tpu.matmul %3, %4, %cst_4 {dimension_numbers = #tpu.dot_dimension_numbers<[1], [0], [0], [1], [0, 0, 1, 1], [], []>} : vector<16x64xf32>, vector<64x256xf32>, vector<16x256xf32> -> vector<16x256xf32>
    %6 = arith.addf %1, %5 : vector<16x256xf32>
    %c1 = arith.constant 1 : index
    %c0_5 = arith.constant 0 : index
    %c0_6 = arith.constant 0 : index
    %7 = vector.load %arg2[%c1, %c0_5, %c0_6] : memref<9x16x64xf32, #tpu.memory_space<vmem>>, vector<1x16x64xf32>
    %8 = vector.shape_cast %7 : vector<1x16x64xf32> to vector<16x64xf32>
    %9 = vector.extract_strided_slice %0 {offsets = [0, 1], sizes = [64, 256], strides = [1, 1]} : vector<64x384xf32> to vector<64x256xf32>
    %cst_7 = arith.constant dense<0.000000e+00> : vector<16x256xf32>
    %10 = tpu.matmul %8, %9, %cst_7 {dimension_numbers = #tpu.dot_dimension_numbers<[1], [0], [0], [1], [0, 0, 1, 1], [], []>} : vector<16x64xf32>, vector<64x256xf32>, vector<16x256xf32> -> vector<16x256xf32>
    %11 = arith.addf %6, %10 : vector<16x256xf32>
    %c2 = arith.constant 2 : index
    %c0_8 = arith.constant 0 : index
    %c0_9 = arith.constant 0 : index
    %12 = vector.load %arg2[%c2, %c0_8, %c0_9] : memref<9x16x64xf32, #tpu.memory_space<vmem>>, vector<1x16x64xf32>
    %13 = vector.shape_cast %12 : vector<1x16x64xf32> to vector<16x64xf32>
    %14 = vector.extract_strided_slice %0 {offsets = [0, 2], sizes = [64, 256], strides = [1, 1]} : vector<64x384xf32> to vector<64x256xf32>
    %cst_10 = arith.constant dense<0.000000e+00> : vector<16x256xf32>
    %15 = tpu.matmul %13, %14, %cst_10 {dimension_numbers = #tpu.dot_dimension_numbers<[1], [0], [0], [1], [0, 0, 1, 1], [], []>} : vector<16x64xf32>, vector<64x256xf32>, vector<16x256xf32> -> vector<16x256xf32>
    %16 = arith.addf %11, %15 : vector<16x256xf32>
    %c3 = arith.constant 3 : index
    %c0_11 = arith.constant 0 : index
    %c0_12 = arith.constant 0 : index
    %17 = vector.load %arg2[%c3, %c0_11, %c0_12] : memref<9x16x64xf32, #tpu.memory_space<vmem>>, vector<1x16x64xf32>
    %18 = vector.shape_cast %17 : vector<1x16x64xf32> to vector<16x64xf32>
    %19 = vector.extract_strided_slice %0 {offsets = [0, 10], sizes = [64, 256], strides = [1, 1]} : vector<64x384xf32> to vector<64x256xf32>
    %cst_13 = arith.constant dense<0.000000e+00> : vector<16x256xf32>
    %20 = tpu.matmul %18, %19, %cst_13 {dimension_numbers = #tpu.dot_dimension_numbers<[1], [0], [0], [1], [0, 0, 1, 1], [], []>} : vector<16x64xf32>, vector<64x256xf32>, vector<16x256xf32> -> vector<16x256xf32>
    %21 = arith.addf %16, %20 : vector<16x256xf32>
    %c4 = arith.constant 4 : index
    %c0_14 = arith.constant 0 : index
    %c0_15 = arith.constant 0 : index
    %22 = vector.load %arg2[%c4, %c0_14, %c0_15] : memref<9x16x64xf32, #tpu.memory_space<vmem>>, vector<1x16x64xf32>
    %23 = vector.shape_cast %22 : vector<1x16x64xf32> to vector<16x64xf32>
    %24 = vector.extract_strided_slice %0 {offsets = [0, 11], sizes = [64, 256], strides = [1, 1]} : vector<64x384xf32> to vector<64x256xf32>
    %cst_16 = arith.constant dense<0.000000e+00> : vector<16x256xf32>
    %25 = tpu.matmul %23, %24, %cst_16 {dimension_numbers = #tpu.dot_dimension_numbers<[1], [0], [0], [1], [0, 0, 1, 1], [], []>} : vector<16x64xf32>, vector<64x256xf32>, vector<16x256xf32> -> vector<16x256xf32>
    %26 = arith.addf %21, %25 : vector<16x256xf32>
    %c5 = arith.constant 5 : index
    %c0_17 = arith.constant 0 : index
    %c0_18 = arith.constant 0 : index
    %27 = vector.load %arg2[%c5, %c0_17, %c0_18] : memref<9x16x64xf32, #tpu.memory_space<vmem>>, vector<1x16x64xf32>
    %28 = vector.shape_cast %27 : vector<1x16x64xf32> to vector<16x64xf32>
    %29 = vector.extract_strided_slice %0 {offsets = [0, 12], sizes = [64, 256], strides = [1, 1]} : vector<64x384xf32> to vector<64x256xf32>
    %cst_19 = arith.constant dense<0.000000e+00> : vector<16x256xf32>
    %30 = tpu.matmul %28, %29, %cst_19 {dimension_numbers = #tpu.dot_dimension_numbers<[1], [0], [0], [1], [0, 0, 1, 1], [], []>} : vector<16x64xf32>, vector<64x256xf32>, vector<16x256xf32> -> vector<16x256xf32>
    %31 = arith.addf %26, %30 : vector<16x256xf32>
    %c6 = arith.constant 6 : index
    %c0_20 = arith.constant 0 : index
    %c0_21 = arith.constant 0 : index
    %32 = vector.load %arg2[%c6, %c0_20, %c0_21] : memref<9x16x64xf32, #tpu.memory_space<vmem>>, vector<1x16x64xf32>
    %33 = vector.shape_cast %32 : vector<1x16x64xf32> to vector<16x64xf32>
    %34 = vector.extract_strided_slice %0 {offsets = [0, 20], sizes = [64, 256], strides = [1, 1]} : vector<64x384xf32> to vector<64x256xf32>
    %cst_22 = arith.constant dense<0.000000e+00> : vector<16x256xf32>
    %35 = tpu.matmul %33, %34, %cst_22 {dimension_numbers = #tpu.dot_dimension_numbers<[1], [0], [0], [1], [0, 0, 1, 1], [], []>} : vector<16x64xf32>, vector<64x256xf32>, vector<16x256xf32> -> vector<16x256xf32>
    %36 = arith.addf %31, %35 : vector<16x256xf32>
    %c7 = arith.constant 7 : index
    %c0_23 = arith.constant 0 : index
    %c0_24 = arith.constant 0 : index
    %37 = vector.load %arg2[%c7, %c0_23, %c0_24] : memref<9x16x64xf32, #tpu.memory_space<vmem>>, vector<1x16x64xf32>
    %38 = vector.shape_cast %37 : vector<1x16x64xf32> to vector<16x64xf32>
    %39 = vector.extract_strided_slice %0 {offsets = [0, 21], sizes = [64, 256], strides = [1, 1]} : vector<64x384xf32> to vector<64x256xf32>
    %cst_25 = arith.constant dense<0.000000e+00> : vector<16x256xf32>
    %40 = tpu.matmul %38, %39, %cst_25 {dimension_numbers = #tpu.dot_dimension_numbers<[1], [0], [0], [1], [0, 0, 1, 1], [], []>} : vector<16x64xf32>, vector<64x256xf32>, vector<16x256xf32> -> vector<16x256xf32>
    %41 = arith.addf %36, %40 : vector<16x256xf32>
    %c8 = arith.constant 8 : index
    %c0_26 = arith.constant 0 : index
    %c0_27 = arith.constant 0 : index
    %42 = vector.load %arg2[%c8, %c0_26, %c0_27] : memref<9x16x64xf32, #tpu.memory_space<vmem>>, vector<1x16x64xf32>
    %43 = vector.shape_cast %42 : vector<1x16x64xf32> to vector<16x64xf32>
    %44 = vector.extract_strided_slice %0 {offsets = [0, 22], sizes = [64, 256], strides = [1, 1]} : vector<64x384xf32> to vector<64x256xf32>
    %cst_28 = arith.constant dense<0.000000e+00> : vector<16x256xf32>
    %45 = tpu.matmul %43, %44, %cst_28 {dimension_numbers = #tpu.dot_dimension_numbers<[1], [0], [0], [1], [0, 0, 1, 1], [], []>} : vector<16x64xf32>, vector<64x256xf32>, vector<16x256xf32> -> vector<16x256xf32>
    %46 = arith.addf %41, %45 : vector<16x256xf32>
    %c0_29 = arith.constant 0 : index
    %c0_30 = arith.constant 0 : index
    %47 = vector.load %arg3[%c0_29, %c0_30] : memref<16x1xf32, #tpu.memory_space<vmem>>, vector<16x1xf32>
    %48 = vector.broadcast %47 : vector<16x1xf32> to vector<16x256xf32>
    %49 = arith.addf %46, %48 : vector<16x256xf32>
    %c0_31 = arith.constant 0 : index
    %c0_32 = arith.constant 0 : index
    %50 = vector.load %arg4[%c0_31, %c0_32] : memref<16x256xf32, #tpu.memory_space<vmem>>, vector<16x256xf32>
    tpu.vector_store %arg4[%c0_31, %c0_32], %49 {strides = array<i32>} : memref<16x256xf32, #tpu.memory_space<vmem>>, vector<16x256xf32>,
    return
  }
  func.func @transform_0(%arg0: i32) -> (i32, i32) {
    %c0_i32 = arith.constant 0 : i32
    %c0_i32_0 = arith.constant 0 : i32
    %c0_i32_1 = arith.constant 0 : i32
    return %c0_i32, %c0_i32_0 : i32, i32
  }
  func.func @transform_1(%arg0: i32) -> (i32, i32, i32) {
    %c0_i32 = arith.constant 0 : i32
    %c0_i32_0 = arith.constant 0 : i32
    %c0_i32_1 = arith.constant 0 : i32
    %c0_i32_2 = arith.constant 0 : i32
    return %c0_i32, %c0_i32_0, %c0_i32_1 : i32, i32, i32
  }
  func.func @transform_2(%arg0: i32) -> (i32, i32) {
    %c0_i32 = arith.constant 0 : i32
    %c0_i32_0 = arith.constant 0 : i32
    %c0_i32_1 = arith.constant 0 : i32
    return %c0_i32, %c0_i32_0 : i32, i32
  }
  func.func @transform_3(%arg0: i32) -> (i32, i32) {
    %c0_i32 = arith.constant 0 : i32
    %c0_i32_0 = arith.constant 0 : i32
    %c0_i32_1 = arith.constant 0 : i32
    return %c0_i32, %c0_i32_0 : i32, i32
  }
}

</mosaic_0001>

<bundles_post_ra>
// kernel: discriminator_forward.3
= control target key start
LH: loop header
LB: loop body
LE: loop exit
PB: predicated region body
PF: predicated region fallthrough
CT: control target
= control target key end

     0   :  { %vm100_vm0 = vcmask 1043456   ;;  %v286_v2 = vmov 0   ;;  %vm75_vm1 = vcmask 293888   ;;  %s402_s0 = inlined_call_operand.vmem [shape: f32[36,128], index: 0, kind: input, shape index: {}]   ;;  %s403_s1 = inlined_call_operand.vmem [shape: f32[64,36], index: 1, kind: input, shape index: {}]   ;;  %s404_s2 = inlined_call_operand.vmem [shape: f32[64,1], index: 2, kind: input, shape index: {}]   ;;  %s405_s3 = inlined_call_operand.vmem [shape: f32[64,128], index: 3, kind: output, shape index: {}]  }
   0x1   :  { %v26_v0 = vld [vmem:[%s402_s0 + $0x20] sm:$0xf]  ;;  %v25_v1 = vld [vmem:[%s402_s0 + $0x18] sm:$0xff]  ;;  %285 = vset.pattern.permute.xlu1 %v286_v2  ;;  %284 = vset.pattern.permute.xlu0 %v286_v2  ;;  %v24_v3 = vld [vmem:[%s402_s0 + $0x10] sm:$0xff] }
   0x2   :  { %251 = vmatprep.subr.msk.mxu0 %vm100_vm0, %v26_v0  ;;  %273 = vmatprep.subr.msk.mxu1 %vm100_vm0, %v26_v0  ;;  %v23_v4 = vld [vmem:[%s402_s0 + $0x8] sm:$0xff]  ;;  %v22_v5 = vld [vmem:[%s402_s0] sm:$0xff]  ;;  %v16_v10 = vld [vmem:[%s403_s1 + $0x10] sm:$0xff] }
   0x3   :  { %252 = vmatpush3.msk.msra.mxu0 %vm100_vm0, %v26_v0  ;;  %278 = vmatpush3.msk.msra.mxu1 %vm100_vm0, %v26_v0  ;;  %v14_v6 = vld [vmem:[%s403_s1] sm:$0xff]  ;;  %v15_v8 = vld [vmem:[%s403_s1 + $0x8] sm:$0xff]  ;;  %v20_v11 = vld [vmem:[%s403_s1 + $0x30] sm:$0xff] }
   0x4   :  { %253 = vmatprep.subr.mxu0 %v25_v1  ;;  %274 = vmatprep.subr.mxu1 %v25_v1  ;;  %v18_v7 = vld [vmem:[%s403_s1 + $0x20] sm:$0xff]  ;;  %v19_v9 = vld [vmem:[%s403_s1 + $0x28] sm:$0xff]  ;;  %v29_v12 = vld [vmem:[%s404_s2 + $0x10] sm:$0xff] }
   0x5   :  { %254 = vmatpush3.msra.mxu0 %v25_v1  ;;  %279 = vmatpush3.msra.mxu1 %v25_v1  ;;  %v27_v13 = vld [vmem:[%s404_s2] sm:$0xff]  ;;  %v17_v14 = vld [vmem:[%s403_s1 + $0x18] sm:$0xff]  ;;  %v28_v17 = vld [vmem:[%s404_s2 + $0x8] sm:$0xff] }
   0x6   :  { %255 = vmatprep.subr.mxu0 %v24_v3  ;;  %275 = vmatprep.subr.mxu1 %v24_v3  ;;  %v21_v15 = vld [vmem:[%s403_s1 + $0x38] sm:$0xff]  ;;  %v32_v18 = vld [vmem:[%s404_s2 + $0x28] sm:$0xff]  ;;  %v31_v19 = vld [vmem:[%s404_s2 + $0x20] sm:$0xff] }
   0x7   :  { %256 = vmatpush3.msra.mxu0 %v24_v3  ;;  %280 = vmatpush3.msra.mxu1 %v24_v3  ;;  %v30_v16 = vld [vmem:[%s404_s2 + $0x18] sm:$0xff]  ;;  %v33_v21 = vld [vmem:[%s404_s2 + $0x30] sm:$0xff] }
   0x8   :  { %257 = vmatprep.subr.mxu0 %v23_v4  ;;  %276 = vmatprep.subr.mxu1 %v23_v4  ;;  %v34_v20 = vld [vmem:[%s404_s2 + $0x38] sm:$0xff] }
   0x9   :  { %258 = vmatpush3.msra.mxu0 %v23_v4  ;;  %281 = vmatpush3.msra.mxu1 %v23_v4 }
   0xa   :  { %259 = vmatprep.subr.mxu0 %v22_v5  ;;  %277 = vmatprep.subr.mxu1 %v22_v5 }
   0xb   :  { %260 = vmatpush3.msra.mxu0 %v22_v5  ;;  %282 = vmatpush3.msra.mxu1 %v22_v5 }
   0xc   :  { %261 = vmatprep.mubr.msk.f32.mxu0 %vm75_vm1, %v14_v6  ;;  %267 = vmatprep.mubr.msk.f32.mxu1 %vm75_vm1, %v18_v7 }
   0xd   :  { %262 = vmatmul.mubr.msk.f32.vlgmr.msra.gmra.mxu0 %vm75_vm1, %v15_v8  ;;  %268 = vmatmul.mubr.msk.f32.vlgmr.msra.gmra.mxu1 %vm75_vm1, %v19_v9 }
   0xe   :  { %264 = vmatprep.mubr.msk.f32.mxu0 %vm75_vm1, %v16_v10  ;;  %270 = vmatprep.mubr.msk.f32.mxu1 %vm75_vm1, %v20_v11 }
   0xf   :  { %47 = vperm.xlu1 %285, %v29_v12   ;;  %37 = vperm.xlu0 %284, %v27_v13  }
  0x11   :  { %265 = vmatmul.mubr.msk.f32.gmra.mxu0 %vm75_vm1, %v17_v14  ;;  %271 = vmatmul.mubr.msk.f32.gmra.mxu1 %vm75_vm1, %v21_v15 }
  0x13   :  { %52 = vperm.xlu1 %285, %v30_v16   ;;  %42 = vperm.xlu0 %284, %v28_v17  }
  0x17   :  { %62 = vperm.xlu1 %285, %v32_v18   ;;  %57 = vperm.xlu0 %284, %v31_v19  }
  0x1b   :  { %72 = vperm.xlu1 %285, %v34_v20   ;;  %67 = vperm.xlu0 %284, %v33_v21  }
  0x8a   :  { %v48_v22 = vpop.permute.xlu1 %47  ;;  %v38_v23 = vpop.permute.xlu0 %37 }
  0x8e   :  { %v53_v24 = vpop.permute.xlu1 %52  ;;  %v43_v25 = vpop.permute.xlu0 %42 }
  0x92   :  { %v63_v26 = vpop.permute.xlu1 %62  ;;  %v58_v27 = vpop.permute.xlu0 %57 }
  0x96   :  { %v73_v34 = vpop.permute.xlu1 %72  ;;  %v68_v41 = vpop.permute.xlu0 %67 }
  0xcd   :  { %v263_v28 = vpop.f32.mrf.mxu0  ;;  %v269_v29 = vpop.f32.mrf.mxu1 }
  0xce   :  { %v176_v30 = vadd.f32 %v263_v28, %v43_v25  ;;  %v196_v31 = vadd.f32 %v269_v29, %v63_v26 }
  0xcf   :  { %v170_v32 = vpop.f32.mrf.mxu0  ;;  %v190_v33 = vpop.f32.mrf.mxu1 }
  0xd0   :  { %v210_v35 = vmax.f32 %v176_v30, 0.0  ;;  %v214_v36 = vmax.f32 %v196_v31, 0.0  ;;  %v171_v37 = vadd.f32 %v170_v32, %v38_v23  ;;  %v191_v38 = vadd.f32 %v190_v33, %v58_v27 }
  0xd1   :  { %v266_v39 = vpop.f32.mrf.mxu0  ;;  %v272_v40 = vpop.f32.mrf.mxu1 }
  0xd2   :  { %218 = vst [vmem:[%s405_s3 + $0x8] sm:$0xff] %v210_v35  ;;  %222 = vst [vmem:[%s405_s3 + $0x28] sm:$0xff] %v214_v36  ;;  %v209_v42 = vmax.f32 %v171_v37, 0.0  ;;  %v213_v43 = vmax.f32 %v191_v38, 0.0  ;;  %v186_v44 = vadd.f32 %v266_v39, %v53_v24  ;;  %v206_v45 = vadd.f32 %v272_v40, %v73_v34 }
  0xd3   :  { %v180_v46 = vpop.f32.mrf.mxu0  ;;  %v200_v47 = vpop.f32.mrf.mxu1 }
  0xd4   :  { %217 = vst [vmem:[%s405_s3] sm:$0xff] %v209_v42  ;;  %221 = vst [vmem:[%s405_s3 + $0x20] sm:$0xff] %v213_v43  ;;  %v212_v48 = vmax.f32 %v186_v44, 0.0  ;;  %v216_v49 = vmax.f32 %v206_v45, 0.0  ;;  %v181_v50 = vadd.f32 %v180_v46, %v48_v22  ;;  %v201_v51 = vadd.f32 %v200_v47, %v68_v41 }
  0xd6   :  { %220 = vst [vmem:[%s405_s3 + $0x18] sm:$0xff] %v212_v48  ;;  %224 = vst [vmem:[%s405_s3 + $0x38] sm:$0xff] %v216_v49  ;;  %v211_v52 = vmax.f32 %v181_v50, 0.0  ;;  %v215_v53 = vmax.f32 %v201_v51, 0.0 }
  0xd8   :  { %219 = vst [vmem:[%s405_s3 + $0x10] sm:$0xff] %v211_v52  ;;  %223 = vst [vmem:[%s405_s3 + $0x30] sm:$0xff] %v215_v53 }

// kernel: discriminator_forward.5
= control target key start
LH: loop header
LB: loop body
LE: loop exit
PB: predicated region body
PF: predicated region fallthrough
CT: control target
= control target key end

     0   :  { %s1612_s16 = smov 127   ;;  %s1613_s8 = smov 126   ;;  %v1614_v24 = vmov 0.0   ;;  %vm148_vm0 = vcmask 523264   ;;  %vm115_vm1 = vcmask 1039360   ;;  %vm366_vm2 = vcmask 1031168   ;;  %s2496_s0 = inlined_call_operand.vmem [shape: f32[64,384], index: 0, kind: input, shape index: {}]   ;;  %s2497_s1 = inlined_call_operand.vmem [shape: f32[9,16,64], index: 1, kind: input, shape index: {}]   ;;  %s2498_s2 = inlined_call_operand.vmem [shape: f32[16,1], index: 2, kind: input, shape index: {}]   ;;  %s2499_s3 = inlined_call_operand.vmem [shape: f32[16,256], index: 3, kind: output, shape index: {}]  }
   0x1   :  { %v1645_v0 = vld [vmem:[%s2496_s0 + $0x10] sm:$0xff]  ;;  %v1650_v1 = vld [vmem:[%s2496_s0] sm:$0xff]  ;;  %v1659_v2 = vld [vmem:[%s2496_s0 + $0x18] sm:$0xff]  ;;  %219 = vmatprep.mubr.f32.mxu0 %v1614_v24  ;;  %302 = vmatprep.mubr.f32.mxu1 %v1614_v24  ;;  %s1615_s10 = smov 118   ;;  %s1616_s13 = smov 117   ;;  %vm537_vm3 = vcmask 965632  }
   0x2   :  { %71 = vrot.lane.b32.xlu1 %v1645_v0, %s1612_s16  ;;  %67 = vrot.lane.b32.xlu0 %v1650_v1, %s1612_s16  ;;  %v1664_v3 = vld [vmem:[%s2496_s0 + $0x8] sm:$0xff]  ;;  %v1678_v5 = vld [vmem:[%s2496_s0 + $0x20] sm:$0xff]  ;;  %s1617_s14 = smov 116   ;;  %s1618_s22 = smov 108   ;;  %vm708_vm4 = vcmask 957440   ;;  %vm879_vm5 = vcmask 949248  }
   0x3   :  { %v1673_v4 = vld [vmem:[%s2496_s0 + $0x28] sm:$0xff]  ;;  %v1687_v6 = vld [vmem:[%s2496_s0 + $0xb0] sm:$0xff]  ;;  %v1692_v7 = vld [vmem:[%s2496_s0 + $0x38] sm:$0xff]  ;;  %s1619_s25 = smov 107   ;;  %s1620_s30 = smov 106   ;;  %vm1050_vm6 = vcmask 883712  }
   0x4   :  { %v1697_v8 = vld [vmem:[%s2496_s0 + $0x30] sm:$0xff]  ;;  %v1702_v9 = vld [vmem:[%s2496_s0 + $0xa8] sm:$0xff]  ;;  %254 = vmatprep.subr.mxu1 %v1687_v6  ;;  %v1708_v10 = vld [vmem:[%s2496_s0 + $0x98] sm:$0xff]  ;;  %vm1221_vm7 = vcmask 875520   ;;  %vm1392_vm8 = vcmask 867328  }
   0x5   :  { %255 = vmatpush1.msra.mxu1 %v1702_v9  ;;  %v1719_v11 = vld [vmem:[%s2496_s0 + $0x90] sm:$0xff]  ;;  %v1724_v12 = vld [vmem:[%s2496_s0 + $0x48] sm:$0xff]  ;;  %v1729_v13 = vld [vmem:[%s2496_s0 + $0x40] sm:$0xff] }
   0x6   :  { %73 = vrot.lane.b32.xlu1 %v1659_v2, %s1612_s16  ;;  %69 = vrot.lane.b32.xlu0 %v1664_v3, %s1612_s16  ;;  %v1734_v14 = vld [vmem:[%s2496_s0 + $0x80] sm:$0xff]  ;;  %v1740_v15 = vld [vmem:[%s2496_s0 + $0x78] sm:$0xff] }
   0x7   :  { %256 = vmatprep.subr.mxu1 %v1708_v10  ;;  %v1751_v16 = vld [vmem:[%s2496_s0 + $0x68] sm:$0xff]  ;;  %v1756_v17 = vld [vmem:[%s2496_s0 + $0x58] sm:$0xff]  ;;  %v1761_v18 = vld [vmem:[%s2496_s0 + $0x50] sm:$0xff] }
   0x8   :  { %257 = vmatpush1.msra.mxu1 %v1719_v11  ;;  %v1766_v19 = vld [vmem:[%s2496_s0 + $0x60] sm:$0xff]  ;;  %v1785_v20 = vld [vmem:[%s2496_s0 + $0x70] sm:$0xff]  ;;  %v1797_v21 = vld [vmem:[%s2496_s0 + $0x88] sm:$0xff] }
   0x9   :  { %258 = vmatprep.subr.mxu1 %v1734_v14  ;;  %v1811_v22 = vld [vmem:[%s2496_s0 + $0xa0] sm:$0xff]  ;;  %v1820_v23 = vld [vmem:[%s2496_s0 + $0xb8] sm:$0xff]  ;;  %v39_v38 = vld [vmem:[%s2497_s1 + $0x8] sm:$0xff] }
   0xa   :  { %77 = vrot.lane.b32.xlu1 %v1673_v4, %s1612_s16  ;;  %75 = vrot.lane.b32.xlu0 %v1678_v5, %s1612_s16  ;;  %v38_v25 = vld [vmem:[%s2497_s1] sm:$0xff] }
   0xb   :  { %259 = vmatpush1.msra.mxu1 %v1740_v15 }
   0xc   :  { %260 = vmatprep.subr.mxu1 %v1751_v16 }
   0xd   :  { %261 = vmatpush1.msra.mxu1 %v1766_v19 }
   0xe   :  { %81 = vrot.lane.b32.xlu1 %v1692_v7, %s1612_s16  ;;  %79 = vrot.lane.b32.xlu0 %v1697_v8, %s1612_s16 }
   0xf   :  { %262 = vmatprep.subr.mxu1 %v1761_v18 }
  0x10   :  { %263 = vmatpush1.msra.mxu1 %v1724_v12 }
  0x11   :  { %264 = vmatprep.subr.mxu1 %v1692_v7 }
  0x12   :  { %85 = vrot.lane.b32.xlu1 %v1724_v12, %s1612_s16  ;;  %83 = vrot.lane.b32.xlu0 %v1729_v13, %s1612_s16 }
  0x13   :  { %265 = vmatpush1.msra.mxu1 %v1697_v8 }
  0x14   :  { %266 = vmatprep.subr.mxu1 %v1678_v5 }
  0x15   :  { %267 = vmatpush1.msra.mxu1 %v1659_v2 }
  0x16   :  { %89 = vrot.lane.b32.xlu1 %v1756_v17, %s1612_s16  ;;  %87 = vrot.lane.b32.xlu0 %v1761_v18, %s1612_s16 }
  0x17   :  { %268 = vmatprep.subr.mxu1 %v1664_v3 }
  0x18   :  { %269 = vmatpush1.msra.mxu1 %v1650_v1 }
  0x19   :  { %1540 = vmatmul.mubr.msk.f32.vlgmr.msra.gmra.mxu1 %vm148_vm0, %v38_v25 }
  0x1a   :  { %93 = vrot.lane.b32.xlu1 %v1751_v16, %s1612_s16  ;;  %91 = vrot.lane.b32.xlu0 %v1766_v19, %s1612_s16 }
  0x1b   :  { %308 = vmatprep.mubr.f32.mxu1 %v1614_v24 }
  0x1d   :  { %1541 = vmatmul.mubr.msk.f32.gmra.mxu1 %vm148_vm0, %v39_v38 }
  0x1e   :  { %97 = vrot.lane.b32.xlu1 %v1740_v15, %s1612_s16  ;;  %95 = vrot.lane.b32.xlu0 %v1785_v20, %s1612_s16 }
  0x1f   :  { %640 = vmatprep.mubr.f32.mxu1 %v1614_v24 }
  0x22   :  { %101 = vrot.lane.b32.xlu1 %v1797_v21, %s1612_s16  ;;  %99 = vrot.lane.b32.xlu0 %v1734_v14, %s1612_s16 }
  0x26   :  { %105 = vrot.lane.b32.xlu1 %v1708_v10, %s1612_s16  ;;  %103 = vrot.lane.b32.xlu0 %v1719_v11, %s1612_s16 }
  0x2a   :  { %109 = vrot.lane.b32.xlu1 %v1702_v9, %s1612_s16  ;;  %107 = vrot.lane.b32.xlu0 %v1811_v22, %s1612_s16 }
  0x2e   :  { %113 = vrot.lane.b32.xlu1 %v1820_v23, %s1612_s16  ;;  %111 = vrot.lane.b32.xlu0 %v1687_v6, %s1612_s16 }
  0x32   :  { %320 = vrot.lane.b32.xlu1 %v1664_v3, %s1613_s8  ;;  %318 = vrot.lane.b32.xlu0 %v1650_v1, %s1613_s8 }
  0x36   :  { %324 = vrot.lane.b32.xlu1 %v1659_v2, %s1613_s8  ;;  %322 = vrot.lane.b32.xlu0 %v1645_v0, %s1613_s8 }
  0x3a   :  { %328 = vrot.lane.b32.xlu1 %v1673_v4, %s1613_s8  ;;  %326 = vrot.lane.b32.xlu0 %v1678_v5, %s1613_s8 }
  0x3e   :  { %332 = vrot.lane.b32.xlu1 %v1692_v7, %s1613_s8  ;;  %330 = vrot.lane.b32.xlu0 %v1697_v8, %s1613_s8 }
  0x42   :  { %336 = vrot.lane.b32.xlu1 %v1724_v12, %s1613_s8  ;;  %334 = vrot.lane.b32.xlu0 %v1729_v13, %s1613_s8 }
  0x46   :  { %362 = vrot.lane.b32.xlu1 %v1687_v6, %s1613_s8  ;;  %338 = vrot.lane.b32.xlu0 %v1761_v18, %s1613_s8 }
  0x4a   :  { %533 = vrot.lane.b32.xlu1 %v1687_v6, %s1615_s10  ;;  %364 = vrot.lane.b32.xlu0 %v1820_v23, %s1613_s8 }
  0x4e   :  { %360 = vrot.lane.b32.xlu1 %v1702_v9, %s1613_s8  ;;  %535 = vrot.lane.b32.xlu0 %v1820_v23, %s1615_s10 }
  0x52   :  { %356 = vrot.lane.b32.xlu1 %v1708_v10, %s1613_s8  ;;  %531 = vrot.lane.b32.xlu0 %v1702_v9, %s1615_s10 }
  0x56   :  { %527 = vrot.lane.b32.xlu1 %v1708_v10, %s1615_s10  ;;  %358 = vrot.lane.b32.xlu0 %v1811_v22, %s1613_s8 }
  0x5a   :  { %354 = vrot.lane.b32.xlu1 %v1719_v11, %s1613_s8  ;;  %529 = vrot.lane.b32.xlu0 %v1811_v22, %s1615_s10 }
  0x5e   :  { %350 = vrot.lane.b32.xlu1 %v1734_v14, %s1613_s8  ;;  %525 = vrot.lane.b32.xlu0 %v1719_v11, %s1615_s10 }
  0x62   :  { %521 = vrot.lane.b32.xlu1 %v1734_v14, %s1615_s10  ;;  %352 = vrot.lane.b32.xlu0 %v1797_v21, %s1613_s8 }
  0x66   :  { %348 = vrot.lane.b32.xlu1 %v1740_v15, %s1613_s8  ;;  %523 = vrot.lane.b32.xlu0 %v1797_v21, %s1615_s10 }
  0x6a   :  { %344 = vrot.lane.b32.xlu1 %v1751_v16, %s1613_s8  ;;  %519 = vrot.lane.b32.xlu0 %v1740_v15, %s1615_s10 }
  0x6e   :  { %515 = vrot.lane.b32.xlu1 %v1751_v16, %s1615_s10  ;;  %346 = vrot.lane.b32.xlu0 %v1785_v20, %s1613_s8 }
  0x72   :  { %342 = vrot.lane.b32.xlu1 %v1766_v19, %s1613_s8  ;;  %517 = vrot.lane.b32.xlu0 %v1785_v20, %s1615_s10 }
  0x74   :  { %v1901_v26 = vpop.permute.xlu1 %71  ;;  %v1903_v27 = vpop.permute.xlu0 %67 }
  0x76   :  { %340 = vrot.lane.b32.xlu1 %v1756_v17, %s1613_s8  ;;  %513 = vrot.lane.b32.xlu0 %v1766_v19, %s1615_s10 }
  0x78   :  { %v1909_v28 = vpop.permute.xlu1 %73  ;;  %v1911_v29 = vpop.permute.xlu0 %69 }
  0x7a   :  { %511 = vrot.lane.b32.xlu1 %v1756_v17, %s1615_s10  ;;  %509 = vrot.lane.b32.xlu0 %v1761_v18, %s1615_s10 }
  0x7c   :  { %v1917_v30 = vpop.permute.xlu1 %77  ;;  %v1919_v31 = vpop.permute.xlu0 %75 }
  0x7e   :  { %503 = vrot.lane.b32.xlu1 %v1692_v7, %s1615_s10  ;;  %507 = vrot.lane.b32.xlu0 %v1724_v12, %s1615_s10 }
  0x80   :  { %v1925_v32 = vpop.permute.xlu1 %81  ;;  %v1927_v33 = vpop.permute.xlu0 %79 }
  0x82   :  { %501 = vrot.lane.b32.xlu1 %v1697_v8, %s1615_s10  ;;  %505 = vrot.lane.b32.xlu0 %v1729_v13, %s1615_s10 }
  0x84   :  { %v1933_v34 = vpop.permute.xlu1 %85  ;;  %v1935_v35 = vpop.permute.xlu0 %83 }
  0x86   :  { %499 = vrot.lane.b32.xlu1 %v1673_v4, %s1615_s10  ;;  %497 = vrot.lane.b32.xlu0 %v1678_v5, %s1615_s10 }
  0x88   :  { %v90_v36 = vpop.permute.xlu1 %89  ;;  %v88_v37 = vpop.permute.xlu0 %87 }
  0x89   :  { %v123_v63 = vsel %vm115_vm1, %v88_v37, %v90_v36  ;;  %v122_v25 = vsel %vm115_vm1, %v1933_v34, %v88_v37  ;;  %v120_v36 = vsel %vm115_vm1, %v1927_v33, %v1925_v32  ;;  %v119_v34 = vsel %vm115_vm1, %v1919_v31, %v1917_v30  ;;  %v1536_v30 = vld [vmem:[%s2497_s1 + $0x10] sm:$0xff] }
  0x8a   :  { %491 = vrot.lane.b32.xlu1 %v1664_v3, %s1615_s10  ;;  %495 = vrot.lane.b32.xlu0 %v1659_v2, %s1615_s10 }
  0x8c   :  { %v94_v39 = vpop.permute.xlu1 %93  ;;  %v92_v40 = vpop.permute.xlu0 %91 }
  0x8d   :  { %v124_v62 = vsel %vm115_vm1, %v92_v40, %v94_v39 }
  0x8e   :  { %489 = vrot.lane.b32.xlu1 %v1650_v1, %s1615_s10  ;;  %493 = vrot.lane.b32.xlu0 %v1645_v0, %s1615_s10 }
  0x90   :  { %v98_v41 = vpop.permute.xlu1 %97  ;;  %v96_v42 = vpop.permute.xlu0 %95 }
  0x91   :  { %v125_v60 = vsel %vm115_vm1, %v94_v39, %v96_v42  ;;  %v121_v39 = vsel %vm115_vm1, %v1925_v32, %v1935_v35  ;;  %v118_v35 = vsel %vm115_vm1, %v1909_v28, %v1919_v31  ;;  %v117_v32 = vsel %vm115_vm1, %v1911_v29, %v1901_v26  ;;  %v1537_v31 = vld [vmem:[%s2497_s1 + $0x18] sm:$0xff] }
  0x92   :  { %706 = vrot.lane.b32.xlu1 %v1820_v23, %s1616_s13  ;;  %704 = vrot.lane.b32.xlu0 %v1687_v6, %s1616_s13 }
  0x94   :  { %v102_v43 = vpop.permute.xlu1 %101  ;;  %v100_v44 = vpop.permute.xlu0 %99 }
  0x95   :  { %v127_v57 = vsel %vm115_vm1, %v100_v44, %v102_v43  ;;  %v126_v58 = vsel %vm115_vm1, %v98_v41, %v100_v44  ;;  %v116_v41 = vsel %vm115_vm1, %v1903_v27, %v1911_v29 }
  0x96   :  { %877 = vrot.lane.b32.xlu1 %v1820_v23, %s1617_s14  ;;  %875 = vrot.lane.b32.xlu0 %v1687_v6, %s1617_s14 }
  0x98   :  { %v106_v45 = vpop.permute.xlu1 %105  ;;  %v104_v46 = vpop.permute.xlu0 %103 }
  0x99   :  { %v128_v56 = vsel %vm115_vm1, %v104_v46, %v106_v45 }
  0x9a   :  { %873 = vrot.lane.b32.xlu1 %v1702_v9, %s1617_s14  ;;  %702 = vrot.lane.b32.xlu0 %v1702_v9, %s1616_s13 }
  0x9c   :  { %v110_v47 = vpop.permute.xlu1 %109  ;;  %v108_v48 = vpop.permute.xlu0 %107 }
  0x9d   :  { %v129_v54 = vsel %vm115_vm1, %v106_v45, %v108_v48 }
  0x9e   :  { %700 = vrot.lane.b32.xlu1 %v1811_v22, %s1616_s13  ;;  %698 = vrot.lane.b32.xlu0 %v1708_v10, %s1616_s13 }
  0xa0   :  { %v114_v49 = vpop.permute.xlu1 %113  ;;  %v112_v50 = vpop.permute.xlu0 %111 }
  0xa1   :  { %v131_v51 = vsel %vm115_vm1, %v112_v50, %v114_v49  ;;  %v130_v52 = vsel %vm115_vm1, %v110_v47, %v112_v50 }
  0xa2   :  { %871 = vrot.lane.b32.xlu1 %v1811_v22, %s1617_s14  ;;  %869 = vrot.lane.b32.xlu0 %v1708_v10, %s1617_s14 }
  0xa3   :  { %171 = vmatprep.subr.mxu0 %v131_v51 }
  0xa4   :  { %172 = vmatpush1.msra.mxu0 %v130_v52  ;;  %v1976_v53 = vpop.permute.xlu1 %320  ;;  %v1979_v55 = vpop.permute.xlu0 %318 }
  0xa5   :  { %173 = vmatprep.subr.mxu0 %v129_v54 }
  0xa6   :  { %174 = vmatpush1.msra.mxu0 %v128_v56  ;;  %867 = vrot.lane.b32.xlu1 %v1719_v11, %s1617_s14 }
  0xa7   :  { %696 = vrot.lane.b32.xlu0 %v1719_v11, %s1616_s13  ;;  %175 = vmatprep.subr.mxu0 %v127_v57 }
  0xa8   :  { %176 = vmatpush1.msra.mxu0 %v126_v58  ;;  %v1988_v59 = vpop.permute.xlu1 %324  ;;  %v1991_v61 = vpop.permute.xlu0 %322 }
  0xa9   :  { %177 = vmatprep.subr.mxu0 %v125_v60 }
  0xaa   :  { %178 = vmatpush1.msra.mxu0 %v124_v62  ;;  %694 = vrot.lane.b32.xlu1 %v1797_v21, %s1616_s13 }
  0xab   :  { %692 = vrot.lane.b32.xlu0 %v1734_v14, %s1616_s13  ;;  %179 = vmatprep.subr.mxu0 %v123_v63 }
  0xac   :  { %180 = vmatpush1.msra.mxu0 %v122_v25  ;;  %v2001_v38 = vpop.permute.xlu1 %328  ;;  %v2006_v40 = vpop.permute.xlu0 %326 }
  0xad   :  { %181 = vmatprep.subr.mxu0 %v121_v39 }
  0xae   :  { %182 = vmatpush1.msra.mxu0 %v120_v36  ;;  %865 = vrot.lane.b32.xlu1 %v1797_v21, %s1617_s14 }
  0xaf   :  { %863 = vrot.lane.b32.xlu0 %v1734_v14, %s1617_s14  ;;  %183 = vmatprep.subr.mxu0 %v119_v34 }
  0xb0   :  { %184 = vmatpush1.msra.mxu0 %v118_v35  ;;  %v2021_v37 = vpop.permute.xlu1 %332  ;;  %v2026_v33 = vpop.permute.xlu0 %330 }
  0xb1   :  { %185 = vmatprep.subr.mxu0 %v117_v32 }
  0xb2   :  { %186 = vmatpush1.msra.mxu0 %v116_v41  ;;  %861 = vrot.lane.b32.xlu1 %v1740_v15, %s1617_s14 }
  0xb3   :  { %690 = vrot.lane.b32.xlu0 %v1740_v15, %s1616_s13  ;;  %1538 = vmatmul.mubr.msk.f32.vlgmr.msra.gmra.mxu0 %vm148_vm0, %v1536_v30 }
  0xb4   :  { %v2039_v26 = vpop.permute.xlu1 %336  ;;  %v2041_v28 = vpop.permute.xlu0 %334  ;;  %225 = vmatprep.mubr.f32.mxu0 %v1614_v24 }
  0xb6   :  { %688 = vrot.lane.b32.xlu1 %v1785_v20, %s1616_s13 }
  0xb7   :  { %686 = vrot.lane.b32.xlu0 %v1751_v16, %s1616_s13  ;;  %1539 = vmatmul.mubr.msk.f32.gmra.mxu0 %vm148_vm0, %v1537_v31 }
  0xb8   :  { %v363_v27 = vpop.permute.xlu1 %362  ;;  %v2052_v29 = vpop.permute.xlu0 %338  ;;  %469 = vmatprep.mubr.f32.mxu0 %v1614_v24 }
  0xba   :  { %859 = vrot.lane.b32.xlu1 %v1785_v20, %s1617_s14 }
  0xbb   :  { %857 = vrot.lane.b32.xlu0 %v1751_v16, %s1617_s14 }
  0xbc   :  { %v534_v42 = vpop.permute.xlu1 %533  ;;  %v365_v43 = vpop.permute.xlu0 %364 }
  0xbd   :  { %v382_v44 = vsel %vm366_vm2, %v363_v27, %v365_v43 }
  0xbe   :  { %855 = vrot.lane.b32.xlu1 %v1766_v19, %s1617_s14  ;;  %421 = vmatprep.subr.mxu0 %v382_v44 }
  0xbf   :  { %684 = vrot.lane.b32.xlu0 %v1766_v19, %s1616_s13 }
  0xc0   :  { %v361_v45 = vpop.permute.xlu1 %360  ;;  %v536_v46 = vpop.permute.xlu0 %535 }
  0xc1   :  { %v381_v47 = vsel %vm366_vm2, %v361_v45, %v363_v27  ;;  %v553_v48 = vsel %vm537_vm3, %v534_v42, %v536_v46 }
  0xc2   :  { %682 = vrot.lane.b32.xlu1 %v1756_v17, %s1616_s13  ;;  %422 = vmatpush1.msra.mxu0 %v381_v47 }
  0xc3   :  { %680 = vrot.lane.b32.xlu0 %v1761_v18, %s1616_s13  ;;  %592 = vmatprep.subr.mxu1 %v553_v48 }
  0xc4   :  { %v357_v49 = vpop.permute.xlu1 %356  ;;  %v532_v50 = vpop.permute.xlu0 %531 }
  0xc5   :  { %v552_v51 = vsel %vm537_vm3, %v532_v50, %v534_v42 }
  0xc6   :  { %853 = vrot.lane.b32.xlu1 %v1756_v17, %s1617_s14  ;;  %593 = vmatpush1.msra.mxu1 %v552_v51 }
  0xc7   :  { %851 = vrot.lane.b32.xlu0 %v1761_v18, %s1617_s14 }
  0xc8   :  { %v528_v52 = vpop.permute.xlu1 %527  ;;  %v359_v54 = vpop.permute.xlu0 %358 }
  0xc9   :  { %v380_v56 = vsel %vm366_vm2, %v357_v49, %v359_v54 }
  0xca   :  { %849 = vrot.lane.b32.xlu1 %v1724_v12, %s1617_s14  ;;  %423 = vmatprep.subr.mxu0 %v380_v56 }
  0xcb   :  { %678 = vrot.lane.b32.xlu0 %v1724_v12, %s1616_s13 }
  0xcc   :  { %v355_v57 = vpop.permute.xlu1 %354  ;;  %v530_v58 = vpop.permute.xlu0 %529 }
  0xcd   :  { %v379_v60 = vsel %vm366_vm2, %v355_v57, %v357_v49  ;;  %v551_v62 = vsel %vm537_vm3, %v528_v52, %v530_v58  ;;  %v373_v57 = vsel %vm366_vm2, %v2039_v26, %v2052_v29  ;;  %v370_v26 = vsel %vm366_vm2, %v2006_v40, %v2001_v38 }
  0xce   :  { %676 = vrot.lane.b32.xlu1 %v1729_v13, %s1616_s13  ;;  %424 = vmatpush1.msra.mxu0 %v379_v60  ;;  %v372_v60 = vsel %vm366_vm2, %v2021_v37, %v2041_v28  ;;  %v369_v28 = vsel %vm366_vm2, %v1988_v59, %v2006_v40  ;;  %v367_v38 = vsel %vm366_vm2, %v1979_v55, %v1976_v53  ;;  %v1543_v40 = vld [vmem:[%s2497_s1 + $0x28] sm:$0xff] }
  0xcf   :  { %674 = vrot.lane.b32.xlu0 %v1692_v7, %s1616_s13  ;;  %594 = vmatprep.subr.mxu1 %v551_v62 }
  0xd0   :  { %v351_v63 = vpop.permute.xlu1 %350  ;;  %v526_v25 = vpop.permute.xlu0 %525 }
  0xd1   :  { %v550_v39 = vsel %vm537_vm3, %v526_v25, %v528_v52 }
  0xd2   :  { %847 = vrot.lane.b32.xlu1 %v1729_v13, %s1617_s14  ;;  %595 = vmatpush1.msra.mxu1 %v550_v39 }
  0xd3   :  { %845 = vrot.lane.b32.xlu0 %v1692_v7, %s1617_s14 }
  0xd4   :  { %v522_v36 = vpop.permute.xlu1 %521  ;;  %v353_v34 = vpop.permute.xlu0 %352 }
  0xd5   :  { %v378_v35 = vsel %vm366_vm2, %v351_v63, %v353_v34 }
  0xd6   :  { %843 = vrot.lane.b32.xlu1 %v1697_v8, %s1617_s14  ;;  %425 = vmatprep.subr.mxu0 %v378_v35 }
  0xd7   :  { %672 = vrot.lane.b32.xlu0 %v1697_v8, %s1616_s13 }
  0xd8   :  { %v349_v32 = vpop.permute.xlu1 %348  ;;  %v524_v30 = vpop.permute.xlu0 %523 }
  0xd9   :  { %v377_v41 = vsel %vm366_vm2, %v349_v32, %v351_v63  ;;  %v549_v31 = vsel %vm537_vm3, %v522_v36, %v524_v30  ;;  %v371_v63 = vsel %vm366_vm2, %v2026_v33, %v2021_v37  ;;  %v368_v33 = vsel %vm366_vm2, %v1976_v53, %v1991_v61 }
  0xda   :  { %670 = vrot.lane.b32.xlu1 %v1673_v4, %s1616_s13  ;;  %426 = vmatpush1.msra.mxu0 %v377_v41 }
  0xdb   :  { %668 = vrot.lane.b32.xlu0 %v1678_v5, %s1616_s13  ;;  %596 = vmatprep.subr.mxu1 %v549_v31 }
  0xdc   :  { %v345_v27 = vpop.permute.xlu1 %344  ;;  %v520_v42 = vpop.permute.xlu0 %519 }
  0xdd   :  { %v548_v43 = vsel %vm537_vm3, %v520_v42, %v522_v36  ;;  %v1542_v36 = vld [vmem:[%s2497_s1 + $0x20] sm:$0xff] }
  0xde   :  { %841 = vrot.lane.b32.xlu1 %v1673_v4, %s1617_s14  ;;  %597 = vmatpush1.msra.mxu1 %v548_v43 }
  0xdf   :  { %839 = vrot.lane.b32.xlu0 %v1678_v5, %s1617_s14 }
  0xe0   :  { %v516_v44 = vpop.permute.xlu1 %515  ;;  %v347_v45 = vpop.permute.xlu0 %346 }
  0xe1   :  { %v376_v46 = vsel %vm366_vm2, %v345_v27, %v347_v45  ;;  %v1546_v45 = vld [vmem:[%s2497_s1 + $0x30] sm:$0xff] }
  0xe2   :  { %837 = vrot.lane.b32.xlu1 %v1659_v2, %s1617_s14  ;;  %427 = vmatprep.subr.mxu0 %v376_v46 }
  0xe3   :  { %666 = vrot.lane.b32.xlu0 %v1659_v2, %s1616_s13 }
  0xe4   :  { %v343_v47 = vpop.permute.xlu1 %342  ;;  %v518_v48 = vpop.permute.xlu0 %517 }
  0xe5   :  { %v375_v49 = vsel %vm366_vm2, %v343_v47, %v345_v27  ;;  %v547_v50 = vsel %vm537_vm3, %v516_v44, %v518_v48 }
  0xe6   :  { %664 = vrot.lane.b32.xlu1 %v1645_v0, %s1616_s13  ;;  %428 = vmatpush1.msra.mxu0 %v375_v49  ;;  %v1547_v49 = vld [vmem:[%s2497_s1 + $0x38] sm:$0xff] }
  0xe7   :  { %662 = vrot.lane.b32.xlu0 %v1664_v3, %s1616_s13  ;;  %598 = vmatprep.subr.mxu1 %v547_v50 }
  0xe8   :  { %v341_v51 = vpop.permute.xlu1 %340  ;;  %v514_v52 = vpop.permute.xlu0 %513 }
  0xe9   :  { %v546_v54 = vsel %vm537_vm3, %v514_v52, %v516_v44  ;;  %v374_v56 = vsel %vm366_vm2, %v2052_v29, %v341_v51 }
  0xea   :  { %835 = vrot.lane.b32.xlu1 %v1645_v0, %s1617_s14  ;;  %429 = vmatprep.subr.mxu0 %v374_v56 }
  0xeb   :  { %833 = vrot.lane.b32.xlu0 %v1664_v3, %s1617_s14  ;;  %599 = vmatpush1.msra.mxu1 %v546_v54 }
  0xec   :  { %430 = vmatpush1.msra.mxu0 %v373_v57  ;;  %v512_v58 = vpop.permute.xlu1 %511  ;;  %v510_v62 = vpop.permute.xlu0 %509 }
  0xed   :  { %431 = vmatprep.subr.mxu0 %v372_v60  ;;  %v545_v25 = vsel %vm537_vm3, %v510_v62, %v512_v58 }
  0xee   :  { %432 = vmatpush1.msra.mxu0 %v371_v63  ;;  %831 = vrot.lane.b32.xlu1 %v1650_v1, %s1617_s14 }
  0xef   :  { %660 = vrot.lane.b32.xlu0 %v1650_v1, %s1616_s13  ;;  %433 = vmatprep.subr.mxu0 %v370_v26 }
  0xf0   :  { %600 = vmatprep.subr.mxu1 %v545_v25  ;;  %434 = vmatpush1.msra.mxu0 %v369_v28  ;;  %v504_v37 = vpop.permute.xlu1 %503  ;;  %v508_v29 = vpop.permute.xlu0 %507 }
  0xf1   :  { %435 = vmatprep.subr.mxu0 %v368_v33  ;;  %v544_v39 = vsel %vm537_vm3, %v508_v29, %v510_v62 }
  0xf2   :  { %436 = vmatpush1.msra.mxu0 %v367_v38  ;;  %1048 = vrot.lane.b32.xlu1 %v1820_v23, %s1618_s22 }
  0xf3   :  { %1046 = vrot.lane.b32.xlu0 %v1687_v6, %s1618_s22  ;;  %601 = vmatpush1.msra.mxu1 %v544_v39 }
  0xf4   :  { %v502_v59 = vpop.permute.xlu1 %501  ;;  %v506_v61 = vpop.permute.xlu0 %505  ;;  %1544 = vmatmul.mubr.msk.f32.vlgmr.msra.gmra.mxu0 %vm148_vm0, %v1542_v36 }
  0xf5   :  { %v542_v53 = vsel %vm537_vm3, %v502_v59, %v504_v37  ;;  %v543_v55 = vsel %vm537_vm3, %v504_v37, %v506_v61  ;;  %475 = vmatprep.mubr.f32.mxu0 %v1614_v24 }
  0xf6   :  { %1219 = vrot.lane.b32.xlu1 %v1820_v23, %s1619_s25  ;;  %602 = vmatprep.subr.mxu1 %v543_v55 }
  0xf7   :  { %1217 = vrot.lane.b32.xlu0 %v1687_v6, %s1619_s25  ;;  %603 = vmatpush1.msra.mxu1 %v542_v53 }
  0xf8   :  { %v500_v34 = vpop.permute.xlu1 %499  ;;  %v498_v35 = vpop.permute.xlu0 %497  ;;  %1545 = vmatmul.mubr.msk.f32.gmra.mxu0 %vm148_vm0, %v1543_v40 }
  0xf9   :  { %v541_v32 = vsel %vm537_vm3, %v498_v35, %v500_v34  ;;  %811 = vmatprep.mubr.f32.mxu0 %v1614_v24 }
  0xfa   :  { %1215 = vrot.lane.b32.xlu1 %v1702_v9, %s1619_s25  ;;  %604 = vmatprep.subr.mxu1 %v541_v32 }
  0xfb   :  { %1044 = vrot.lane.b32.xlu0 %v1702_v9, %s1618_s22 }
  0xfc   :  { %v492_v30 = vpop.permute.xlu1 %491  ;;  %v496_v41 = vpop.permute.xlu0 %495 }
  0xfd   :  { %v540_v31 = vsel %vm537_vm3, %v496_v41, %v498_v35 }
  0xfe   :  { %1042 = vrot.lane.b32.xlu1 %v1811_v22, %s1618_s22  ;;  %605 = vmatpush1.msra.mxu1 %v540_v31 }
  0xff   :  { %1040 = vrot.lane.b32.xlu0 %v1708_v10, %s1618_s22 }
 0x100   :  { %v490_v27 = vpop.permute.xlu1 %489  ;;  %v494_v42 = vpop.permute.xlu0 %493 }
 0x101   :  { %v538_v43 = vsel %vm537_vm3, %v490_v27, %v492_v30  ;;  %v539_v44 = vsel %vm537_vm3, %v492_v30, %v494_v42 }
 0x102   :  { %1213 = vrot.lane.b32.xlu1 %v1811_v22, %s1619_s25  ;;  %606 = vmatprep.subr.mxu1 %v539_v44 }
 0x103   :  { %1211 = vrot.lane.b32.xlu0 %v1708_v10, %s1619_s25  ;;  %607 = vmatpush1.msra.mxu1 %v538_v43 }
 0x104   :  { %v707_v46 = vpop.permute.xlu1 %706  ;;  %v705_v47 = vpop.permute.xlu0 %704  ;;  %1548 = vmatmul.mubr.msk.f32.vlgmr.msra.gmra.mxu1 %vm148_vm0, %v1546_v45 }
 0x105   :  { %v724_v48 = vsel %vm708_vm4, %v705_v47, %v707_v46  ;;  %646 = vmatprep.mubr.f32.mxu1 %v1614_v24 }
 0x106   :  { %1209 = vrot.lane.b32.xlu1 %v1719_v11, %s1619_s25  ;;  %763 = vmatprep.subr.mxu0 %v724_v48 }
 0x107   :  { %1038 = vrot.lane.b32.xlu0 %v1719_v11, %s1618_s22 }
 0x108   :  { %v878_v50 = vpop.permute.xlu1 %877  ;;  %v876_v51 = vpop.permute.xlu0 %875  ;;  %1549 = vmatmul.mubr.msk.f32.gmra.mxu1 %vm148_vm0, %v1547_v49 }
 0x109   :  { %v895_v52 = vsel %vm879_vm5, %v876_v51, %v878_v50  ;;  %982 = vmatprep.mubr.f32.mxu1 %v1614_v24 }
 0x10a   :  { %1036 = vrot.lane.b32.xlu1 %v1797_v21, %s1618_s22  ;;  %934 = vmatprep.subr.mxu1 %v895_v52 }
 0x10b   :  { %1034 = vrot.lane.b32.xlu0 %v1734_v14, %s1618_s22 }
 0x10c   :  { %v874_v54 = vpop.permute.xlu1 %873  ;;  %v703_v56 = vpop.permute.xlu0 %702 }
 0x10d   :  { %v894_v57 = vsel %vm879_vm5, %v874_v54, %v876_v51  ;;  %v723_v58 = vsel %vm708_vm4, %v703_v56, %v705_v47 }
 0x10e   :  { %1207 = vrot.lane.b32.xlu1 %v1797_v21, %s1619_s25  ;;  %764 = vmatpush1.msra.mxu0 %v723_v58 }
 0x10f   :  { %1205 = vrot.lane.b32.xlu0 %v1734_v14, %s1619_s25  ;;  %935 = vmatpush1.msra.mxu1 %v894_v57 }
 0x110   :  { %v701_v60 = vpop.permute.xlu1 %700  ;;  %v699_v62 = vpop.permute.xlu0 %698 }
 0x111   :  { %v722_v63 = vsel %vm708_vm4, %v699_v62, %v701_v60 }
 0x112   :  { %1203 = vrot.lane.b32.xlu1 %v1740_v15, %s1619_s25  ;;  %765 = vmatprep.subr.mxu0 %v722_v63 }
 0x113   :  { %1032 = vrot.lane.b32.xlu0 %v1740_v15, %s1618_s22 }
 0x114   :  { %v872_v25 = vpop.permute.xlu1 %871  ;;  %v870_v26 = vpop.permute.xlu0 %869 }
 0x115   :  { %v893_v28 = vsel %vm879_vm5, %v870_v26, %v872_v25 }
 0x116   :  { %1030 = vrot.lane.b32.xlu1 %v1785_v20, %s1618_s22  ;;  %936 = vmatprep.subr.mxu1 %v893_v28 }
 0x117   :  { %1028 = vrot.lane.b32.xlu0 %v1751_v16, %s1618_s22 }
 0x118   :  { %v868_v37 = vpop.permute.xlu1 %867 }
 0x119   :  { %v892_v33 = vsel %vm879_vm5, %v868_v37, %v870_v26  ;;  %v697_v29 = vpop.permute.xlu0 %696 }
 0x11a   :  { %v721_v38 = vsel %vm708_vm4, %v697_v29, %v699_v62  ;;  %1201 = vrot.lane.b32.xlu1 %v1785_v20, %s1619_s25  ;;  %937 = vmatpush1.msra.mxu1 %v892_v33 }
 0x11b   :  { %1199 = vrot.lane.b32.xlu0 %v1751_v16, %s1619_s25  ;;  %766 = vmatpush1.msra.mxu0 %v721_v38 }
 0x11c   :  { %v695_v15 = vpop.permute.xlu1 %694 }
 0x11d   :  { %v693_v39 = vpop.permute.xlu0 %692 }
 0x11e   :  { %1197 = vrot.lane.b32.xlu1 %v1766_v19, %s1619_s25  ;;  %v720_v36 = vsel %vm708_vm4, %v693_v39, %v695_v15 }
 0x11f   :  { %1026 = vrot.lane.b32.xlu0 %v1766_v19, %s1618_s22  ;;  %767 = vmatprep.subr.mxu0 %v720_v36 }
 0x120   :  { %v866_v59 = vpop.permute.xlu1 %865 }
 0x121   :  { %v864_v61 = vpop.permute.xlu0 %863 }
 0x122   :  { %1024 = vrot.lane.b32.xlu1 %v1756_v17, %s1618_s22  ;;  %v891_v53 = vsel %vm879_vm5, %v864_v61, %v866_v59 }
 0x123   :  { %1022 = vrot.lane.b32.xlu0 %v1761_v18, %s1618_s22  ;;  %938 = vmatprep.subr.mxu1 %v891_v53  ;;  %v1599_v53 = vld [vmem:[%s2496_s0 + $0x60] sm:$0xff] }
 0x124   :  { %v862_v55 = vpop.permute.xlu1 %861 }
 0x125   :  { %v890_v40 = vsel %vm879_vm5, %v862_v55, %v864_v61  ;;  %v691_v34 = vpop.permute.xlu0 %690  ;;  %v1555_v61 = vld [vmem:[%s2497_s1 + $0x58] sm:$0xff] }
 0x126   :  { %v719_v35 = vsel %vm708_vm4, %v691_v34, %v693_v39  ;;  %1195 = vrot.lane.b32.xlu1 %v1756_v17, %s1619_s25  ;;  %939 = vmatpush1.msra.mxu1 %v890_v40  ;;  %v1554_v39 = vld [vmem:[%s2497_s1 + $0x50] sm:$0xff] }
 0x127   :  { %1193 = vrot.lane.b32.xlu0 %v1761_v18, %s1619_s25  ;;  %768 = vmatpush1.msra.mxu0 %v719_v35  ;;  %v1600_v35 = vld [vmem:[%s2496_s0 + $0x58] sm:$0xff] }
 0x128   :  { %v689_v19 = vpop.permute.xlu1 %688 }
 0x129   :  { %v687_v32 = vpop.permute.xlu0 %686 }
 0x12a   :  { %1191 = vrot.lane.b32.xlu1 %v1724_v12, %s1619_s25  ;;  %v718_v30 = vsel %vm708_vm4, %v687_v32, %v689_v19  ;;  %v1601_v19 = vld [vmem:[%s2496_s0 + $0x50] sm:$0xff] }
 0x12b   :  { %1020 = vrot.lane.b32.xlu0 %v1724_v12, %s1618_s22  ;;  %769 = vmatprep.subr.mxu0 %v718_v30 }
 0x12c   :  { %v860_v41 = vpop.permute.xlu1 %859 }
 0x12d   :  { %v858_v31 = vpop.permute.xlu0 %857 }
 0x12e   :  { %1018 = vrot.lane.b32.xlu1 %v1729_v13, %s1618_s22  ;;  %v889_v17 = vsel %vm879_vm5, %v858_v31, %v860_v41 }
 0x12f   :  { %1016 = vrot.lane.b32.xlu0 %v1692_v7, %s1618_s22  ;;  %940 = vmatprep.subr.mxu1 %v889_v17  ;;  %v1602_v17 = vld [vmem:[%s2496_s0 + $0x38] sm:$0xff] }
 0x130   :  { %v856_v18 = vpop.permute.xlu1 %855 }
 0x131   :  { %v888_v27 = vsel %vm879_vm5, %v856_v18, %v858_v31  ;;  %v685_v42 = vpop.permute.xlu0 %684  ;;  %v1603_v18 = vld [vmem:[%s2496_s0 + $0x48] sm:$0xff] }
 0x132   :  { %v717_v43 = vsel %vm708_vm4, %v685_v42, %v687_v32  ;;  %1189 = vrot.lane.b32.xlu1 %v1729_v13, %s1619_s25  ;;  %941 = vmatpush1.msra.mxu1 %v888_v27 }
 0x133   :  { %1187 = vrot.lane.b32.xlu0 %v1692_v7, %s1619_s25  ;;  %770 = vmatpush1.msra.mxu0 %v717_v43  ;;  %v1604_v43 = vld [vmem:[%s2496_s0 + $0x30] sm:$0xff] }
 0x134   :  { %v683_v12 = vpop.permute.xlu1 %682 }
 0x135   :  { %v681_v44 = vpop.permute.xlu0 %680 }
 0x136   :  { %1185 = vrot.lane.b32.xlu1 %v1697_v8, %s1619_s25  ;;  %v716_v45 = vsel %vm708_vm4, %v681_v44, %v683_v12 }
 0x137   :  { %1014 = vrot.lane.b32.xlu0 %v1697_v8, %s1618_s22  ;;  %771 = vmatprep.subr.mxu0 %v716_v45 }
 0x138   :  { %v854_v46 = vpop.permute.xlu1 %853 }
 0x139   :  { %v852_v47 = vpop.permute.xlu0 %851 }
 0x13a   :  { %1012 = vrot.lane.b32.xlu1 %v1673_v4, %s1618_s22  ;;  %v887_v13 = vsel %vm879_vm5, %v852_v47, %v854_v46 }
 0x13b   :  { %1010 = vrot.lane.b32.xlu0 %v1678_v5, %s1618_s22  ;;  %942 = vmatprep.subr.mxu1 %v887_v13 }
 0x13c   :  { %v850_v7 = vpop.permute.xlu1 %849 }
 0x13d   :  { %v886_v48 = vsel %vm879_vm5, %v850_v7, %v852_v47  ;;  %v679_v49 = vpop.permute.xlu0 %678  ;;  %v1606_v47 = vld [vmem:[%s2496_s0 + $0x28] sm:$0xff]  ;;  %v1621_v7 = vmov 0  }
 0x13e   :  { %v715_v50 = vsel %vm708_vm4, %v679_v49, %v681_v44  ;;  %1183 = vrot.lane.b32.xlu1 %v1673_v4, %s1619_s25  ;;  %943 = vmatpush1.msra.mxu1 %v886_v48  ;;  %v1605_v44 = vld [vmem:[%s2496_s0 + $0x40] sm:$0xff] }
 0x13f   :  { %1181 = vrot.lane.b32.xlu0 %v1678_v5, %s1619_s25  ;;  %772 = vmatpush1.msra.mxu0 %v715_v50  ;;  %v1607_v48 = vld [vmem:[%s2496_s0 + $0x20] sm:$0xff] }
 0x140   :  { %v677_v8 = vpop.permute.xlu1 %676  ;;  %1596 = vset.pattern.permute.xlu0 %v1621_v7  ;;  %1597 = vset.pattern.permute.xlu1 %v1621_v7 }
 0x141   :  { %v675_v51 = vpop.permute.xlu0 %674 }
 0x142   :  { %1179 = vrot.lane.b32.xlu1 %v1659_v2, %s1619_s25  ;;  %v714_v52 = vsel %vm708_vm4, %v675_v51, %v677_v8 }
 0x143   :  { %1008 = vrot.lane.b32.xlu0 %v1659_v2, %s1618_s22  ;;  %773 = vmatprep.subr.mxu0 %v714_v52  ;;  %v1608_v52 = vld [vmem:[%s2496_s0 + $0x8] sm:$0xff] }
 0x144   :  { %v848_v54 = vpop.permute.xlu1 %847 }
 0x145   :  { %v846_v56 = vpop.permute.xlu0 %845 }
 0x146   :  { %1006 = vrot.lane.b32.xlu1 %v1645_v0, %s1618_s22  ;;  %v885_v4 = vsel %vm879_vm5, %v846_v56, %v848_v54  ;;  %v1609_v54 = vld [vmem:[%s2496_s0 + $0x18] sm:$0xff] }
 0x147   :  { %1004 = vrot.lane.b32.xlu0 %v1664_v3, %s1618_s22  ;;  %944 = vmatprep.subr.mxu1 %v885_v4 }
 0x148   :  { %v844_v5 = vpop.permute.xlu1 %843 }
 0x149   :  { %v884_v57 = vsel %vm879_vm5, %v844_v5, %v846_v56  ;;  %v673_v58 = vpop.permute.xlu0 %672  ;;  %v1610_v5 = vld [vmem:[%s2496_s0] sm:$0xff] }
 0x14a   :  { %v713_v60 = vsel %vm708_vm4, %v673_v58, %v675_v51  ;;  %1177 = vrot.lane.b32.xlu1 %v1645_v0, %s1619_s25  ;;  %945 = vmatpush1.msra.mxu1 %v884_v57  ;;  %v1611_v58 = vld [vmem:[%s2496_s0 + $0x10] sm:$0xff] }
 0x14b   :  { %1175 = vrot.lane.b32.xlu0 %v1664_v3, %s1619_s25  ;;  %774 = vmatpush1.msra.mxu0 %v713_v60  ;;  %v1513_v60 = vld [vmem:[%s2498_s2 + $0x8] sm:$0xff] }
 0x14c   :  { %v671_v2 = vpop.permute.xlu1 %670 }
 0x14d   :  { %v669_v62 = vpop.permute.xlu0 %668 }
 0x14e   :  { %1173 = vrot.lane.b32.xlu1 %v1650_v1, %s1619_s25  ;;  %v712_v63 = vsel %vm708_vm4, %v669_v62, %v671_v2 }
 0x14f   :  { %1002 = vrot.lane.b32.xlu0 %v1650_v1, %s1618_s22  ;;  %775 = vmatprep.subr.mxu0 %v712_v63 }
 0x150   :  { %v842_v25 = vpop.permute.xlu1 %841 }
 0x151   :  { %v840_v26 = vpop.permute.xlu0 %839 }
 0x152   :  { %1390 = vrot.lane.b32.xlu1 %v1820_v23, %s1620_s30  ;;  %v883_v0 = vsel %vm879_vm5, %v840_v26, %v842_v25 }
 0x153   :  { %1388 = vrot.lane.b32.xlu0 %v1687_v6, %s1620_s30  ;;  %946 = vmatprep.subr.mxu1 %v883_v0 }
 0x154   :  { %v838_v3 = vpop.permute.xlu1 %837 }
 0x155   :  { %v882_v28 = vsel %vm879_vm5, %v838_v3, %v840_v26  ;;  %v667_v37 = vpop.permute.xlu0 %666 }
 0x156   :  { %v711_v33 = vsel %vm708_vm4, %v667_v37, %v669_v62  ;;  %1382 = vrot.lane.b32.xlu1 %v1708_v10, %s1620_s30  ;;  %947 = vmatpush1.msra.mxu1 %v882_v28  ;;  %v1512_v62 = vld [vmem:[%s2498_s2] sm:$0xff] }
 0x157   :  { %1386 = vrot.lane.b32.xlu0 %v1702_v9, %s1620_s30  ;;  %776 = vmatpush1.msra.mxu0 %v711_v33 }
 0x158   :  { %v665_v1 = vpop.permute.xlu1 %664 }
 0x159   :  { %v663_v23 = vpop.permute.xlu0 %662 }
 0x15a   :  { %1380 = vrot.lane.b32.xlu1 %v1719_v11, %s1620_s30  ;;  %v710_v6 = vsel %vm708_vm4, %v663_v23, %v665_v1 }
 0x15b   :  { %1384 = vrot.lane.b32.xlu0 %v1811_v22, %s1620_s30  ;;  %777 = vmatprep.subr.mxu0 %v710_v6  ;;  %v1550_v22 = vld [vmem:[%s2497_s1 + $0x40] sm:$0xff] }
 0x15c   :  { %v836_v29 = vpop.permute.xlu1 %835 }
 0x15d   :  { %v834_v38 = vpop.permute.xlu0 %833 }
 0x15e   :  { %1378 = vrot.lane.b32.xlu1 %v1797_v21, %s1620_s30  ;;  %v881_v10 = vsel %vm879_vm5, %v834_v38, %v836_v29 }
 0x15f   :  { %1376 = vrot.lane.b32.xlu0 %v1734_v14, %s1620_s30  ;;  %948 = vmatprep.subr.mxu1 %v881_v10  ;;  %v1598_v14 = vld [vmem:[%s2496_s0 + $0x78] sm:$0xff] }
 0x160   :  { %v832_v9 = vpop.permute.xlu1 %831 }
 0x161   :  { %v880_v11 = vsel %vm879_vm5, %v832_v9, %v834_v38  ;;  %v661_v15 = vpop.permute.xlu0 %660 }
 0x162   :  { %v709_v21 = vsel %vm708_vm4, %v661_v15, %v663_v23  ;;  %1370 = vrot.lane.b32.xlu1 %v1751_v16, %s1620_s30  ;;  %949 = vmatpush1.msra.mxu1 %v880_v11  ;;  %v1551_v16 = vld [vmem:[%s2497_s1 + $0x48] sm:$0xff] }
 0x163   :  { %1374 = vrot.lane.b32.xlu0 %v1598_v14, %s1620_s30  ;;  %778 = vmatpush1.msra.mxu0 %v709_v21 }
 0x164   :  { %v1049_v36 = vpop.permute.xlu1 %1048  ;;  %1552 = vmatmul.mubr.msk.f32.vlgmr.msra.gmra.mxu0 %vm148_vm0, %v1550_v22  ;;  %1556 = vmatmul.mubr.msk.f32.vlgmr.msra.gmra.mxu1 %vm148_vm0, %v1554_v39 }
 0x165   :  { %v1047_v59 = vpop.permute.xlu0 %1046  ;;  %817 = vmatprep.mubr.f32.mxu0 %v1614_v24  ;;  %988 = vmatprep.mubr.f32.mxu1 %v1614_v24 }
 0x166   :  { %1368 = vrot.lane.b32.xlu1 %v1599_v53, %s1620_s30  ;;  %v1066_v55 = vsel %vm1050_vm6, %v1047_v59, %v1049_v36 }
 0x167   :  { %1372 = vrot.lane.b32.xlu0 %v1785_v20, %s1620_s30  ;;  %1105 = vmatprep.subr.mxu0 %v1066_v55 }
 0x168   :  { %v1220_v40 = vpop.permute.xlu1 %1219  ;;  %1553 = vmatmul.mubr.msk.f32.gmra.mxu0 %vm148_vm0, %v1551_v16  ;;  %1557 = vmatmul.mubr.msk.f32.gmra.mxu1 %vm148_vm0, %v1555_v61 }
 0x169   :  { %v1218_v34 = vpop.permute.xlu0 %1217  ;;  %1153 = vmatprep.mubr.f32.mxu0 %v1614_v24  ;;  %1324 = vmatprep.mubr.f32.mxu1 %v1614_v24 }
 0x16a   :  { %1366 = vrot.lane.b32.xlu1 %v1600_v35, %s1620_s30  ;;  %v1237_v20 = vsel %vm1221_vm7, %v1218_v34, %v1220_v40 }
 0x16b   :  { %1364 = vrot.lane.b32.xlu0 %v1601_v19, %s1620_s30  ;;  %1276 = vmatprep.subr.mxu1 %v1237_v20 }
 0x16c   :  { %v1216_v32 = vpop.permute.xlu1 %1215 }
 0x16d   :  { %v1236_v30 = vsel %vm1221_vm7, %v1216_v32, %v1218_v34  ;;  %v1045_v41 = vpop.permute.xlu0 %1044 }
 0x16e   :  { %v1065_v31 = vsel %vm1050_vm6, %v1045_v41, %v1047_v59  ;;  %1358 = vrot.lane.b32.xlu1 %v1602_v17, %s1620_s30  ;;  %1277 = vmatpush1.msra.mxu1 %v1236_v30 }
 0x16f   :  { %1362 = vrot.lane.b32.xlu0 %v1603_v18, %s1620_s30  ;;  %1106 = vmatpush1.msra.mxu0 %v1065_v31 }
 0x170   :  { %v1043_v27 = vpop.permute.xlu1 %1042 }
 0x171   :  { %v1041_v42 = vpop.permute.xlu0 %1040 }
 0x172   :  { %1356 = vrot.lane.b32.xlu1 %v1604_v43, %s1620_s30  ;;  %v1064_v12 = vsel %vm1050_vm6, %v1041_v42, %v1043_v27 }
 0x173   :  { %1360 = vrot.lane.b32.xlu0 %v1605_v44, %s1620_s30  ;;  %1107 = vmatprep.subr.mxu0 %v1064_v12 }
 0x174   :  { %v1214_v45 = vpop.permute.xlu1 %1213 }
 0x175   :  { %v1212_v46 = vpop.permute.xlu0 %1211 }
 0x176   :  { %1354 = vrot.lane.b32.xlu1 %v1606_v47, %s1620_s30  ;;  %v1235_v13 = vsel %vm1221_vm7, %v1212_v46, %v1214_v45 }
 0x177   :  { %1352 = vrot.lane.b32.xlu0 %v1607_v48, %s1620_s30  ;;  %1278 = vmatprep.subr.mxu1 %v1235_v13 }
 0x178   :  { %v1210_v49 = vpop.permute.xlu1 %1209 }
 0x179   :  { %v1234_v50 = vsel %vm1221_vm7, %v1210_v49, %v1212_v46  ;;  %v1039_v8 = vpop.permute.xlu0 %1038 }
 0x17a   :  { %v1063_v51 = vsel %vm1050_vm6, %v1039_v8, %v1041_v42  ;;  %1346 = vrot.lane.b32.xlu1 %v1608_v52, %s1620_s30  ;;  %1279 = vmatpush1.msra.mxu1 %v1234_v50  ;;  %v1562_v52 = vld [vmem:[%s2497_s1 + $0x70] sm:$0xff] }
 0x17b   :  { %1350 = vrot.lane.b32.xlu0 %v1609_v54, %s1620_s30  ;;  %1108 = vmatpush1.msra.mxu0 %v1063_v51 }
 0x17c   :  { %v1037_v56 = vpop.permute.xlu1 %1036 }
 0x17d   :  { %v1035_v4 = vpop.permute.xlu0 %1034 }
 0x17e   :  { %1344 = vrot.lane.b32.xlu1 %v1610_v5, %s1620_s30  ;;  %v1062_v57 = vsel %vm1050_vm6, %v1035_v4, %v1037_v56 }
 0x17f   :  { %1348 = vrot.lane.b32.xlu0 %v1611_v58, %s1620_s30  ;;  %1109 = vmatprep.subr.mxu0 %v1062_v57 }
 0x180   :  { %v1208_v2 = vpop.permute.xlu1 %1207 }
 0x181   :  { %v1206_v63 = vpop.permute.xlu0 %1205 }
 0x182   :  { %v1233_v25 = vsel %vm1221_vm7, %v1206_v63, %v1208_v2  ;;  %1521 = vperm.xlu1 %1597, %v1513_v60   ;;  %v1559_v60 = vld [vmem:[%s2497_s1 + $0x68] sm:$0xff]  ;;  %v1563_v2 = vld [vmem:[%s2497_s1 + $0x78] sm:$0xff] }
 0x183   :  { %1280 = vmatprep.subr.mxu1 %v1233_v25  ;;  %1516 = vperm.xlu0 %1596, %v1512_v62  }
 0x184   :  { %v1204_v26 = vpop.permute.xlu1 %1203 }
 0x185   :  { %v1232_v0 = vsel %vm1221_vm7, %v1204_v26, %v1206_v63  ;;  %v1033_v3 = vpop.permute.xlu0 %1032 }
 0x186   :  { %v1061_v28 = vsel %vm1050_vm6, %v1033_v3, %v1035_v4  ;;  %1281 = vmatpush1.msra.mxu1 %v1232_v0  ;;  %v1558_v4 = vld [vmem:[%s2497_s1 + $0x60] sm:$0xff] }
 0x187   :  { %1110 = vmatpush1.msra.mxu0 %v1061_v28 }
 0x188   :  { %v1031_v37 = vpop.permute.xlu1 %1030 }
 0x189   :  { %v1029_v33 = vpop.permute.xlu0 %1028 }
 0x18a   :  { %v1060_v1 = vsel %vm1050_vm6, %v1029_v33, %v1031_v37 }
 0x18b   :  { %1111 = vmatprep.subr.mxu0 %v1060_v1 }
 0x18c   :  { %v1202_v23 = vpop.permute.xlu1 %1201 }
 0x18d   :  { %v1200_v6 = vpop.permute.xlu0 %1199 }
 0x18e   :  { %v1231_v29 = vsel %vm1221_vm7, %v1200_v6, %v1202_v23 }
 0x18f   :  { %1282 = vmatprep.subr.mxu1 %v1231_v29 }
 0x190   :  { %v1198_v38 = vpop.permute.xlu1 %1197 }
 0x191   :  { %v1230_v10 = vsel %vm1221_vm7, %v1198_v38, %v1200_v6  ;;  %v1027_v9 = vpop.permute.xlu0 %1026 }
 0x192   :  { %v1059_v11 = vsel %vm1050_vm6, %v1027_v9, %v1029_v33  ;;  %1283 = vmatpush1.msra.mxu1 %v1230_v10 }
 0x193   :  { %1112 = vmatpush1.msra.mxu0 %v1059_v11 }
 0x194   :  { %v1025_v15 = vpop.permute.xlu1 %1024 }
 0x195   :  { %v1023_v22 = vpop.permute.xlu0 %1022 }
 0x196   :  { %v1058_v39 = vsel %vm1050_vm6, %v1023_v22, %v1025_v15 }
 0x197   :  { %1113 = vmatprep.subr.mxu0 %v1058_v39 }
 0x198   :  { %v1196_v21 = vpop.permute.xlu1 %1195 }
 0x199   :  { %v1194_v14 = vpop.permute.xlu0 %1193 }
 0x19a   :  { %v1229_v36 = vsel %vm1221_vm7, %v1194_v14, %v1196_v21 }
 0x19b   :  { %1284 = vmatprep.subr.mxu1 %v1229_v36 }
 0x19c   :  { %v1192_v59 = vpop.permute.xlu1 %1191 }
 0x19d   :  { %v1228_v16 = vsel %vm1221_vm7, %v1192_v59, %v1194_v14  ;;  %v1021_v61 = vpop.permute.xlu0 %1020 }
 0x19e   :  { %v1057_v53 = vsel %vm1050_vm6, %v1021_v61, %v1023_v22  ;;  %1285 = vmatpush1.msra.mxu1 %v1228_v16 }
 0x19f   :  { %1114 = vmatpush1.msra.mxu0 %v1057_v53 }
 0x1a0   :  { %v1019_v55 = vpop.permute.xlu1 %1018 }
 0x1a1   :  { %v1017_v40 = vpop.permute.xlu0 %1016 }
 0x1a2   :  { %v1056_v34 = vsel %vm1050_vm6, %v1017_v40, %v1019_v55 }
 0x1a3   :  { %1115 = vmatprep.subr.mxu0 %v1056_v34 }
 0x1a4   :  { %v1190_v35 = vpop.permute.xlu1 %1189 }
 0x1a5   :  { %v1188_v20 = vpop.permute.xlu0 %1187 }
 0x1a6   :  { %v1227_v19 = vsel %vm1221_vm7, %v1188_v20, %v1190_v35 }
 0x1a7   :  { %1286 = vmatprep.subr.mxu1 %v1227_v19 }
 0x1a8   :  { %v1186_v32 = vpop.permute.xlu1 %1185 }
 0x1a9   :  { %v1226_v30 = vsel %vm1221_vm7, %v1186_v32, %v1188_v20  ;;  %v1015_v41 = vpop.permute.xlu0 %1014 }
 0x1aa   :  { %v1055_v31 = vsel %vm1050_vm6, %v1015_v41, %v1017_v40  ;;  %1287 = vmatpush1.msra.mxu1 %v1226_v30 }
 0x1ab   :  { %1116 = vmatpush1.msra.mxu0 %v1055_v31 }
 0x1ac   :  { %v1013_v17 = vpop.permute.xlu1 %1012 }
 0x1ad   :  { %v1011_v18 = vpop.permute.xlu0 %1010 }
 0x1ae   :  { %v1054_v27 = vsel %vm1050_vm6, %v1011_v18, %v1013_v17  ;;  %v1566_v17 = vld [vmem:[%s2497_s1 + $0x80] sm:$0xff] }
 0x1af   :  { %1117 = vmatprep.subr.mxu0 %v1054_v27  ;;  %v221_v27 = vpop.f32.mrf.mxu0 }
 0x1b0   :  { %v1184_v42 = vpop.permute.xlu1 %1183 }
 0x1b1   :  { %v1182_v43 = vpop.permute.xlu0 %1181 }
 0x1b2   :  { %v1225_v12 = vsel %vm1221_vm7, %v1182_v43, %v1184_v42  ;;  %v223_v42 = vpop.f32.mrf.mxu0 }
 0x1b3   :  { %1288 = vmatprep.subr.mxu1 %v1225_v12 }
 0x1b4   :  { %v1180_v44 = vpop.permute.xlu1 %1179  ;;  %v227_v12 = vpop.f32.mrf.mxu0 }
 0x1b5   :  { %v1224_v45 = vsel %vm1221_vm7, %v1180_v44, %v1182_v43  ;;  %v1009_v46 = vpop.permute.xlu0 %1008  ;;  %v304_v43 = vpop.f32.mrf.mxu1 }
 0x1b6   :  { %v1053_v47 = vsel %vm1050_vm6, %v1009_v46, %v1011_v18  ;;  %1289 = vmatpush1.msra.mxu1 %v1224_v45  ;;  %v1567_v18 = vld [vmem:[%s2497_s1 + $0x88] sm:$0xff]  ;;  %v229_v45 = vpop.f32.mrf.mxu0 }
 0x1b7   :  { %1118 = vmatpush1.msra.mxu0 %v1053_v47  ;;  %v306_v44 = vpop.f32.mrf.mxu1 }
 0x1b8   :  { %v1007_v13 = vpop.permute.xlu1 %1006 }
 0x1b9   :  { %v1005_v7 = vpop.permute.xlu0 %1004  ;;  %v310_v46 = vpop.f32.mrf.mxu1 }
 0x1ba   :  { %v1052_v48 = vsel %vm1050_vm6, %v1005_v7, %v1007_v13  ;;  %v471_v13 = vpop.f32.mrf.mxu0 }
 0x1bb   :  { %1119 = vmatprep.subr.mxu0 %v1052_v48  ;;  %v312_v47 = vpop.f32.mrf.mxu1 }
 0x1bc   :  { %v1178_v49 = vpop.permute.xlu1 %1177 }
 0x1bd   :  { %v1176_v50 = vpop.permute.xlu0 %1175 }
 0x1be   :  { %v1223_v8 = vsel %vm1221_vm7, %v1176_v50, %v1178_v49 }
 0x1bf   :  { %1290 = vmatprep.subr.mxu1 %v1223_v8 }
 0x1c0   :  { %v1174_v51 = vpop.permute.xlu1 %1173 }
 0x1c1   :  { %v1222_v54 = vsel %vm1221_vm7, %v1174_v51, %v1176_v50  ;;  %v1003_v56 = vpop.permute.xlu0 %1002 }
 0x1c2   :  { %v1051_v5 = vsel %vm1050_vm6, %v1003_v56, %v1005_v7  ;;  %1291 = vmatpush1.msra.mxu1 %v1222_v54  ;;  %v473_v7 = vpop.f32.mrf.mxu0 }
 0x1c3   :  { %1120 = vmatpush1.msra.mxu0 %v1051_v5  ;;  %1564 = vmatmul.mubr.msk.f32.vlgmr.msra.gmra.mxu1 %vm148_vm0, %v1562_v52  ;;  %v311_v5 = vadd.f32 %v310_v46, %v227_v12 }
 0x1c4   :  { %1560 = vmatmul.mubr.msk.f32.vlgmr.msra.gmra.mxu0 %vm148_vm0, %v1558_v4  ;;  %v1391_v57 = vpop.permute.xlu1 %1390  ;;  %1330 = vmatprep.mubr.f32.mxu1 %v1614_v24  ;;  %v642_v48 = vpop.f32.mrf.mxu1 }
 0x1c5   :  { %v1389_v58 = vpop.permute.xlu0 %1388  ;;  %1159 = vmatprep.mubr.f32.mxu0 %v1614_v24  ;;  %v477_v49 = vpop.f32.mrf.mxu0 }
 0x1c6   :  { %v1408_v62 = vsel %vm1392_vm8, %v1389_v58, %v1391_v57  ;;  %v644_v50 = vpop.f32.mrf.mxu1 }
 0x1c7   :  { %1447 = vmatprep.subr.mxu0 %v1408_v62  ;;  %1570 = vmatprep.subr.mxu1 %v1408_v62  ;;  %v479_v8 = vpop.f32.mrf.mxu0  ;;  %v307_v62 = vadd.f32 %v306_v44, %v223_v42 }
 0x1c8   :  { %v1383_v63 = vpop.permute.xlu1 %1382  ;;  %1561 = vmatmul.mubr.msk.f32.gmra.mxu0 %vm148_vm0, %v1559_v60  ;;  %1565 = vmatmul.mubr.msk.f32.gmra.mxu1 %vm148_vm0, %v1563_v2  ;;  %v648_v51 = vpop.f32.mrf.mxu1  ;;  %v313_v60 = vadd.f32 %v312_v47, %v229_v45 }
 0x1c9   :  { %v1387_v25 = vpop.permute.xlu0 %1386  ;;  %1495 = vmatprep.mubr.f32.mxu0 %v1614_v24  ;;  %1501 = vmatprep.mubr.f32.mxu1 %v1614_v24 }
 0x1ca   :  { %v1407_v26 = vsel %vm1392_vm8, %v1387_v25, %v1389_v58  ;;  %v650_v52 = vpop.f32.mrf.mxu1  ;;  %v305_v58 = vadd.f32 %v304_v43, %v221_v27 }
 0x1cb   :  { %1448 = vmatpush1.msra.mxu0 %v1407_v26  ;;  %1578 = vmatpush1.msra.mxu1 %v1407_v26 }
 0x1cc   :  { %v1381_v0 = vpop.permute.xlu1 %1380 }
 0x1cd   :  { %v1405_v3 = vsel %vm1392_vm8, %v1381_v0, %v1383_v63  ;;  %v1385_v28 = vpop.permute.xlu0 %1384  ;;  %v482_v0 = vadd.f32 %v471_v13, %v305_v58 }
 0x1ce   :  { %v1406_v37 = vsel %vm1392_vm8, %v1383_v63, %v1385_v28  ;;  %v484_v63 = vadd.f32 %v477_v49, %v311_v5  ;;  %v483_v28 = vadd.f32 %v473_v7, %v307_v62 }
 0x1cf   :  { %1449 = vmatprep.subr.mxu0 %v1406_v37  ;;  %1571 = vmatprep.subr.mxu1 %v1406_v37 }
 0x1d0   :  { %1450 = vmatpush1.msra.mxu0 %v1405_v3  ;;  %1579 = vmatpush1.msra.mxu1 %v1405_v3  ;;  %v1379_v33 = vpop.permute.xlu1 %1378  ;;  %v485_v3 = vadd.f32 %v479_v8, %v313_v60  ;;  %v655_v37 = vadd.f32 %v648_v51, %v484_v63 }
 0x1d1   :  { %v1377_v1 = vpop.permute.xlu0 %1376 }
 0x1d2   :  { %v1404_v23 = vsel %vm1392_vm8, %v1377_v1, %v1379_v33 }
 0x1d3   :  { %1451 = vmatprep.subr.mxu0 %v1404_v23  ;;  %1572 = vmatprep.subr.mxu1 %v1404_v23  ;;  %v653_v23 = vadd.f32 %v642_v48, %v482_v0 }
 0x1d4   :  { %v1371_v24 = vpop.permute.xlu1 %1370 }
 0x1d5   :  { %v1375_v6 = vpop.permute.xlu0 %1374 }
 0x1d6   :  { %v1403_v29 = vsel %vm1392_vm8, %v1375_v6, %v1377_v1  ;;  %v654_v6 = vadd.f32 %v644_v50, %v483_v28 }
 0x1d7   :  { %1452 = vmatpush1.msra.mxu0 %v1403_v29  ;;  %1580 = vmatpush1.msra.mxu1 %v1403_v29 }
 0x1d8   :  { %v1369_v38 = vpop.permute.xlu1 %1368 }
 0x1d9   :  { %v1401_v10 = vsel %vm1392_vm8, %v1369_v38, %v1371_v24  ;;  %v1373_v9 = vpop.permute.xlu0 %1372 }
 0x1da   :  { %v1402_v11 = vsel %vm1392_vm8, %v1371_v24, %v1373_v9  ;;  %v656_v24 = vadd.f32 %v650_v52, %v485_v3 }
 0x1db   :  { %1453 = vmatprep.subr.mxu0 %v1402_v11  ;;  %1573 = vmatprep.subr.mxu1 %v1402_v11 }
 0x1dc   :  { %1454 = vmatpush1.msra.mxu0 %v1401_v10  ;;  %1581 = vmatpush1.msra.mxu1 %v1401_v10  ;;  %v1367_v15 = vpop.permute.xlu1 %1366 }
 0x1dd   :  { %v1365_v22 = vpop.permute.xlu0 %1364 }
 0x1de   :  { %v1400_v39 = vsel %vm1392_vm8, %v1365_v22, %v1367_v15 }
 0x1df   :  { %1455 = vmatprep.subr.mxu0 %v1400_v39  ;;  %1574 = vmatprep.subr.mxu1 %v1400_v39 }
 0x1e0   :  { %v1359_v21 = vpop.permute.xlu1 %1358 }
 0x1e1   :  { %v1363_v14 = vpop.permute.xlu0 %1362 }
 0x1e2   :  { %v1399_v36 = vsel %vm1392_vm8, %v1363_v14, %v1365_v22 }
 0x1e3   :  { %1456 = vmatpush1.msra.mxu0 %v1399_v36  ;;  %1582 = vmatpush1.msra.mxu1 %v1399_v36 }
 0x1e4   :  { %v1357_v59 = vpop.permute.xlu1 %1356 }
 0x1e5   :  { %v1397_v16 = vsel %vm1392_vm8, %v1357_v59, %v1359_v21  ;;  %v1361_v61 = vpop.permute.xlu0 %1360 }
 0x1e6   :  { %v1398_v53 = vsel %vm1392_vm8, %v1359_v21, %v1361_v61 }
 0x1e7   :  { %1457 = vmatprep.subr.mxu0 %v1398_v53  ;;  %1575 = vmatprep.subr.mxu1 %v1398_v53 }
 0x1e8   :  { %1458 = vmatpush1.msra.mxu0 %v1397_v16  ;;  %1583 = vmatpush1.msra.mxu1 %v1397_v16  ;;  %v1355_v55 = vpop.permute.xlu1 %1354 }
 0x1e9   :  { %v1353_v40 = vpop.permute.xlu0 %1352 }
 0x1ea   :  { %v1396_v34 = vsel %vm1392_vm8, %v1353_v40, %v1355_v55 }
 0x1eb   :  { %1459 = vmatprep.subr.mxu0 %v1396_v34  ;;  %1576 = vmatprep.subr.mxu1 %v1396_v34 }
 0x1ec   :  { %v1347_v35 = vpop.permute.xlu1 %1346 }
 0x1ed   :  { %v1351_v20 = vpop.permute.xlu0 %1350 }
 0x1ee   :  { %v1395_v19 = vsel %vm1392_vm8, %v1351_v20, %v1353_v40 }
 0x1ef   :  { %1460 = vmatpush1.msra.mxu0 %v1395_v19  ;;  %1584 = vmatpush1.msra.mxu1 %v1395_v19 }
 0x1f0   :  { %v1345_v32 = vpop.permute.xlu1 %1344 }
 0x1f1   :  { %v1393_v30 = vsel %vm1392_vm8, %v1345_v32, %v1347_v35  ;;  %v1349_v41 = vpop.permute.xlu0 %1348 }
 0x1f2   :  { %v1394_v31 = vsel %vm1392_vm8, %v1347_v35, %v1349_v41 }
 0x1f3   :  { %1461 = vmatprep.subr.mxu0 %v1394_v31  ;;  %1577 = vmatprep.subr.mxu1 %v1394_v31 }
 0x1f4   :  { %1462 = vmatpush1.msra.mxu0 %v1393_v30  ;;  %1585 = vmatpush1.msra.mxu1 %v1393_v30 }
 0x1f5   :  { %1568 = vmatmul.mubr.msk.f32.vlgmr.msra.gmra.mxu0 %vm148_vm0, %v1566_v17  ;;  %1569 = vmatmul.mubr.msk.f32.vlgmr.msra.gmra.mxu1 %vm148_vm0, %v1567_v18 }
 0x1fd   :  { %v1522_v32 = vpop.permute.xlu1 %1521 }
 0x1fe   :  { %v1517_v30 = vpop.permute.xlu0 %1516 }
 0x224   :  { %v813_v54 = vpop.f32.mrf.mxu0  ;;  %v984_v4 = vpop.f32.mrf.mxu1 }
 0x225   :  { %v824_v9 = vadd.f32 %v813_v54, %v653_v23 }
 0x226   :  { %v815_v56 = vpop.f32.mrf.mxu0  ;;  %v986_v2 = vpop.f32.mrf.mxu1 }
 0x227   :  { %v825_v22 = vadd.f32 %v815_v56, %v654_v6  ;;  %v995_v14 = vadd.f32 %v984_v4, %v824_v9 }
 0x228   :  { %v819_v57 = vpop.f32.mrf.mxu0  ;;  %v990_v26 = vpop.f32.mrf.mxu1 }
 0x229   :  { %v826_v29 = vadd.f32 %v819_v57, %v655_v37  ;;  %v996_v61 = vadd.f32 %v986_v2, %v825_v22 }
 0x22a   :  { %v821_v25 = vpop.f32.mrf.mxu0  ;;  %v992_v33 = vpop.f32.mrf.mxu1 }
 0x22b   :  { %v827_v11 = vadd.f32 %v821_v25, %v656_v24  ;;  %v997_v39 = vadd.f32 %v990_v26, %v826_v29 }
 0x22d   :  { %v998_v36 = vadd.f32 %v992_v33, %v827_v11 }
 0x283   :  { %v1326_v10 = vpop.f32.mrf.mxu1 }
 0x284   :  { %v1155_v1 = vpop.f32.mrf.mxu0 }
 0x285   :  { %v1328_v21 = vpop.f32.mrf.mxu1  ;;  %v1166_v53 = vadd.f32 %v1155_v1, %v995_v14 }
 0x286   :  { %v1157_v38 = vpop.f32.mrf.mxu0 }
 0x287   :  { %v1167_v40 = vadd.f32 %v1157_v38, %v996_v61  ;;  %v1337_v20 = vadd.f32 %v1326_v10, %v1166_v53 }
 0x288   :  { %v1161_v15 = vpop.f32.mrf.mxu0  ;;  %v1332_v16 = vpop.f32.mrf.mxu1 }
 0x289   :  { %v1168_v55 = vadd.f32 %v1161_v15, %v997_v39  ;;  %v1338_v17 = vadd.f32 %v1328_v21, %v1167_v40 }
 0x28a   :  { %v1163_v59 = vpop.f32.mrf.mxu0  ;;  %v1334_v35 = vpop.f32.mrf.mxu1 }
 0x28b   :  { %v1169_v34 = vadd.f32 %v1163_v59, %v998_v36  ;;  %v1339_v19 = vadd.f32 %v1332_v16, %v1168_v55 }
 0x28d   :  { %v1340_v18 = vadd.f32 %v1334_v35, %v1169_v34 }
 0x2b5   :  { %v1497_v41 = vpop.f32.mrf.mxu0  ;;  %v1503_v31 = vpop.f32.mrf.mxu1 }
 0x2b6   :  { %v1508_v27 = vadd.f32 %v1497_v41, %v1337_v20  ;;  %v1510_v42 = vadd.f32 %v1503_v31, %v1339_v19 }
 0x2b7   :  { %v1499_v43 = vpop.f32.mrf.mxu0  ;;  %v1505_v12 = vpop.f32.mrf.mxu1 }
 0x2b8   :  { %v1526_v44 = vadd.f32 %v1522_v32, %v1510_v42  ;;  %v1509_v45 = vadd.f32 %v1499_v43, %v1338_v17  ;;  %v1524_v46 = vadd.f32 %v1517_v30, %v1508_v27  ;;  %v1511_v47 = vadd.f32 %v1505_v12, %v1340_v18 }
 0x2ba   :  { %1530 = vst [vmem:[%s2499_s3 + $0x10] sm:$0xff] %v1526_v44  ;;  %v1525_v13 = vadd.f32 %v1517_v30, %v1509_v45  ;;  %1528 = vst [vmem:[%s2499_s3] sm:$0xff] %v1524_v46  ;;  %v1527_v7 = vadd.f32 %v1522_v32, %v1511_v47 }
 0x2bc   :  { %1529 = vst [vmem:[%s2499_s3 + $0x8] sm:$0xff] %v1525_v13  ;;  %1531 = vst [vmem:[%s2499_s3 + $0x18] sm:$0xff] %v1527_v7 }

// kernel: discriminator_forward.4
= control target key start
LH: loop header
LB: loop body
LE: loop exit
PB: predicated region body
PF: predicated region fallthrough
CT: control target
= control target key end

     0   :  { %v5321_v30 = vmov 1983009808   ;;  %v574_v32 = vlaneseq  ;;  %s8222_s0 = inlined_call_operand.vmem [shape: f32[2,4096], index: 0, kind: input, shape index: {}]   ;;  %s8223_s1 = inlined_call_operand.vmem [shape: f32[4096,32], index: 1, kind: input, shape index: {}]   ;;  %s8224_s2 = inlined_call_operand.vmem [shape: f32[1,32], index: 2, kind: input, shape index: {}]   ;;  %s8225_s3 = inlined_call_operand.vmem [shape: f32[1,32], index: 3, kind: input, shape index: {}]   ;;  %s8226_s4 = inlined_call_operand.vmem [shape: f32[1,32], index: 4, kind: input, shape index: {}]   ;;  %s8227_s5 = inlined_call_operand.vmem [shape: f32[32,4096], index: 5, kind: input, shape index: {}]   ;;  %s8228_s6 = inlined_call_operand.vmem [shape: f32[1,4096], index: 6, kind: input, shape index: {}]   ;;  %s8229_s7 = inlined_call_operand.vmem [shape: f32[1,4096], index: 7, kind: input, shape index: {}]   ;;  %s8230_s8 = inlined_call_operand.vmem [shape: f32[1,4096], index: 8, kind: input, shape index: {}]   ;;  %s8231_s9 = inlined_call_operand.vmem [shape: f32[2,4096], index: 9, kind: output, shape index: {0}]   ;;  %s8232_s10 = inlined_call_operand.hbm [shape: f32[2,32], index: 10, kind: output, shape index: {1}]  }
   0x1   :  { %v74_v0 = vld [vmem:[%s8223_s1 + $0xf8] sm:$0xff]  ;;  %v73_v4 = vld [vmem:[%s8223_s1 + $0xf0] sm:$0xff]  ;;  %v72_v8 = vld [vmem:[%s8223_s1 + $0xe8] sm:$0xff]  ;;  %v572_v31 = vunpack.c.l.s4 %v5321_v30 }
   0x2   :  { %v106_v1 = vld [vmem:[%s8223_s1 + $0x1f8] sm:$0xff]  ;;  %4661 = vmatprep.subr.mxu0 %v74_v0  ;;  %v105_v5 = vld [vmem:[%s8223_s1 + $0x1f0] sm:$0xff]  ;;  %v104_v9 = vld [vmem:[%s8223_s1 + $0x1e8] sm:$0xff]  ;;  %v5493_v42 = vshrl.u32 %v574_v32, 7 }
   0x3   :  { %v58_v2 = vld [vmem:[%s8223_s1 + $0x78] sm:$0xff]  ;;  %4696 = vmatprep.subr.mxu1 %v106_v1  ;;  %v57_v6 = vld [vmem:[%s8223_s1 + $0x70] sm:$0xff]  ;;  %v56_v10 = vld [vmem:[%s8223_s1 + $0x68] sm:$0xff]  ;;  %v573_v41 = vunpack.c.0.s8 %v572_v31 }
   0x4   :  { %v90_v3 = vld [vmem:[%s8223_s1 + $0x178] sm:$0xff]  ;;  %4662 = vmatpush3.msra.mxu0 %v58_v2  ;;  %v89_v7 = vld [vmem:[%s8223_s1 + $0x170] sm:$0xff]  ;;  %v88_v11 = vld [vmem:[%s8223_s1 + $0x168] sm:$0xff] }
   0x5   :  { %4697 = vmatpush3.msra.mxu1 %v90_v3  ;;  %4663 = vmatprep.subr.mxu0 %v73_v4  ;;  %v71_v12 = vld [vmem:[%s8223_s1 + $0xe0] sm:$0xff]  ;;  %v70_v16 = vld [vmem:[%s8223_s1 + $0xd8] sm:$0xff]  ;;  %v69_v20 = vld [vmem:[%s8223_s1 + $0xd0] sm:$0xff]  ;;  %v5520_v51 = vsub.s32 %v573_v41, %v5493_v42 }
   0x6   :  { %4698 = vmatprep.subr.mxu1 %v105_v5  ;;  %4664 = vmatpush3.msra.mxu0 %v57_v6  ;;  %v103_v13 = vld [vmem:[%s8223_s1 + $0x1e0] sm:$0xff]  ;;  %v102_v17 = vld [vmem:[%s8223_s1 + $0x1d8] sm:$0xff]  ;;  %v101_v21 = vld [vmem:[%s8223_s1 + $0x1d0] sm:$0xff] }
   0x7   :  { %4699 = vmatpush3.msra.mxu1 %v89_v7  ;;  %4665 = vmatprep.subr.mxu0 %v72_v8  ;;  %v55_v14 = vld [vmem:[%s8223_s1 + $0x60] sm:$0xff]  ;;  %v54_v18 = vld [vmem:[%s8223_s1 + $0x58] sm:$0xff]  ;;  %v53_v22 = vld [vmem:[%s8223_s1 + $0x50] sm:$0xff] }
   0x8   :  { %4700 = vmatprep.subr.mxu1 %v104_v9  ;;  %v87_v15 = vld [vmem:[%s8223_s1 + $0x160] sm:$0xff]  ;;  %4666 = vmatpush3.msra.mxu0 %v56_v10  ;;  %v86_v19 = vld [vmem:[%s8223_s1 + $0x158] sm:$0xff]  ;;  %v85_v23 = vld [vmem:[%s8223_s1 + $0x150] sm:$0xff] }
   0x9   :  { %4701 = vmatpush3.msra.mxu1 %v88_v11  ;;  %4667 = vmatprep.subr.mxu0 %v71_v12  ;;  %v68_v24 = vld [vmem:[%s8223_s1 + $0xc8] sm:$0xff]  ;;  %v67_v28 = vld [vmem:[%s8223_s1 + $0xc0] sm:$0xff]  ;;  %v66_v35 = vld [vmem:[%s8223_s1 + $0xb8] sm:$0xff] }
   0xa   :  { %4702 = vmatprep.subr.mxu1 %v103_v13  ;;  %4668 = vmatpush3.msra.mxu0 %v55_v14  ;;  %v100_v25 = vld [vmem:[%s8223_s1 + $0x1c8] sm:$0xff]  ;;  %v99_v29 = vld [vmem:[%s8223_s1 + $0x1c0] sm:$0xff]  ;;  %v98_v36 = vld [vmem:[%s8223_s1 + $0x1b8] sm:$0xff] }
   0xb   :  { %4703 = vmatpush3.msra.mxu1 %v87_v15  ;;  %4669 = vmatprep.subr.mxu0 %v70_v16  ;;  %v52_v26 = vld [vmem:[%s8223_s1 + $0x48] sm:$0xff]  ;;  %v51_v33 = vld [vmem:[%s8223_s1 + $0x40] sm:$0xff]  ;;  %v50_v37 = vld [vmem:[%s8223_s1 + $0x38] sm:$0xff] }
   0xc   :  { %4704 = vmatprep.subr.mxu1 %v102_v17  ;;  %4670 = vmatpush3.msra.mxu0 %v54_v18  ;;  %v84_v27 = vld [vmem:[%s8223_s1 + $0x148] sm:$0xff]  ;;  %v83_v34 = vld [vmem:[%s8223_s1 + $0x140] sm:$0xff]  ;;  %v82_v38 = vld [vmem:[%s8223_s1 + $0x138] sm:$0xff] }
   0xd   :  { %4705 = vmatpush3.msra.mxu1 %v86_v19  ;;  %4671 = vmatprep.subr.mxu0 %v69_v20  ;;  %v65_v39 = vld [vmem:[%s8223_s1 + $0xb0] sm:$0xff]  ;;  %v64_v45 = vld [vmem:[%s8223_s1 + $0xa8] sm:$0xff]  ;;  %v63_v49 = vld [vmem:[%s8223_s1 + $0xa0] sm:$0xff] }
   0xe   :  { %4706 = vmatprep.subr.mxu1 %v101_v21  ;;  %4672 = vmatpush3.msra.mxu0 %v53_v22  ;;  %v97_v40 = vld [vmem:[%s8223_s1 + $0x1b0] sm:$0xff]  ;;  %v96_v46 = vld [vmem:[%s8223_s1 + $0x1a8] sm:$0xff]  ;;  %v95_v50 = vld [vmem:[%s8223_s1 + $0x1a0] sm:$0xff] }
   0xf   :  { %4707 = vmatpush3.msra.mxu1 %v85_v23  ;;  %4673 = vmatprep.subr.mxu0 %v68_v24  ;;  %v49_v43 = vld [vmem:[%s8223_s1 + $0x30] sm:$0xff]  ;;  %v48_v47 = vld [vmem:[%s8223_s1 + $0x28] sm:$0xff]  ;;  %v47_v52 = vld [vmem:[%s8223_s1 + $0x20] sm:$0xff] }
  0x10   :  { %4708 = vmatprep.subr.mxu1 %v100_v25  ;;  %4674 = vmatpush3.msra.mxu0 %v52_v26  ;;  %v81_v44 = vld [vmem:[%s8223_s1 + $0x130] sm:$0xff]  ;;  %v80_v48 = vld [vmem:[%s8223_s1 + $0x128] sm:$0xff]  ;;  %v79_v53 = vld [vmem:[%s8223_s1 + $0x120] sm:$0xff] }
  0x11   :  { %4709 = vmatpush3.msra.mxu1 %v84_v27  ;;  %4675 = vmatprep.subr.mxu0 %v67_v28  ;;  %v35_v54 = vld [vmem:[%s8222_s0] sm:$0xff]  ;;  %v62_v55 = vld [vmem:[%s8223_s1 + $0x98] sm:$0xff]  ;;  %v61_v60 = vld [vmem:[%s8223_s1 + $0x90] sm:$0xff] }
  0x12   :  { %4710 = vmatprep.subr.mxu1 %v99_v29  ;;  %4676 = vmatpush3.msra.mxu0 %v51_v33  ;;  %v94_v56 = vld [vmem:[%s8223_s1 + $0x198] sm:$0xff]  ;;  %v570_v57 = vcombine.high %v35_v54, %v35_v54  ;;  %v93_v61 = vld [vmem:[%s8223_s1 + $0x190] sm:$0xff]  ;;  %v577_v62 = vrot.slane %v35_v54, %v5520_v51  ;;  %v60_v1 = vld [vmem:[%s8223_s1 + $0x88] sm:$0xff] }
  0x13   :  { %4711 = vmatpush3.msra.mxu1 %v83_v34  ;;  %4677 = vmatprep.subr.mxu0 %v66_v35  ;;  %v46_v58 = vld [vmem:[%s8223_s1 + $0x18] sm:$0xff]  ;;  %v45_v63 = vld [vmem:[%s8223_s1 + $0x10] sm:$0xff]  ;;  %v92_v2 = vld [vmem:[%s8223_s1 + $0x188] sm:$0xff] }
  0x14   :  { %4712 = vmatprep.subr.mxu1 %v98_v36  ;;  %4678 = vmatpush3.msra.mxu0 %v50_v37  ;;  %v78_v59 = vld [vmem:[%s8223_s1 + $0x118] sm:$0xff]  ;;  %v77_v0 = vld [vmem:[%s8223_s1 + $0x110] sm:$0xff]  ;;  %v584_v3 = vrot.slane %v570_v57, %v5520_v51  ;;  %v44_v4 = vld [vmem:[%s8223_s1 + $0x8] sm:$0xff]  ;;  %v585_v8 = vcombine.high %v577_v62, %v577_v62 }
  0x15   :  { %4713 = vmatpush3.msra.mxu1 %v82_v38  ;;  %4679 = vmatprep.subr.mxu0 %v65_v39  ;;  %v76_v5 = vld [vmem:[%s8223_s1 + $0x108] sm:$0xff]  ;;  %v59_v6 = vld [vmem:[%s8223_s1 + $0x80] sm:$0xff]  ;;  %v138_v12 = vld [vmem:[%s8223_s1 + $0x2f8] sm:$0xff] }
  0x16   :  { %4714 = vmatprep.subr.mxu1 %v97_v40  ;;  %4680 = vmatpush3.msra.mxu0 %v49_v43  ;;  %v91_v7 = vld [vmem:[%s8223_s1 + $0x180] sm:$0xff]  ;;  %v586_v11 = vcombine.high %v584_v3, %v584_v3  ;;  %v170_v13 = vld [vmem:[%s8223_s1 + $0x3f8] sm:$0xff]  ;;  %v137_v16 = vld [vmem:[%s8223_s1 + $0x2f0] sm:$0xff] }
  0x17   :  { %4715 = vmatpush3.msra.mxu1 %v81_v44  ;;  %4681 = vmatprep.subr.mxu0 %v64_v45  ;;  %v43_v9 = vld [vmem:[%s8223_s1] sm:$0xff]  ;;  %v122_v14 = vld [vmem:[%s8223_s1 + $0x278] sm:$0xff]  ;;  %v169_v17 = vld [vmem:[%s8223_s1 + $0x3f0] sm:$0xff] }
  0x18   :  { %4716 = vmatprep.subr.mxu1 %v96_v46  ;;  %4682 = vmatpush3.msra.mxu0 %v48_v47  ;;  %v75_v10 = vld [vmem:[%s8223_s1 + $0x100] sm:$0xff]  ;;  %v154_v15 = vld [vmem:[%s8223_s1 + $0x378] sm:$0xff]  ;;  %v121_v18 = vld [vmem:[%s8223_s1 + $0x270] sm:$0xff] }
  0x19   :  { %4717 = vmatpush3.msra.mxu1 %v80_v48  ;;  %4683 = vmatprep.subr.mxu0 %v63_v49  ;;  %v153_v19 = vld [vmem:[%s8223_s1 + $0x370] sm:$0xff]  ;;  %v136_v20 = vld [vmem:[%s8223_s1 + $0x2e8] sm:$0xff]  ;;  %v135_v24 = vld [vmem:[%s8223_s1 + $0x2e0] sm:$0xff] }
  0x1a   :  { %4718 = vmatprep.subr.mxu1 %v95_v50  ;;  %4684 = vmatpush3.msra.mxu0 %v47_v52  ;;  %v168_v21 = vld [vmem:[%s8223_s1 + $0x3e8] sm:$0xff]  ;;  %v167_v25 = vld [vmem:[%s8223_s1 + $0x3e0] sm:$0xff]  ;;  %v134_v28 = vld [vmem:[%s8223_s1 + $0x2d8] sm:$0xff] }
  0x1b   :  { %4719 = vmatpush3.msra.mxu1 %v79_v53  ;;  %4685 = vmatprep.subr.mxu0 %v62_v55  ;;  %v120_v22 = vld [vmem:[%s8223_s1 + $0x268] sm:$0xff]  ;;  %v119_v26 = vld [vmem:[%s8223_s1 + $0x260] sm:$0xff]  ;;  %v166_v29 = vld [vmem:[%s8223_s1 + $0x3d8] sm:$0xff] }
  0x1c   :  { %4720 = vmatprep.subr.mxu1 %v94_v56  ;;  %4686 = vmatpush3.msra.mxu0 %v46_v58  ;;  %v152_v23 = vld [vmem:[%s8223_s1 + $0x368] sm:$0xff]  ;;  %v151_v27 = vld [vmem:[%s8223_s1 + $0x360] sm:$0xff]  ;;  %v118_v30 = vld [vmem:[%s8223_s1 + $0x258] sm:$0xff] }
  0x1d   :  { %4721 = vmatpush3.msra.mxu1 %v78_v59  ;;  %4687 = vmatprep.subr.mxu0 %v61_v60  ;;  %v150_v31 = vld [vmem:[%s8223_s1 + $0x358] sm:$0xff]  ;;  %v133_v32 = vld [vmem:[%s8223_s1 + $0x2d0] sm:$0xff]  ;;  %v132_v36 = vld [vmem:[%s8223_s1 + $0x2c8] sm:$0xff] }
  0x1e   :  { %4722 = vmatprep.subr.mxu1 %v93_v61  ;;  %4688 = vmatpush3.msra.mxu0 %v45_v63  ;;  %v165_v33 = vld [vmem:[%s8223_s1 + $0x3d0] sm:$0xff]  ;;  %v164_v37 = vld [vmem:[%s8223_s1 + $0x3c8] sm:$0xff]  ;;  %v131_v40 = vld [vmem:[%s8223_s1 + $0x2c0] sm:$0xff] }
  0x1f   :  { %4723 = vmatpush3.msra.mxu1 %v77_v0  ;;  %4689 = vmatprep.subr.mxu0 %v60_v1  ;;  %v117_v34 = vld [vmem:[%s8223_s1 + $0x250] sm:$0xff]  ;;  %v116_v38 = vld [vmem:[%s8223_s1 + $0x248] sm:$0xff]  ;;  %v163_v41 = vld [vmem:[%s8223_s1 + $0x3c0] sm:$0xff] }
  0x20   :  { %4724 = vmatprep.subr.mxu1 %v92_v2  ;;  %4690 = vmatpush3.msra.mxu0 %v44_v4  ;;  %v149_v35 = vld [vmem:[%s8223_s1 + $0x350] sm:$0xff]  ;;  %v148_v39 = vld [vmem:[%s8223_s1 + $0x348] sm:$0xff]  ;;  %v115_v43 = vld [vmem:[%s8223_s1 + $0x240] sm:$0xff] }
  0x21   :  { %4725 = vmatpush3.msra.mxu1 %v76_v5  ;;  %4691 = vmatprep.subr.mxu0 %v59_v6  ;;  %v147_v44 = vld [vmem:[%s8223_s1 + $0x340] sm:$0xff]  ;;  %v130_v45 = vld [vmem:[%s8223_s1 + $0x2b8] sm:$0xff]  ;;  %v129_v49 = vld [vmem:[%s8223_s1 + $0x2b0] sm:$0xff] }
  0x22   :  { %4726 = vmatprep.subr.mxu1 %v91_v7  ;;  %4692 = vmatpush3.msra.mxu0 %v43_v9  ;;  %v162_v46 = vld [vmem:[%s8223_s1 + $0x3b8] sm:$0xff]  ;;  %v161_v50 = vld [vmem:[%s8223_s1 + $0x3b0] sm:$0xff]  ;;  %v128_v54 = vld [vmem:[%s8223_s1 + $0x2a8] sm:$0xff] }
  0x23   :  { %802 = vmatprep.mubr.f32.mxu0 %v585_v8  ;;  %4727 = vmatpush3.msra.mxu1 %v75_v10  ;;  %v114_v47 = vld [vmem:[%s8223_s1 + $0x238] sm:$0xff]  ;;  %v113_v52 = vld [vmem:[%s8223_s1 + $0x230] sm:$0xff]  ;;  %v160_v55 = vld [vmem:[%s8223_s1 + $0x3a8] sm:$0xff] }
  0x24   :  { %803 = vmatmul.mubr.f32.vlgmr.msra.gmra.mxu0 %v577_v62  ;;  %872 = vmatprep.mubr.f32.mxu1 %v586_v11  ;;  %v146_v48 = vld [vmem:[%s8223_s1 + $0x338] sm:$0xff]  ;;  %v145_v53 = vld [vmem:[%s8223_s1 + $0x330] sm:$0xff]  ;;  %v112_v56 = vld [vmem:[%s8223_s1 + $0x228] sm:$0xff] }
  0x25   :  { %4731 = vmatprep.subr.mxu0 %v138_v12  ;;  %4766 = vmatprep.subr.mxu1 %v170_v13  ;;  %v144_v57 = vld [vmem:[%s8223_s1 + $0x328] sm:$0xff]  ;;  %v127_v59 = vld [vmem:[%s8223_s1 + $0x2a0] sm:$0xff]  ;;  %v126_v63 = vld [vmem:[%s8223_s1 + $0x298] sm:$0xff] }
  0x26   :  { %873 = vmatmul.mubr.f32.vlgmr.msra.gmra.mxu1 %v584_v3  ;;  %4732 = vmatpush3.msra.mxu0 %v122_v14  ;;  %v36_v58 = vld [vmem:[%s8222_s0 + $0x8] sm:$0xff]  ;;  %v159_v60 = vld [vmem:[%s8223_s1 + $0x3a0] sm:$0xff]  ;;  %v158_v0 = vld [vmem:[%s8223_s1 + $0x398] sm:$0xff] }
  0x27   :  { %4767 = vmatpush3.msra.mxu1 %v154_v15  ;;  %4733 = vmatprep.subr.mxu0 %v137_v16  ;;  %v111_v61 = vld [vmem:[%s8223_s1 + $0x220] sm:$0xff]  ;;  %v587_v1 = vcombine.high %v36_v58, %v36_v58  ;;  %v110_v2 = vld [vmem:[%s8223_s1 + $0x218] sm:$0xff]  ;;  %v125_v4 = vld [vmem:[%s8223_s1 + $0x290] sm:$0xff]  ;;  %v594_v6 = vrot.slane %v36_v58, %v5520_v51 }
  0x28   :  { %4768 = vmatprep.subr.mxu1 %v169_v17  ;;  %4734 = vmatpush3.msra.mxu0 %v121_v18  ;;  %v143_v62 = vld [vmem:[%s8223_s1 + $0x320] sm:$0xff]  ;;  %v142_v3 = vld [vmem:[%s8223_s1 + $0x318] sm:$0xff]  ;;  %v157_v5 = vld [vmem:[%s8223_s1 + $0x390] sm:$0xff] }
  0x29   :  { %4769 = vmatpush3.msra.mxu1 %v153_v19  ;;  %4735 = vmatprep.subr.mxu0 %v136_v20  ;;  %v109_v7 = vld [vmem:[%s8223_s1 + $0x210] sm:$0xff]  ;;  %v124_v9 = vld [vmem:[%s8223_s1 + $0x288] sm:$0xff]  ;;  %v601_v11 = vrot.slane %v587_v1, %v5520_v51  ;;  %v123_v14 = vld [vmem:[%s8223_s1 + $0x280] sm:$0xff]  ;;  %v602_v16 = vcombine.high %v594_v6, %v594_v6 }
  0x2a   :  { %4770 = vmatprep.subr.mxu1 %v168_v21  ;;  %4736 = vmatpush3.msra.mxu0 %v120_v22  ;;  %v141_v8 = vld [vmem:[%s8223_s1 + $0x310] sm:$0xff]  ;;  %v156_v10 = vld [vmem:[%s8223_s1 + $0x388] sm:$0xff]  ;;  %v155_v15 = vld [vmem:[%s8223_s1 + $0x380] sm:$0xff] }
  0x2b   :  { %4771 = vmatpush3.msra.mxu1 %v152_v23  ;;  %4737 = vmatprep.subr.mxu0 %v135_v24  ;;  %v108_v12 = vld [vmem:[%s8223_s1 + $0x208] sm:$0xff]  ;;  %v107_v17 = vld [vmem:[%s8223_s1 + $0x200] sm:$0xff]  ;;  %v603_v19 = vcombine.high %v601_v11, %v601_v11  ;;  %v202_v20 = vld [vmem:[%s8223_s1 + $0x4f8] sm:$0xff] }
  0x2c   :  { %4772 = vmatprep.subr.mxu1 %v167_v25  ;;  %4738 = vmatpush3.msra.mxu0 %v119_v26  ;;  %v140_v13 = vld [vmem:[%s8223_s1 + $0x308] sm:$0xff]  ;;  %v139_v18 = vld [vmem:[%s8223_s1 + $0x300] sm:$0xff]  ;;  %v234_v21 = vld [vmem:[%s8223_s1 + $0x5f8] sm:$0xff] }
  0x2d   :  { %4773 = vmatpush3.msra.mxu1 %v151_v27  ;;  %4739 = vmatprep.subr.mxu0 %v134_v28  ;;  %v186_v22 = vld [vmem:[%s8223_s1 + $0x478] sm:$0xff]  ;;  %v201_v24 = vld [vmem:[%s8223_s1 + $0x4f0] sm:$0xff]  ;;  %v200_v28 = vld [vmem:[%s8223_s1 + $0x4e8] sm:$0xff] }
  0x2e   :  { %4774 = vmatprep.subr.mxu1 %v166_v29  ;;  %4740 = vmatpush3.msra.mxu0 %v118_v30  ;;  %v218_v23 = vld [vmem:[%s8223_s1 + $0x578] sm:$0xff]  ;;  %v233_v25 = vld [vmem:[%s8223_s1 + $0x5f0] sm:$0xff]  ;;  %v232_v29 = vld [vmem:[%s8223_s1 + $0x5e8] sm:$0xff] }
  0x2f   :  { %4775 = vmatpush3.msra.mxu1 %v150_v31  ;;  %4741 = vmatprep.subr.mxu0 %v133_v32  ;;  %v185_v26 = vld [vmem:[%s8223_s1 + $0x470] sm:$0xff]  ;;  %v184_v30 = vld [vmem:[%s8223_s1 + $0x468] sm:$0xff]  ;;  %v199_v32 = vld [vmem:[%s8223_s1 + $0x4e0] sm:$0xff] }
  0x30   :  { %4776 = vmatprep.subr.mxu1 %v165_v33  ;;  %4742 = vmatpush3.msra.mxu0 %v117_v34  ;;  %v217_v27 = vld [vmem:[%s8223_s1 + $0x570] sm:$0xff]  ;;  %v216_v31 = vld [vmem:[%s8223_s1 + $0x568] sm:$0xff]  ;;  %v231_v33 = vld [vmem:[%s8223_s1 + $0x5e0] sm:$0xff] }
  0x31   :  { %4777 = vmatpush3.msra.mxu1 %v149_v35  ;;  %4743 = vmatprep.subr.mxu0 %v132_v36  ;;  %v183_v34 = vld [vmem:[%s8223_s1 + $0x460] sm:$0xff]  ;;  %v198_v36 = vld [vmem:[%s8223_s1 + $0x4d8] sm:$0xff]  ;;  %v193_v58 = vld [vmem:[%s8223_s1 + $0x4b0] sm:$0xff] }
  0x32   :  { %4778 = vmatprep.subr.mxu1 %v164_v37  ;;  %4744 = vmatpush3.msra.mxu0 %v116_v38  ;;  %v215_v35 = vld [vmem:[%s8223_s1 + $0x560] sm:$0xff]  ;;  %v230_v37 = vld [vmem:[%s8223_s1 + $0x5d8] sm:$0xff]  ;;  %v208_v1 = vld [vmem:[%s8223_s1 + $0x528] sm:$0xff] }
  0x33   :  { %4779 = vmatpush3.msra.mxu1 %v148_v39  ;;  %4745 = vmatprep.subr.mxu0 %v131_v40  ;;  %v182_v38 = vld [vmem:[%s8223_s1 + $0x458] sm:$0xff]  ;;  %v197_v40 = vld [vmem:[%s8223_s1 + $0x4d0] sm:$0xff] }
  0x34   :  { %4780 = vmatprep.subr.mxu1 %v163_v41  ;;  %4746 = vmatpush3.msra.mxu0 %v115_v43  ;;  %v214_v39 = vld [vmem:[%s8223_s1 + $0x558] sm:$0xff]  ;;  %v229_v41 = vld [vmem:[%s8223_s1 + $0x5d0] sm:$0xff] }
  0x35   :  { %4781 = vmatpush3.msra.mxu1 %v147_v44  ;;  %4747 = vmatprep.subr.mxu0 %v130_v45  ;;  %v181_v43 = vld [vmem:[%s8223_s1 + $0x450] sm:$0xff]  ;;  %v196_v45 = vld [vmem:[%s8223_s1 + $0x4c8] sm:$0xff] }
  0x36   :  { %4782 = vmatprep.subr.mxu1 %v162_v46  ;;  %4748 = vmatpush3.msra.mxu0 %v114_v47  ;;  %v213_v44 = vld [vmem:[%s8223_s1 + $0x550] sm:$0xff]  ;;  %v228_v46 = vld [vmem:[%s8223_s1 + $0x5c8] sm:$0xff] }
  0x37   :  { %4783 = vmatpush3.msra.mxu1 %v146_v48  ;;  %4749 = vmatprep.subr.mxu0 %v129_v49  ;;  %v180_v47 = vld [vmem:[%s8223_s1 + $0x448] sm:$0xff]  ;;  %v195_v49 = vld [vmem:[%s8223_s1 + $0x4c0] sm:$0xff] }
  0x38   :  { %4784 = vmatprep.subr.mxu1 %v161_v50  ;;  %4750 = vmatpush3.msra.mxu0 %v113_v52  ;;  %v212_v48 = vld [vmem:[%s8223_s1 + $0x548] sm:$0xff]  ;;  %v227_v50 = vld [vmem:[%s8223_s1 + $0x5c0] sm:$0xff] }
  0x39   :  { %4785 = vmatpush3.msra.mxu1 %v145_v53  ;;  %4751 = vmatprep.subr.mxu0 %v128_v54  ;;  %v179_v52 = vld [vmem:[%s8223_s1 + $0x440] sm:$0xff]  ;;  %v194_v54 = vld [vmem:[%s8223_s1 + $0x4b8] sm:$0xff] }
  0x3a   :  { %4786 = vmatprep.subr.mxu1 %v160_v55  ;;  %4752 = vmatpush3.msra.mxu0 %v112_v56  ;;  %v211_v53 = vld [vmem:[%s8223_s1 + $0x540] sm:$0xff]  ;;  %v226_v55 = vld [vmem:[%s8223_s1 + $0x5b8] sm:$0xff] }
  0x3b   :  { %4787 = vmatpush3.msra.mxu1 %v144_v57  ;;  %4753 = vmatprep.subr.mxu0 %v127_v59  ;;  %v178_v56 = vld [vmem:[%s8223_s1 + $0x438] sm:$0xff]  ;;  %v225_v59 = vld [vmem:[%s8223_s1 + $0x5b0] sm:$0xff] }
  0x3c   :  { %4788 = vmatprep.subr.mxu1 %v159_v60  ;;  %4754 = vmatpush3.msra.mxu0 %v111_v61  ;;  %v210_v57 = vld [vmem:[%s8223_s1 + $0x538] sm:$0xff]  ;;  %v177_v60 = vld [vmem:[%s8223_s1 + $0x430] sm:$0xff] }
  0x3d   :  { %4789 = vmatpush3.msra.mxu1 %v143_v62  ;;  %4755 = vmatprep.subr.mxu0 %v126_v63  ;;  %v209_v61 = vld [vmem:[%s8223_s1 + $0x530] sm:$0xff]  ;;  %v192_v62 = vld [vmem:[%s8223_s1 + $0x4a8] sm:$0xff] }
  0x3e   :  { %4790 = vmatprep.subr.mxu1 %v158_v0  ;;  %4756 = vmatpush3.msra.mxu0 %v110_v2  ;;  %v224_v63 = vld [vmem:[%s8223_s1 + $0x5a8] sm:$0xff]  ;;  %v37_v2 = vld [vmem:[%s8222_s0 + $0x10] sm:$0xff] }
  0x3f   :  { %4791 = vmatpush3.msra.mxu1 %v142_v3  ;;  %4757 = vmatprep.subr.mxu0 %v125_v4  ;;  %v176_v0 = vld [vmem:[%s8223_s1 + $0x428] sm:$0xff]  ;;  %v191_v3 = vld [vmem:[%s8223_s1 + $0x4a0] sm:$0xff] }
  0x40   :  { %4792 = vmatprep.subr.mxu1 %v157_v5  ;;  %4758 = vmatpush3.msra.mxu0 %v109_v7  ;;  %v223_v4 = vld [vmem:[%s8223_s1 + $0x5a0] sm:$0xff]  ;;  %v190_v7 = vld [vmem:[%s8223_s1 + $0x498] sm:$0xff] }
  0x41   :  { %4793 = vmatpush3.msra.mxu1 %v141_v8  ;;  %4759 = vmatprep.subr.mxu0 %v124_v9  ;;  %v175_v5 = vld [vmem:[%s8223_s1 + $0x420] sm:$0xff]  ;;  %v222_v8 = vld [vmem:[%s8223_s1 + $0x598] sm:$0xff]  ;;  %v604_v9 = vcombine.high %v37_v2, %v37_v2 }
  0x42   :  { %4794 = vmatprep.subr.mxu1 %v156_v10  ;;  %4760 = vmatpush3.msra.mxu0 %v108_v12  ;;  %v174_v10 = vld [vmem:[%s8223_s1 + $0x418] sm:$0xff]  ;;  %v189_v12 = vld [vmem:[%s8223_s1 + $0x490] sm:$0xff] }
  0x43   :  { %4795 = vmatpush3.msra.mxu1 %v140_v13  ;;  %4761 = vmatprep.subr.mxu0 %v123_v14  ;;  %v221_v13 = vld [vmem:[%s8223_s1 + $0x590] sm:$0xff]  ;;  %v611_v14 = vrot.slane %v37_v2, %v5520_v51 }
  0x44   :  { %4796 = vmatprep.subr.mxu1 %v155_v15  ;;  %4762 = vmatpush3.msra.mxu0 %v107_v17  ;;  %v173_v15 = vld [vmem:[%s8223_s1 + $0x410] sm:$0xff]  ;;  %v188_v17 = vld [vmem:[%s8223_s1 + $0x488] sm:$0xff] }
  0x45   :  { %942 = vmatprep.mubr.f32.mxu0 %v602_v16  ;;  %4797 = vmatpush3.msra.mxu1 %v139_v18  ;;  %v205_v16 = vld [vmem:[%s8223_s1 + $0x510] sm:$0xff]  ;;  %v220_v18 = vld [vmem:[%s8223_s1 + $0x588] sm:$0xff] }
  0x46   :  { %943 = vmatmul.mubr.f32.vlgmr.msra.gmra.mxu0 %v594_v6  ;;  %1012 = vmatprep.mubr.f32.mxu1 %v603_v19  ;;  %v207_v6 = vld [vmem:[%s8223_s1 + $0x520] sm:$0xff]  ;;  %v618_v19 = vrot.slane %v604_v9, %v5520_v51  ;;  %v257_v2 = vld [vmem:[%s8223_s1 + $0x6b0] sm:$0xff]  ;;  %v272_v9 = vld [vmem:[%s8223_s1 + $0x728] sm:$0xff] }
  0x47   :  { %4801 = vmatprep.subr.mxu0 %v202_v20  ;;  %4836 = vmatprep.subr.mxu1 %v234_v21  ;;  %v172_v20 = vld [vmem:[%s8223_s1 + $0x408] sm:$0xff] }
  0x48   :  { %1013 = vmatmul.mubr.f32.vlgmr.msra.gmra.mxu1 %v601_v11  ;;  %4802 = vmatpush3.msra.mxu0 %v186_v22  ;;  %v206_v11 = vld [vmem:[%s8223_s1 + $0x518] sm:$0xff]  ;;  %v204_v21 = vld [vmem:[%s8223_s1 + $0x508] sm:$0xff]  ;;  %v187_v22 = vld [vmem:[%s8223_s1 + $0x480] sm:$0xff] }
  0x49   :  { %4837 = vmatpush3.msra.mxu1 %v218_v23  ;;  %4803 = vmatprep.subr.mxu0 %v201_v24  ;;  %v219_v23 = vld [vmem:[%s8223_s1 + $0x580] sm:$0xff]  ;;  %v619_v24 = vcombine.high %v611_v14, %v611_v14 }
  0x4a   :  { %4838 = vmatprep.subr.mxu1 %v233_v25  ;;  %4804 = vmatpush3.msra.mxu0 %v185_v26  ;;  %v171_v25 = vld [vmem:[%s8223_s1 + $0x400] sm:$0xff] }
  0x4b   :  { %4839 = vmatpush3.msra.mxu1 %v217_v27  ;;  %4805 = vmatprep.subr.mxu0 %v200_v28  ;;  %v203_v26 = vld [vmem:[%s8223_s1 + $0x500] sm:$0xff]  ;;  %v620_v27 = vcombine.high %v618_v19, %v618_v19  ;;  %v266_v28 = vld [vmem:[%s8223_s1 + $0x6f8] sm:$0xff] }
  0x4c   :  { %4840 = vmatprep.subr.mxu1 %v232_v29  ;;  %4806 = vmatpush3.msra.mxu0 %v184_v30  ;;  %v298_v29 = vld [vmem:[%s8223_s1 + $0x7f8] sm:$0xff] }
  0x4d   :  { %4841 = vmatpush3.msra.mxu1 %v216_v31  ;;  %4807 = vmatprep.subr.mxu0 %v199_v32  ;;  %v250_v30 = vld [vmem:[%s8223_s1 + $0x678] sm:$0xff]  ;;  %v265_v32 = vld [vmem:[%s8223_s1 + $0x6f0] sm:$0xff] }
  0x4e   :  { %4842 = vmatprep.subr.mxu1 %v231_v33  ;;  %4808 = vmatpush3.msra.mxu0 %v183_v34  ;;  %v282_v31 = vld [vmem:[%s8223_s1 + $0x778] sm:$0xff]  ;;  %v297_v33 = vld [vmem:[%s8223_s1 + $0x7f0] sm:$0xff] }
  0x4f   :  { %4843 = vmatpush3.msra.mxu1 %v215_v35  ;;  %4809 = vmatprep.subr.mxu0 %v198_v36  ;;  %v249_v34 = vld [vmem:[%s8223_s1 + $0x670] sm:$0xff]  ;;  %v264_v36 = vld [vmem:[%s8223_s1 + $0x6e8] sm:$0xff] }
  0x50   :  { %4844 = vmatprep.subr.mxu1 %v230_v37  ;;  %4810 = vmatpush3.msra.mxu0 %v182_v38  ;;  %v281_v35 = vld [vmem:[%s8223_s1 + $0x770] sm:$0xff]  ;;  %v296_v37 = vld [vmem:[%s8223_s1 + $0x7e8] sm:$0xff] }
  0x51   :  { %4845 = vmatpush3.msra.mxu1 %v214_v39  ;;  %4811 = vmatprep.subr.mxu0 %v197_v40  ;;  %v248_v38 = vld [vmem:[%s8223_s1 + $0x668] sm:$0xff]  ;;  %v263_v40 = vld [vmem:[%s8223_s1 + $0x6e0] sm:$0xff] }
  0x52   :  { %4846 = vmatprep.subr.mxu1 %v229_v41  ;;  %4812 = vmatpush3.msra.mxu0 %v181_v43  ;;  %v280_v39 = vld [vmem:[%s8223_s1 + $0x768] sm:$0xff]  ;;  %v295_v41 = vld [vmem:[%s8223_s1 + $0x7e0] sm:$0xff] }
  0x53   :  { %4847 = vmatpush3.msra.mxu1 %v213_v44  ;;  %4813 = vmatprep.subr.mxu0 %v196_v45  ;;  %v247_v43 = vld [vmem:[%s8223_s1 + $0x660] sm:$0xff]  ;;  %v262_v45 = vld [vmem:[%s8223_s1 + $0x6d8] sm:$0xff] }
  0x54   :  { %4848 = vmatprep.subr.mxu1 %v228_v46  ;;  %4814 = vmatpush3.msra.mxu0 %v180_v47  ;;  %v279_v44 = vld [vmem:[%s8223_s1 + $0x760] sm:$0xff]  ;;  %v294_v46 = vld [vmem:[%s8223_s1 + $0x7d8] sm:$0xff] }
  0x55   :  { %4849 = vmatpush3.msra.mxu1 %v212_v48  ;;  %4815 = vmatprep.subr.mxu0 %v195_v49  ;;  %v246_v47 = vld [vmem:[%s8223_s1 + $0x658] sm:$0xff]  ;;  %v261_v49 = vld [vmem:[%s8223_s1 + $0x6d0] sm:$0xff] }
  0x56   :  { %4850 = vmatprep.subr.mxu1 %v227_v50  ;;  %4816 = vmatpush3.msra.mxu0 %v179_v52  ;;  %v278_v48 = vld [vmem:[%s8223_s1 + $0x758] sm:$0xff]  ;;  %v293_v50 = vld [vmem:[%s8223_s1 + $0x7d0] sm:$0xff] }
  0x57   :  { %4851 = vmatpush3.msra.mxu1 %v211_v53  ;;  %4817 = vmatprep.subr.mxu0 %v194_v54  ;;  %v245_v52 = vld [vmem:[%s8223_s1 + $0x650] sm:$0xff]  ;;  %v260_v54 = vld [vmem:[%s8223_s1 + $0x6c8] sm:$0xff] }
  0x58   :  { %4852 = vmatprep.subr.mxu1 %v226_v55  ;;  %4818 = vmatpush3.msra.mxu0 %v178_v56  ;;  %v277_v53 = vld [vmem:[%s8223_s1 + $0x750] sm:$0xff]  ;;  %v292_v55 = vld [vmem:[%s8223_s1 + $0x7c8] sm:$0xff] }
  0x59   :  { %4853 = vmatpush3.msra.mxu1 %v210_v57  ;;  %4819 = vmatprep.subr.mxu0 %v193_v58  ;;  %v244_v56 = vld [vmem:[%s8223_s1 + $0x648] sm:$0xff]  ;;  %v259_v58 = vld [vmem:[%s8223_s1 + $0x6c0] sm:$0xff] }
  0x5a   :  { %4854 = vmatprep.subr.mxu1 %v225_v59  ;;  %4820 = vmatpush3.msra.mxu0 %v177_v60  ;;  %v276_v57 = vld [vmem:[%s8223_s1 + $0x748] sm:$0xff]  ;;  %v291_v59 = vld [vmem:[%s8223_s1 + $0x7c0] sm:$0xff] }
  0x5b   :  { %4855 = vmatpush3.msra.mxu1 %v209_v61  ;;  %4821 = vmatprep.subr.mxu0 %v192_v62  ;;  %v243_v60 = vld [vmem:[%s8223_s1 + $0x640] sm:$0xff]  ;;  %v258_v62 = vld [vmem:[%s8223_s1 + $0x6b8] sm:$0xff] }
  0x5c   :  { %4856 = vmatprep.subr.mxu1 %v224_v63  ;;  %4822 = vmatpush3.msra.mxu0 %v176_v0  ;;  %v275_v61 = vld [vmem:[%s8223_s1 + $0x740] sm:$0xff]  ;;  %v290_v63 = vld [vmem:[%s8223_s1 + $0x7b8] sm:$0xff] }
  0x5d   :  { %4857 = vmatpush3.msra.mxu1 %v208_v1  ;;  %4823 = vmatprep.subr.mxu0 %v191_v3  ;;  %v242_v0 = vld [vmem:[%s8223_s1 + $0x638] sm:$0xff]  ;;  %v289_v3 = vld [vmem:[%s8223_s1 + $0x7b0] sm:$0xff] }
  0x5e   :  { %4858 = vmatprep.subr.mxu1 %v223_v4  ;;  %4824 = vmatpush3.msra.mxu0 %v175_v5  ;;  %v274_v1 = vld [vmem:[%s8223_s1 + $0x738] sm:$0xff]  ;;  %v241_v4 = vld [vmem:[%s8223_s1 + $0x630] sm:$0xff] }
  0x5f   :  { %4859 = vmatpush3.msra.mxu1 %v207_v6  ;;  %4825 = vmatprep.subr.mxu0 %v190_v7  ;;  %v273_v5 = vld [vmem:[%s8223_s1 + $0x730] sm:$0xff]  ;;  %v256_v6 = vld [vmem:[%s8223_s1 + $0x6a8] sm:$0xff] }
  0x60   :  { %4860 = vmatprep.subr.mxu1 %v222_v8  ;;  %4826 = vmatpush3.msra.mxu0 %v174_v10  ;;  %v288_v7 = vld [vmem:[%s8223_s1 + $0x7a8] sm:$0xff]  ;;  %v38_v10 = vld [vmem:[%s8222_s0 + $0x18] sm:$0xff] }
  0x61   :  { %4861 = vmatpush3.msra.mxu1 %v206_v11  ;;  %4827 = vmatprep.subr.mxu0 %v189_v12  ;;  %v240_v8 = vld [vmem:[%s8223_s1 + $0x628] sm:$0xff]  ;;  %v255_v11 = vld [vmem:[%s8223_s1 + $0x6a0] sm:$0xff] }
  0x62   :  { %4862 = vmatprep.subr.mxu1 %v221_v13  ;;  %4828 = vmatpush3.msra.mxu0 %v173_v15  ;;  %v287_v12 = vld [vmem:[%s8223_s1 + $0x7a0] sm:$0xff]  ;;  %v254_v15 = vld [vmem:[%s8223_s1 + $0x698] sm:$0xff] }
  0x63   :  { %4863 = vmatpush3.msra.mxu1 %v205_v16  ;;  %4829 = vmatprep.subr.mxu0 %v188_v17  ;;  %v239_v13 = vld [vmem:[%s8223_s1 + $0x620] sm:$0xff]  ;;  %v286_v16 = vld [vmem:[%s8223_s1 + $0x798] sm:$0xff]  ;;  %v621_v17 = vcombine.high %v38_v10, %v38_v10 }
  0x64   :  { %4864 = vmatprep.subr.mxu1 %v220_v18  ;;  %4830 = vmatpush3.msra.mxu0 %v172_v20  ;;  %v238_v18 = vld [vmem:[%s8223_s1 + $0x618] sm:$0xff]  ;;  %v253_v20 = vld [vmem:[%s8223_s1 + $0x690] sm:$0xff] }
  0x65   :  { %4865 = vmatpush3.msra.mxu1 %v204_v21  ;;  %4831 = vmatprep.subr.mxu0 %v187_v22  ;;  %v285_v21 = vld [vmem:[%s8223_s1 + $0x790] sm:$0xff]  ;;  %v628_v22 = vrot.slane %v38_v10, %v5520_v51 }
  0x66   :  { %4866 = vmatprep.subr.mxu1 %v219_v23  ;;  %4832 = vmatpush3.msra.mxu0 %v171_v25  ;;  %v237_v23 = vld [vmem:[%s8223_s1 + $0x610] sm:$0xff]  ;;  %v252_v25 = vld [vmem:[%s8223_s1 + $0x688] sm:$0xff] }
  0x67   :  { %1082 = vmatprep.mubr.f32.mxu0 %v619_v24  ;;  %4867 = vmatpush3.msra.mxu1 %v203_v26  ;;  %v269_v24 = vld [vmem:[%s8223_s1 + $0x710] sm:$0xff]  ;;  %v284_v26 = vld [vmem:[%s8223_s1 + $0x788] sm:$0xff] }
  0x68   :  { %1083 = vmatmul.mubr.f32.vlgmr.msra.gmra.mxu0 %v611_v14  ;;  %1152 = vmatprep.mubr.f32.mxu1 %v620_v27  ;;  %v271_v14 = vld [vmem:[%s8223_s1 + $0x720] sm:$0xff]  ;;  %v635_v27 = vrot.slane %v621_v17, %v5520_v51  ;;  %v321_v10 = vld [vmem:[%s8223_s1 + $0x8b0] sm:$0xff]  ;;  %v336_v17 = vld [vmem:[%s8223_s1 + $0x928] sm:$0xff] }
  0x69   :  { %4871 = vmatprep.subr.mxu0 %v266_v28  ;;  %4906 = vmatprep.subr.mxu1 %v298_v29  ;;  %v236_v28 = vld [vmem:[%s8223_s1 + $0x608] sm:$0xff] }
  0x6a   :  { %1153 = vmatmul.mubr.f32.vlgmr.msra.gmra.mxu1 %v618_v19  ;;  %4872 = vmatpush3.msra.mxu0 %v250_v30  ;;  %v270_v19 = vld [vmem:[%s8223_s1 + $0x718] sm:$0xff]  ;;  %v268_v29 = vld [vmem:[%s8223_s1 + $0x708] sm:$0xff]  ;;  %v251_v30 = vld [vmem:[%s8223_s1 + $0x680] sm:$0xff] }
  0x6b   :  { %4907 = vmatpush3.msra.mxu1 %v282_v31  ;;  %4873 = vmatprep.subr.mxu0 %v265_v32  ;;  %v283_v31 = vld [vmem:[%s8223_s1 + $0x780] sm:$0xff]  ;;  %v636_v32 = vcombine.high %v628_v22, %v628_v22 }
  0x6c   :  { %4908 = vmatprep.subr.mxu1 %v297_v33  ;;  %4874 = vmatpush3.msra.mxu0 %v249_v34  ;;  %v235_v33 = vld [vmem:[%s8223_s1 + $0x600] sm:$0xff] }
  0x6d   :  { %4909 = vmatpush3.msra.mxu1 %v281_v35  ;;  %4875 = vmatprep.subr.mxu0 %v264_v36  ;;  %v267_v34 = vld [vmem:[%s8223_s1 + $0x700] sm:$0xff]  ;;  %v637_v35 = vcombine.high %v635_v27, %v635_v27  ;;  %v330_v36 = vld [vmem:[%s8223_s1 + $0x8f8] sm:$0xff] }
  0x6e   :  { %4910 = vmatprep.subr.mxu1 %v296_v37  ;;  %4876 = vmatpush3.msra.mxu0 %v248_v38  ;;  %v362_v37 = vld [vmem:[%s8223_s1 + $0x9f8] sm:$0xff] }
  0x6f   :  { %4911 = vmatpush3.msra.mxu1 %v280_v39  ;;  %4877 = vmatprep.subr.mxu0 %v263_v40  ;;  %v314_v38 = vld [vmem:[%s8223_s1 + $0x878] sm:$0xff]  ;;  %v329_v40 = vld [vmem:[%s8223_s1 + $0x8f0] sm:$0xff] }
  0x70   :  { %4912 = vmatprep.subr.mxu1 %v295_v41  ;;  %4878 = vmatpush3.msra.mxu0 %v247_v43  ;;  %v346_v39 = vld [vmem:[%s8223_s1 + $0x978] sm:$0xff]  ;;  %v361_v41 = vld [vmem:[%s8223_s1 + $0x9f0] sm:$0xff] }
  0x71   :  { %4913 = vmatpush3.msra.mxu1 %v279_v44  ;;  %4879 = vmatprep.subr.mxu0 %v262_v45  ;;  %v313_v43 = vld [vmem:[%s8223_s1 + $0x870] sm:$0xff]  ;;  %v328_v45 = vld [vmem:[%s8223_s1 + $0x8e8] sm:$0xff] }
  0x72   :  { %4914 = vmatprep.subr.mxu1 %v294_v46  ;;  %4880 = vmatpush3.msra.mxu0 %v246_v47  ;;  %v345_v44 = vld [vmem:[%s8223_s1 + $0x970] sm:$0xff]  ;;  %v360_v46 = vld [vmem:[%s8223_s1 + $0x9e8] sm:$0xff] }
  0x73   :  { %4915 = vmatpush3.msra.mxu1 %v278_v48  ;;  %4881 = vmatprep.subr.mxu0 %v261_v49  ;;  %v312_v47 = vld [vmem:[%s8223_s1 + $0x868] sm:$0xff]  ;;  %v327_v49 = vld [vmem:[%s8223_s1 + $0x8e0] sm:$0xff] }
  0x74   :  { %4916 = vmatprep.subr.mxu1 %v293_v50  ;;  %4882 = vmatpush3.msra.mxu0 %v245_v52  ;;  %v344_v48 = vld [vmem:[%s8223_s1 + $0x968] sm:$0xff]  ;;  %v359_v50 = vld [vmem:[%s8223_s1 + $0x9e0] sm:$0xff] }
  0x75   :  { %4917 = vmatpush3.msra.mxu1 %v277_v53  ;;  %4883 = vmatprep.subr.mxu0 %v260_v54  ;;  %v311_v52 = vld [vmem:[%s8223_s1 + $0x860] sm:$0xff]  ;;  %v326_v54 = vld [vmem:[%s8223_s1 + $0x8d8] sm:$0xff] }
  0x76   :  { %4918 = vmatprep.subr.mxu1 %v292_v55  ;;  %4884 = vmatpush3.msra.mxu0 %v244_v56  ;;  %v343_v53 = vld [vmem:[%s8223_s1 + $0x960] sm:$0xff]  ;;  %v358_v55 = vld [vmem:[%s8223_s1 + $0x9d8] sm:$0xff] }
  0x77   :  { %4919 = vmatpush3.msra.mxu1 %v276_v57  ;;  %4885 = vmatprep.subr.mxu0 %v259_v58  ;;  %v310_v56 = vld [vmem:[%s8223_s1 + $0x858] sm:$0xff]  ;;  %v325_v58 = vld [vmem:[%s8223_s1 + $0x8d0] sm:$0xff] }
  0x78   :  { %4920 = vmatprep.subr.mxu1 %v291_v59  ;;  %4886 = vmatpush3.msra.mxu0 %v243_v60  ;;  %v342_v57 = vld [vmem:[%s8223_s1 + $0x958] sm:$0xff]  ;;  %v357_v59 = vld [vmem:[%s8223_s1 + $0x9d0] sm:$0xff] }
  0x79   :  { %4921 = vmatpush3.msra.mxu1 %v275_v61  ;;  %4887 = vmatprep.subr.mxu0 %v258_v62  ;;  %v309_v60 = vld [vmem:[%s8223_s1 + $0x850] sm:$0xff]  ;;  %v324_v62 = vld [vmem:[%s8223_s1 + $0x8c8] sm:$0xff] }
  0x7a   :  { %4922 = vmatprep.subr.mxu1 %v290_v63  ;;  %4888 = vmatpush3.msra.mxu0 %v242_v0  ;;  %v341_v61 = vld [vmem:[%s8223_s1 + $0x950] sm:$0xff]  ;;  %v356_v63 = vld [vmem:[%s8223_s1 + $0x9c8] sm:$0xff] }
  0x7b   :  { %4923 = vmatpush3.msra.mxu1 %v274_v1  ;;  %4889 = vmatprep.subr.mxu0 %v257_v2  ;;  %v308_v0 = vld [vmem:[%s8223_s1 + $0x848] sm:$0xff]  ;;  %v323_v2 = vld [vmem:[%s8223_s1 + $0x8c0] sm:$0xff] }
  0x7c   :  { %4924 = vmatprep.subr.mxu1 %v289_v3  ;;  %4890 = vmatpush3.msra.mxu0 %v241_v4  ;;  %v340_v1 = vld [vmem:[%s8223_s1 + $0x948] sm:$0xff]  ;;  %v355_v3 = vld [vmem:[%s8223_s1 + $0x9c0] sm:$0xff] }
  0x7d   :  { %4925 = vmatpush3.msra.mxu1 %v273_v5  ;;  %4891 = vmatprep.subr.mxu0 %v256_v6  ;;  %v307_v4 = vld [vmem:[%s8223_s1 + $0x840] sm:$0xff]  ;;  %v322_v6 = vld [vmem:[%s8223_s1 + $0x8b8] sm:$0xff] }
  0x7e   :  { %4926 = vmatprep.subr.mxu1 %v288_v7  ;;  %4892 = vmatpush3.msra.mxu0 %v240_v8  ;;  %v339_v5 = vld [vmem:[%s8223_s1 + $0x940] sm:$0xff]  ;;  %v354_v7 = vld [vmem:[%s8223_s1 + $0x9b8] sm:$0xff] }
  0x7f   :  { %4927 = vmatpush3.msra.mxu1 %v272_v9  ;;  %4893 = vmatprep.subr.mxu0 %v255_v11  ;;  %v306_v8 = vld [vmem:[%s8223_s1 + $0x838] sm:$0xff]  ;;  %v353_v11 = vld [vmem:[%s8223_s1 + $0x9b0] sm:$0xff] }
  0x80   :  { %4928 = vmatprep.subr.mxu1 %v287_v12  ;;  %4894 = vmatpush3.msra.mxu0 %v239_v13  ;;  %v338_v9 = vld [vmem:[%s8223_s1 + $0x938] sm:$0xff]  ;;  %v305_v12 = vld [vmem:[%s8223_s1 + $0x830] sm:$0xff] }
  0x81   :  { %4929 = vmatpush3.msra.mxu1 %v271_v14  ;;  %4895 = vmatprep.subr.mxu0 %v254_v15  ;;  %v337_v13 = vld [vmem:[%s8223_s1 + $0x930] sm:$0xff]  ;;  %v320_v14 = vld [vmem:[%s8223_s1 + $0x8a8] sm:$0xff] }
  0x82   :  { %4930 = vmatprep.subr.mxu1 %v286_v16  ;;  %4896 = vmatpush3.msra.mxu0 %v238_v18  ;;  %v352_v15 = vld [vmem:[%s8223_s1 + $0x9a8] sm:$0xff]  ;;  %v39_v18 = vld [vmem:[%s8222_s0 + $0x20] sm:$0xff] }
  0x83   :  { %4931 = vmatpush3.msra.mxu1 %v270_v19  ;;  %4897 = vmatprep.subr.mxu0 %v253_v20  ;;  %v304_v16 = vld [vmem:[%s8223_s1 + $0x828] sm:$0xff]  ;;  %v319_v19 = vld [vmem:[%s8223_s1 + $0x8a0] sm:$0xff] }
  0x84   :  { %4932 = vmatprep.subr.mxu1 %v285_v21  ;;  %4898 = vmatpush3.msra.mxu0 %v237_v23  ;;  %v351_v20 = vld [vmem:[%s8223_s1 + $0x9a0] sm:$0xff]  ;;  %v318_v23 = vld [vmem:[%s8223_s1 + $0x898] sm:$0xff] }
  0x85   :  { %4933 = vmatpush3.msra.mxu1 %v269_v24  ;;  %4899 = vmatprep.subr.mxu0 %v252_v25  ;;  %v303_v21 = vld [vmem:[%s8223_s1 + $0x820] sm:$0xff]  ;;  %v350_v24 = vld [vmem:[%s8223_s1 + $0x998] sm:$0xff]  ;;  %v638_v25 = vcombine.high %v39_v18, %v39_v18 }
  0x86   :  { %4934 = vmatprep.subr.mxu1 %v284_v26  ;;  %4900 = vmatpush3.msra.mxu0 %v236_v28  ;;  %v302_v26 = vld [vmem:[%s8223_s1 + $0x818] sm:$0xff]  ;;  %v317_v28 = vld [vmem:[%s8223_s1 + $0x890] sm:$0xff] }
  0x87   :  { %4935 = vmatpush3.msra.mxu1 %v268_v29  ;;  %4901 = vmatprep.subr.mxu0 %v251_v30  ;;  %v349_v29 = vld [vmem:[%s8223_s1 + $0x990] sm:$0xff]  ;;  %v645_v30 = vrot.slane %v39_v18, %v5520_v51 }
  0x88   :  { %4936 = vmatprep.subr.mxu1 %v283_v31  ;;  %4902 = vmatpush3.msra.mxu0 %v235_v33  ;;  %v301_v31 = vld [vmem:[%s8223_s1 + $0x810] sm:$0xff]  ;;  %v316_v33 = vld [vmem:[%s8223_s1 + $0x888] sm:$0xff] }
  0x89   :  { %1222 = vmatprep.mubr.f32.mxu0 %v636_v32  ;;  %4937 = vmatpush3.msra.mxu1 %v267_v34  ;;  %v333_v32 = vld [vmem:[%s8223_s1 + $0x910] sm:$0xff]  ;;  %v348_v34 = vld [vmem:[%s8223_s1 + $0x988] sm:$0xff] }
  0x8a   :  { %1223 = vmatmul.mubr.f32.vlgmr.msra.gmra.mxu0 %v628_v22  ;;  %1292 = vmatprep.mubr.f32.mxu1 %v637_v35  ;;  %v335_v22 = vld [vmem:[%s8223_s1 + $0x920] sm:$0xff]  ;;  %v652_v35 = vrot.slane %v638_v25, %v5520_v51 }
  0x8b   :  { %4941 = vmatprep.subr.mxu0 %v330_v36  ;;  %4976 = vmatprep.subr.mxu1 %v362_v37  ;;  %v300_v36 = vld [vmem:[%s8223_s1 + $0x808] sm:$0xff] }
  0x8c   :  { %1293 = vmatmul.mubr.f32.vlgmr.msra.gmra.mxu1 %v635_v27  ;;  %4942 = vmatpush3.msra.mxu0 %v314_v38  ;;  %v334_v27 = vld [vmem:[%s8223_s1 + $0x918] sm:$0xff]  ;;  %v332_v37 = vld [vmem:[%s8223_s1 + $0x908] sm:$0xff]  ;;  %v315_v38 = vld [vmem:[%s8223_s1 + $0x880] sm:$0xff] }
  0x8d   :  { %4977 = vmatpush3.msra.mxu1 %v346_v39  ;;  %4943 = vmatprep.subr.mxu0 %v329_v40  ;;  %v347_v39 = vld [vmem:[%s8223_s1 + $0x980] sm:$0xff]  ;;  %v653_v40 = vcombine.high %v645_v30, %v645_v30 }
  0x8e   :  { %4978 = vmatprep.subr.mxu1 %v361_v41  ;;  %4944 = vmatpush3.msra.mxu0 %v313_v43  ;;  %v299_v41 = vld [vmem:[%s8223_s1 + $0x800] sm:$0xff] }
  0x8f   :  { %4979 = vmatpush3.msra.mxu1 %v345_v44  ;;  %4945 = vmatprep.subr.mxu0 %v328_v45  ;;  %v331_v43 = vld [vmem:[%s8223_s1 + $0x900] sm:$0xff]  ;;  %v654_v44 = vcombine.high %v652_v35, %v652_v35  ;;  %v394_v45 = vld [vmem:[%s8223_s1 + $0xaf8] sm:$0xff] }
  0x90   :  { %4980 = vmatprep.subr.mxu1 %v360_v46  ;;  %4946 = vmatpush3.msra.mxu0 %v312_v47  ;;  %v426_v46 = vld [vmem:[%s8223_s1 + $0xbf8] sm:$0xff] }
  0x91   :  { %4981 = vmatpush3.msra.mxu1 %v344_v48  ;;  %4947 = vmatprep.subr.mxu0 %v327_v49  ;;  %v378_v47 = vld [vmem:[%s8223_s1 + $0xa78] sm:$0xff]  ;;  %v393_v49 = vld [vmem:[%s8223_s1 + $0xaf0] sm:$0xff] }
  0x92   :  { %4982 = vmatprep.subr.mxu1 %v359_v50  ;;  %4948 = vmatpush3.msra.mxu0 %v311_v52  ;;  %v410_v48 = vld [vmem:[%s8223_s1 + $0xb78] sm:$0xff]  ;;  %v425_v50 = vld [vmem:[%s8223_s1 + $0xbf0] sm:$0xff] }
  0x93   :  { %4983 = vmatpush3.msra.mxu1 %v343_v53  ;;  %4949 = vmatprep.subr.mxu0 %v326_v54  ;;  %v377_v52 = vld [vmem:[%s8223_s1 + $0xa70] sm:$0xff]  ;;  %v392_v54 = vld [vmem:[%s8223_s1 + $0xae8] sm:$0xff] }
  0x94   :  { %4984 = vmatprep.subr.mxu1 %v358_v55  ;;  %4950 = vmatpush3.msra.mxu0 %v310_v56  ;;  %v409_v53 = vld [vmem:[%s8223_s1 + $0xb70] sm:$0xff]  ;;  %v424_v55 = vld [vmem:[%s8223_s1 + $0xbe8] sm:$0xff] }
  0x95   :  { %4985 = vmatpush3.msra.mxu1 %v342_v57  ;;  %4951 = vmatprep.subr.mxu0 %v325_v58  ;;  %v376_v56 = vld [vmem:[%s8223_s1 + $0xa68] sm:$0xff] }
  0x96   :  { %4986 = vmatprep.subr.mxu1 %v357_v59  ;;  %4952 = vmatpush3.msra.mxu0 %v309_v60  ;;  %v408_v57 = vld [vmem:[%s8223_s1 + $0xb68] sm:$0xff] }
  0x97   :  { %4987 = vmatpush3.msra.mxu1 %v341_v61  ;;  %4953 = vmatprep.subr.mxu0 %v324_v62 }
  0x98   :  { %4988 = vmatprep.subr.mxu1 %v356_v63  ;;  %4954 = vmatpush3.msra.mxu0 %v308_v0 }
  0x99   :  { %4989 = vmatpush3.msra.mxu1 %v340_v1  ;;  %4955 = vmatprep.subr.mxu0 %v323_v2 }
  0x9a   :  { %4990 = vmatprep.subr.mxu1 %v355_v3  ;;  %4956 = vmatpush3.msra.mxu0 %v307_v4 }
  0x9b   :  { %4991 = vmatpush3.msra.mxu1 %v339_v5  ;;  %4957 = vmatprep.subr.mxu0 %v322_v6 }
  0x9c   :  { %4992 = vmatprep.subr.mxu1 %v354_v7  ;;  %4958 = vmatpush3.msra.mxu0 %v306_v8 }
  0x9d   :  { %4993 = vmatpush3.msra.mxu1 %v338_v9  ;;  %4959 = vmatprep.subr.mxu0 %v321_v10 }
  0x9e   :  { %4994 = vmatprep.subr.mxu1 %v353_v11  ;;  %4960 = vmatpush3.msra.mxu0 %v305_v12 }
  0x9f   :  { %4995 = vmatpush3.msra.mxu1 %v337_v13  ;;  %4961 = vmatprep.subr.mxu0 %v320_v14 }
  0xa0   :  { %4996 = vmatprep.subr.mxu1 %v352_v15  ;;  %4962 = vmatpush3.msra.mxu0 %v304_v16 }
  0xa1   :  { %4997 = vmatpush3.msra.mxu1 %v336_v17  ;;  %4963 = vmatprep.subr.mxu0 %v319_v19 }
  0xa2   :  { %4998 = vmatprep.subr.mxu1 %v351_v20  ;;  %4964 = vmatpush3.msra.mxu0 %v303_v21 }
  0xa3   :  { %4999 = vmatpush3.msra.mxu1 %v335_v22  ;;  %4965 = vmatprep.subr.mxu0 %v318_v23 }
  0xa4   :  { %5000 = vmatprep.subr.mxu1 %v350_v24  ;;  %4966 = vmatpush3.msra.mxu0 %v302_v26 }
  0xa5   :  { %5001 = vmatpush3.msra.mxu1 %v334_v27  ;;  %4967 = vmatprep.subr.mxu0 %v317_v28 }
  0xa6   :  { %5002 = vmatprep.subr.mxu1 %v349_v29  ;;  %4968 = vmatpush3.msra.mxu0 %v301_v31 }
  0xa7   :  { %5003 = vmatpush3.msra.mxu1 %v333_v32  ;;  %4969 = vmatprep.subr.mxu0 %v316_v33 }
  0xa8   :  { %5004 = vmatprep.subr.mxu1 %v348_v34  ;;  %4970 = vmatpush3.msra.mxu0 %v300_v36 }
  0xa9   :  { %5005 = vmatpush3.msra.mxu1 %v332_v37  ;;  %4971 = vmatprep.subr.mxu0 %v315_v38 }
  0xaa   :  { %5006 = vmatprep.subr.mxu1 %v347_v39  ;;  %4972 = vmatpush3.msra.mxu0 %v299_v41 }
  0xab   :  { %1362 = vmatprep.mubr.f32.mxu0 %v653_v40  ;;  %5007 = vmatpush3.msra.mxu1 %v331_v43 }
  0xac   :  { %1363 = vmatmul.mubr.f32.vlgmr.msra.gmra.mxu0 %v645_v30  ;;  %1432 = vmatprep.mubr.f32.mxu1 %v654_v44 }
  0xad   :  { %5011 = vmatprep.subr.mxu0 %v394_v45  ;;  %5046 = vmatprep.subr.mxu1 %v426_v46 }
  0xae   :  { %1433 = vmatmul.mubr.f32.vlgmr.msra.gmra.mxu1 %v652_v35  ;;  %5012 = vmatpush3.msra.mxu0 %v378_v47 }
  0xaf   :  { %5047 = vmatpush3.msra.mxu1 %v410_v48  ;;  %5013 = vmatprep.subr.mxu0 %v393_v49 }
  0xb0   :  { %5048 = vmatprep.subr.mxu1 %v425_v50 }
  0xb1   :  { %16 = vsyncpa [#allocation3], 0  ;;  %5014 = vmatpush3.msra.mxu0 %v377_v52  ;;  %5049 = vmatpush3.msra.mxu1 %v409_v53  ;;  %v391_v58 = vld [vmem:[%s8223_s1 + $0xae0] sm:$0xff]  ;;  %v390_v62 = vld [vmem:[%s8223_s1 + $0xad8] sm:$0xff]  ;;  %vm1858_vm0 = vcmask 254976   ;;  %vm2195_vm1 = vcmask 261120  }
  0xb2   :  { %v423_v59 = vld [vmem:[%s8223_s1 + $0xbe0] sm:$0xff]  ;;  %5015 = vmatprep.subr.mxu0 %v392_v54  ;;  %5050 = vmatprep.subr.mxu1 %v424_v55  ;;  %v422_v63 = vld [vmem:[%s8223_s1 + $0xbd8] sm:$0xff]  ;;  %v389_v2 = vld [vmem:[%s8223_s1 + $0xad0] sm:$0xff]  ;;  %vm3335_vm2 = vcmask 1041408   ;;  %s5323_s20 = smov [#allocation2]  }
  0xb3   :  { %v375_v60 = vld [vmem:[%s8223_s1 + $0xa60] sm:$0xff]  ;;  %5016 = vmatpush3.msra.mxu0 %v376_v56  ;;  %5051 = vmatpush3.msra.mxu1 %v408_v57  ;;  %v374_v0 = vld [vmem:[%s8223_s1 + $0xa58] sm:$0xff]  ;;  %v421_v3 = vld [vmem:[%s8223_s1 + $0xbd0] sm:$0xff]  ;;  %s4632_s21 = sshll.u32 %s5323_s20, 4  ;;  %s4633_s21 = int_to_ptr.vmem [resolvable:$true] %s4632_s21 }
  0xb4   :  { %v407_v61 = vld [vmem:[%s8223_s1 + $0xb60] sm:$0xff]  ;;  %5017 = vmatprep.subr.mxu0 %v391_v58  ;;  %5052 = vmatprep.subr.mxu1 %v423_v59  ;;  %v406_v1 = vld [vmem:[%s8223_s1 + $0xb58] sm:$0xff]  ;;  %v373_v4 = vld [vmem:[%s8223_s1 + $0xa50] sm:$0xff]  ;;  %s5299_s22 = scalar_lea.vmem %s4633_s21, 32  ;;  %p5304_p1 = scmp.lt.s32.totalorder %s4633_s21, %s4633_s21 }
  0xb5   :  { %5018 = vmatpush3.msra.mxu0 %v375_v60  ;;  %5053 = vmatpush3.msra.mxu1 %v407_v61  ;;  %v405_v5 = vld [vmem:[%s8223_s1 + $0xb50] sm:$0xff]  ;;  %v388_v6 = vld [vmem:[%s8223_s1 + $0xac8] sm:$0xff]  ;;  %v387_v10 = vld [vmem:[%s8223_s1 + $0xac0] sm:$0xff]  ;;  %p5300_p0 = scmp.ne.s32.totalorder %s4633_s21, %s5299_s22  ;;  %p5305_p2 = scmp.lt.s32.totalorder %s5299_s22, %s5299_s22 }
  0xb6   :  { %5019 = vmatprep.subr.mxu0 %v390_v62  ;;  %5054 = vmatprep.subr.mxu1 %v422_v63  ;;  %v420_v7 = vld [vmem:[%s8223_s1 + $0xbc8] sm:$0xff]  ;;  %v419_v11 = vld [vmem:[%s8223_s1 + $0xbc0] sm:$0xff]  ;;  %v386_v14 = vld [vmem:[%s8223_s1 + $0xab8] sm:$0xff] }
  0xb7   :  { %5020 = vmatpush3.msra.mxu0 %v374_v0  ;;  %5055 = vmatpush3.msra.mxu1 %v406_v1  ;;  %v372_v8 = vld [vmem:[%s8223_s1 + $0xa48] sm:$0xff]  ;;  %v371_v12 = vld [vmem:[%s8223_s1 + $0xa40] sm:$0xff]  ;;  %v418_v15 = vld [vmem:[%s8223_s1 + $0xbb8] sm:$0xff]  ;;  %p5306_p3 = por %p5305_p2, %p5304_p1 }
  0xb8   :  { %5021 = vmatprep.subr.mxu0 %v389_v2  ;;  %5056 = vmatprep.subr.mxu1 %v421_v3  ;;  %v404_v9 = vld [vmem:[%s8223_s1 + $0xb48] sm:$0xff]  ;;  %v403_v13 = vld [vmem:[%s8223_s1 + $0xb40] sm:$0xff]  ;;  %v370_v16 = vld [vmem:[%s8223_s1 + $0xa38] sm:$0xff] }
  0xb9   :  { %5022 = vmatpush3.msra.mxu0 %v373_v4  ;;  %5057 = vmatpush3.msra.mxu1 %v405_v5  ;;  %v402_v17 = vld [vmem:[%s8223_s1 + $0xb38] sm:$0xff]  ;;  %v385_v18 = vld [vmem:[%s8223_s1 + $0xab0] sm:$0xff]  ;;  %v384_v22 = vld [vmem:[%s8223_s1 + $0xaa8] sm:$0xff]  ;;  %p5307_p4 = pnand %p5306_p3, %p5300_p0 }
  0xba   :  { %5023 = vmatprep.subr.mxu0 %v388_v6  ;;  %5058 = vmatprep.subr.mxu1 %v420_v7  ;;  %v417_v19 = vld [vmem:[%s8223_s1 + $0xbb0] sm:$0xff]  ;;  %v416_v23 = vld [vmem:[%s8223_s1 + $0xba8] sm:$0xff]  ;;  %v383_v27 = vld [vmem:[%s8223_s1 + $0xaa0] sm:$0xff] }
  0xbb   :  { %5024 = vmatpush3.msra.mxu0 %v372_v8  ;;  %5059 = vmatpush3.msra.mxu1 %v404_v9  ;;  %v369_v20 = vld [vmem:[%s8223_s1 + $0xa30] sm:$0xff]  ;;  %v368_v24 = vld [vmem:[%s8223_s1 + $0xa28] sm:$0xff]  ;;  %v415_v28 = vld [vmem:[%s8223_s1 + $0xba0] sm:$0xff] }
  0xbc   :  { %5025 = vmatprep.subr.mxu0 %v387_v10  ;;  %5060 = vmatprep.subr.mxu1 %v419_v11  ;;  %v401_v21 = vld [vmem:[%s8223_s1 + $0xb30] sm:$0xff]  ;;  %v400_v25 = vld [vmem:[%s8223_s1 + $0xb28] sm:$0xff]  ;;  %v367_v29 = vld [vmem:[%s8223_s1 + $0xa20] sm:$0xff] }
  0xbd   :  { %5026 = vmatpush3.msra.mxu0 %v371_v12  ;;  %5061 = vmatpush3.msra.mxu1 %v403_v13  ;;  %v40_v26 = vld [vmem:[%s8222_s0 + $0x28] sm:$0xff]  ;;  %v399_v30 = vld [vmem:[%s8223_s1 + $0xb20] sm:$0xff]  ;;  %v382_v31 = vld [vmem:[%s8223_s1 + $0xa98] sm:$0xff] }
  0xbe   :  { %5027 = vmatprep.subr.mxu0 %v386_v14  ;;  %5062 = vmatprep.subr.mxu1 %v418_v15  ;;  %v414_v32 = vld [vmem:[%s8223_s1 + $0xb98] sm:$0xff]  ;;  %v655_v33 = vcombine.high %v40_v26, %v40_v26  ;;  %v381_v36 = vld [vmem:[%s8223_s1 + $0xa90] sm:$0xff]  ;;  %v662_v38 = vrot.slane %v40_v26, %v5520_v51  ;;  %v380_v41 = vld [vmem:[%s8223_s1 + $0xa88] sm:$0xff] }
  0xbf   :  { %5028 = vmatpush3.msra.mxu0 %v370_v16  ;;  %5063 = vmatpush3.msra.mxu1 %v402_v17  ;;  %v366_v34 = vld [vmem:[%s8223_s1 + $0xa18] sm:$0xff]  ;;  %v413_v37 = vld [vmem:[%s8223_s1 + $0xb90] sm:$0xff]  ;;  %v412_v43 = vld [vmem:[%s8223_s1 + $0xb88] sm:$0xff] }
  0xc0   :  { %5029 = vmatprep.subr.mxu0 %v385_v18  ;;  %5064 = vmatprep.subr.mxu1 %v417_v19  ;;  %v398_v35 = vld [vmem:[%s8223_s1 + $0xb18] sm:$0xff]  ;;  %v365_v39 = vld [vmem:[%s8223_s1 + $0xa10] sm:$0xff]  ;;  %v669_v44 = vrot.slane %v655_v33, %v5520_v51  ;;  %v364_v45 = vld [vmem:[%s8223_s1 + $0xa08] sm:$0xff]  ;;  %v670_v49 = vcombine.high %v662_v38, %v662_v38 }
  0xc1   :  { %5030 = vmatpush3.msra.mxu0 %v369_v20  ;;  %5065 = vmatpush3.msra.mxu1 %v401_v21  ;;  %v397_v40 = vld [vmem:[%s8223_s1 + $0xb10] sm:$0xff]  ;;  %v396_v46 = vld [vmem:[%s8223_s1 + $0xb08] sm:$0xff]  ;;  %v379_v47 = vld [vmem:[%s8223_s1 + $0xa80] sm:$0xff] }
  0xc2   :  { %5031 = vmatprep.subr.mxu0 %v384_v22  ;;  %5066 = vmatprep.subr.mxu1 %v416_v23  ;;  %v411_v48 = vld [vmem:[%s8223_s1 + $0xb80] sm:$0xff]  ;;  %v671_v53 = vcombine.high %v669_v44, %v669_v44  ;;  %v458_v54 = vld [vmem:[%s8223_s1 + $0xcf8] sm:$0xff]  ;;  %v457_v58 = vld [vmem:[%s8223_s1 + $0xcf0] sm:$0xff] }
  0xc3   :  { %5032 = vmatpush3.msra.mxu0 %v368_v24  ;;  %5067 = vmatpush3.msra.mxu1 %v400_v25  ;;  %v363_v50 = vld [vmem:[%s8223_s1 + $0xa00] sm:$0xff]  ;;  %v490_v55 = vld [vmem:[%s8223_s1 + $0xdf8] sm:$0xff]  ;;  %v489_v59 = vld [vmem:[%s8223_s1 + $0xdf0] sm:$0xff] }
  0xc4   :  { %5033 = vmatprep.subr.mxu0 %v383_v27  ;;  %5068 = vmatprep.subr.mxu1 %v415_v28  ;;  %v395_v52 = vld [vmem:[%s8223_s1 + $0xb00] sm:$0xff]  ;;  %v442_v56 = vld [vmem:[%s8223_s1 + $0xc78] sm:$0xff]  ;;  %v441_v60 = vld [vmem:[%s8223_s1 + $0xc70] sm:$0xff] }
  0xc5   :  { %5034 = vmatpush3.msra.mxu0 %v367_v29  ;;  %5069 = vmatpush3.msra.mxu1 %v399_v30  ;;  %v474_v57 = vld [vmem:[%s8223_s1 + $0xd78] sm:$0xff]  ;;  %v473_v61 = vld [vmem:[%s8223_s1 + $0xd70] sm:$0xff]  ;;  %v456_v62 = vld [vmem:[%s8223_s1 + $0xce8] sm:$0xff] }
  0xc6   :  { %5035 = vmatprep.subr.mxu0 %v382_v31  ;;  %5070 = vmatprep.subr.mxu1 %v414_v32  ;;  %v488_v63 = vld [vmem:[%s8223_s1 + $0xde8] sm:$0xff]  ;;  %v455_v2 = vld [vmem:[%s8223_s1 + $0xce0] sm:$0xff]  ;;  %v454_v6 = vld [vmem:[%s8223_s1 + $0xcd8] sm:$0xff] }
  0xc7   :  { %5036 = vmatpush3.msra.mxu0 %v366_v34  ;;  %5071 = vmatpush3.msra.mxu1 %v398_v35  ;;  %v440_v0 = vld [vmem:[%s8223_s1 + $0xc68] sm:$0xff]  ;;  %v487_v3 = vld [vmem:[%s8223_s1 + $0xde0] sm:$0xff]  ;;  %v486_v7 = vld [vmem:[%s8223_s1 + $0xdd8] sm:$0xff] }
  0xc8   :  { %5037 = vmatprep.subr.mxu0 %v381_v36  ;;  %5072 = vmatprep.subr.mxu1 %v413_v37  ;;  %v472_v1 = vld [vmem:[%s8223_s1 + $0xd68] sm:$0xff]  ;;  %v439_v4 = vld [vmem:[%s8223_s1 + $0xc60] sm:$0xff]  ;;  %v438_v8 = vld [vmem:[%s8223_s1 + $0xc58] sm:$0xff] }
  0xc9   :  { %5038 = vmatpush3.msra.mxu0 %v365_v39  ;;  %5073 = vmatpush3.msra.mxu1 %v397_v40  ;;  %v471_v5 = vld [vmem:[%s8223_s1 + $0xd60] sm:$0xff]  ;;  %v470_v9 = vld [vmem:[%s8223_s1 + $0xd58] sm:$0xff]  ;;  %v453_v10 = vld [vmem:[%s8223_s1 + $0xcd0] sm:$0xff] }
  0xca   :  { %5039 = vmatprep.subr.mxu0 %v380_v41  ;;  %5074 = vmatprep.subr.mxu1 %v412_v43  ;;  %v485_v11 = vld [vmem:[%s8223_s1 + $0xdd0] sm:$0xff]  ;;  %v452_v14 = vld [vmem:[%s8223_s1 + $0xcc8] sm:$0xff]  ;;  %v451_v18 = vld [vmem:[%s8223_s1 + $0xcc0] sm:$0xff] }
  0xcb   :  { %5040 = vmatpush3.msra.mxu0 %v364_v45  ;;  %5075 = vmatpush3.msra.mxu1 %v396_v46  ;;  %v437_v12 = vld [vmem:[%s8223_s1 + $0xc50] sm:$0xff]  ;;  %v484_v15 = vld [vmem:[%s8223_s1 + $0xdc8] sm:$0xff]  ;;  %v483_v19 = vld [vmem:[%s8223_s1 + $0xdc0] sm:$0xff] }
  0xcc   :  { %5041 = vmatprep.subr.mxu0 %v379_v47  ;;  %5076 = vmatprep.subr.mxu1 %v411_v48  ;;  %v469_v13 = vld [vmem:[%s8223_s1 + $0xd50] sm:$0xff]  ;;  %v436_v16 = vld [vmem:[%s8223_s1 + $0xc48] sm:$0xff]  ;;  %v435_v20 = vld [vmem:[%s8223_s1 + $0xc40] sm:$0xff] }
  0xcd   :  { %5042 = vmatpush3.msra.mxu0 %v363_v50  ;;  %1502 = vmatprep.mubr.f32.mxu0 %v670_v49  ;;  %v468_v17 = vld [vmem:[%s8223_s1 + $0xd48] sm:$0xff]  ;;  %v467_v21 = vld [vmem:[%s8223_s1 + $0xd40] sm:$0xff]  ;;  %v450_v22 = vld [vmem:[%s8223_s1 + $0xcb8] sm:$0xff] }
  0xce   :  { %5077 = vmatpush3.msra.mxu1 %v395_v52  ;;  %1503 = vmatmul.mubr.f32.vlgmr.msra.gmra.mxu0 %v662_v38  ;;  %v482_v23 = vld [vmem:[%s8223_s1 + $0xdb8] sm:$0xff]  ;;  %v449_v26 = vld [vmem:[%s8223_s1 + $0xcb0] sm:$0xff]  ;;  %v448_v30 = vld [vmem:[%s8223_s1 + $0xca8] sm:$0xff] }
  0xcf   :  { %1572 = vmatprep.mubr.f32.mxu1 %v671_v53  ;;  %5081 = vmatprep.subr.mxu0 %v458_v54  ;;  %v434_v24 = vld [vmem:[%s8223_s1 + $0xc38] sm:$0xff]  ;;  %v481_v27 = vld [vmem:[%s8223_s1 + $0xdb0] sm:$0xff]  ;;  %v480_v31 = vld [vmem:[%s8223_s1 + $0xda8] sm:$0xff] }
  0xd0   :  { %5116 = vmatprep.subr.mxu1 %v490_v55  ;;  %1573 = vmatmul.mubr.f32.vlgmr.msra.gmra.mxu1 %v669_v44  ;;  %v466_v25 = vld [vmem:[%s8223_s1 + $0xd38] sm:$0xff]  ;;  %v433_v28 = vld [vmem:[%s8223_s1 + $0xc30] sm:$0xff]  ;;  %v432_v32 = vld [vmem:[%s8223_s1 + $0xc28] sm:$0xff] }
  0xd1   :  { %5082 = vmatpush3.msra.mxu0 %v442_v56  ;;  %5117 = vmatpush3.msra.mxu1 %v474_v57  ;;  %v465_v29 = vld [vmem:[%s8223_s1 + $0xd30] sm:$0xff]  ;;  %v464_v33 = vld [vmem:[%s8223_s1 + $0xd28] sm:$0xff]  ;;  %v447_v35 = vld [vmem:[%s8223_s1 + $0xca0] sm:$0xff] }
  0xd2   :  { %5083 = vmatprep.subr.mxu0 %v457_v58  ;;  %5118 = vmatprep.subr.mxu1 %v489_v59  ;;  %v41_v34 = vld [vmem:[%s8222_s0 + $0x30] sm:$0xff]  ;;  %v479_v36 = vld [vmem:[%s8223_s1 + $0xda0] sm:$0xff]  ;;  %v446_v39 = vld [vmem:[%s8223_s1 + $0xc98] sm:$0xff] }
  0xd3   :  { %5084 = vmatpush3.msra.mxu0 %v441_v60  ;;  %5119 = vmatpush3.msra.mxu1 %v473_v61  ;;  %v431_v37 = vld [vmem:[%s8223_s1 + $0xc20] sm:$0xff]  ;;  %v478_v40 = vld [vmem:[%s8223_s1 + $0xd98] sm:$0xff]  ;;  %v672_v41 = vcombine.high %v41_v34, %v41_v34  ;;  %v445_v45 = vld [vmem:[%s8223_s1 + $0xc90] sm:$0xff]  ;;  %v679_v47 = vrot.slane %v41_v34, %v5520_v51 }
  0xd4   :  { %5085 = vmatprep.subr.mxu0 %v456_v62  ;;  %5120 = vmatprep.subr.mxu1 %v488_v63  ;;  %v463_v38 = vld [vmem:[%s8223_s1 + $0xd20] sm:$0xff]  ;;  %v430_v43 = vld [vmem:[%s8223_s1 + $0xc18] sm:$0xff]  ;;  %v477_v46 = vld [vmem:[%s8223_s1 + $0xd90] sm:$0xff] }
  0xd5   :  { %5086 = vmatpush3.msra.mxu0 %v440_v0  ;;  %5121 = vmatpush3.msra.mxu1 %v472_v1  ;;  %v462_v44 = vld [vmem:[%s8223_s1 + $0xd18] sm:$0xff]  ;;  %v429_v48 = vld [vmem:[%s8223_s1 + $0xc10] sm:$0xff]  ;;  %v444_v50 = vld [vmem:[%s8223_s1 + $0xc88] sm:$0xff]  ;;  %v686_v53 = vrot.slane %v672_v41, %v5520_v51  ;;  %v687_v58 = vcombine.high %v679_v47, %v679_v47 }
  0xd6   :  { %5087 = vmatprep.subr.mxu0 %v455_v2  ;;  %5122 = vmatprep.subr.mxu1 %v487_v3  ;;  %v461_v49 = vld [vmem:[%s8223_s1 + $0xd10] sm:$0xff]  ;;  %v476_v52 = vld [vmem:[%s8223_s1 + $0xd88] sm:$0xff]  ;;  %v443_v56 = vld [vmem:[%s8223_s1 + $0xc80] sm:$0xff] }
  0xd7   :  { %5088 = vmatpush3.msra.mxu0 %v439_v4  ;;  %5123 = vmatpush3.msra.mxu1 %v471_v5  ;;  %v428_v54 = vld [vmem:[%s8223_s1 + $0xc08] sm:$0xff]  ;;  %v475_v57 = vld [vmem:[%s8223_s1 + $0xd80] sm:$0xff]  ;;  %v688_v61 = vcombine.high %v686_v53, %v686_v53  ;;  %v522_v62 = vld [vmem:[%s8223_s1 + $0xef8] sm:$0xff] }
  0xd8   :  { %5089 = vmatprep.subr.mxu0 %v454_v6  ;;  %5124 = vmatprep.subr.mxu1 %v486_v7  ;;  %v460_v55 = vld [vmem:[%s8223_s1 + $0xd08] sm:$0xff]  ;;  %v427_v59 = vld [vmem:[%s8223_s1 + $0xc00] sm:$0xff]  ;;  %v554_v63 = vld [vmem:[%s8223_s1 + $0xff8] sm:$0xff] }
  0xd9   :  { %5090 = vmatpush3.msra.mxu0 %v438_v8  ;;  %5125 = vmatpush3.msra.mxu1 %v470_v9  ;;  %v459_v60 = vld [vmem:[%s8223_s1 + $0xd00] sm:$0xff]  ;;  %v506_v0 = vld [vmem:[%s8223_s1 + $0xe78] sm:$0xff]  ;;  %v521_v2 = vld [vmem:[%s8223_s1 + $0xef0] sm:$0xff] }
  0xda   :  { %5091 = vmatprep.subr.mxu0 %v453_v10  ;;  %5126 = vmatprep.subr.mxu1 %v485_v11  ;;  %v538_v1 = vld [vmem:[%s8223_s1 + $0xf78] sm:$0xff]  ;;  %v553_v3 = vld [vmem:[%s8223_s1 + $0xff0] sm:$0xff]  ;;  %v520_v6 = vld [vmem:[%s8223_s1 + $0xee8] sm:$0xff] }
  0xdb   :  { %5092 = vmatpush3.msra.mxu0 %v437_v12  ;;  %5127 = vmatpush3.msra.mxu1 %v469_v13  ;;  %v505_v4 = vld [vmem:[%s8223_s1 + $0xe70] sm:$0xff]  ;;  %v552_v7 = vld [vmem:[%s8223_s1 + $0xfe8] sm:$0xff]  ;;  %v519_v10 = vld [vmem:[%s8223_s1 + $0xee0] sm:$0xff] }
  0xdc   :  { %5093 = vmatprep.subr.mxu0 %v452_v14  ;;  %5128 = vmatprep.subr.mxu1 %v484_v15  ;;  %v537_v5 = vld [vmem:[%s8223_s1 + $0xf70] sm:$0xff]  ;;  %v504_v8 = vld [vmem:[%s8223_s1 + $0xe68] sm:$0xff]  ;;  %v551_v11 = vld [vmem:[%s8223_s1 + $0xfe0] sm:$0xff] }
  0xdd   :  { %5094 = vmatpush3.msra.mxu0 %v436_v16  ;;  %5129 = vmatpush3.msra.mxu1 %v468_v17  ;;  %v536_v9 = vld [vmem:[%s8223_s1 + $0xf68] sm:$0xff]  ;;  %v503_v12 = vld [vmem:[%s8223_s1 + $0xe60] sm:$0xff]  ;;  %v518_v14 = vld [vmem:[%s8223_s1 + $0xed8] sm:$0xff] }
  0xde   :  { %5095 = vmatprep.subr.mxu0 %v451_v18  ;;  %5130 = vmatprep.subr.mxu1 %v483_v19  ;;  %v535_v13 = vld [vmem:[%s8223_s1 + $0xf60] sm:$0xff]  ;;  %v550_v15 = vld [vmem:[%s8223_s1 + $0xfd8] sm:$0xff]  ;;  %v517_v18 = vld [vmem:[%s8223_s1 + $0xed0] sm:$0xff] }
  0xdf   :  { %5096 = vmatpush3.msra.mxu0 %v435_v20  ;;  %5131 = vmatpush3.msra.mxu1 %v467_v21  ;;  %v502_v16 = vld [vmem:[%s8223_s1 + $0xe58] sm:$0xff]  ;;  %v549_v19 = vld [vmem:[%s8223_s1 + $0xfd0] sm:$0xff]  ;;  %v496_v41 = vld [vmem:[%s8223_s1 + $0xe28] sm:$0xff] }
  0xe0   :  { %5097 = vmatprep.subr.mxu0 %v450_v22  ;;  %5132 = vmatprep.subr.mxu1 %v482_v23  ;;  %v534_v17 = vld [vmem:[%s8223_s1 + $0xf58] sm:$0xff]  ;;  %v501_v20 = vld [vmem:[%s8223_s1 + $0xe50] sm:$0xff]  ;;  %v516_v22 = vld [vmem:[%s8223_s1 + $0xec8] sm:$0xff] }
  0xe1   :  { %5098 = vmatpush3.msra.mxu0 %v434_v24  ;;  %5133 = vmatpush3.msra.mxu1 %v466_v25  ;;  %v533_v21 = vld [vmem:[%s8223_s1 + $0xf50] sm:$0xff]  ;;  %v548_v23 = vld [vmem:[%s8223_s1 + $0xfc8] sm:$0xff] }
  0xe2   :  { %5099 = vmatprep.subr.mxu0 %v449_v26  ;;  %5134 = vmatprep.subr.mxu1 %v481_v27  ;;  %v500_v24 = vld [vmem:[%s8223_s1 + $0xe48] sm:$0xff]  ;;  %v515_v26 = vld [vmem:[%s8223_s1 + $0xec0] sm:$0xff]  ;;  %v513_v34 = vld [vmem:[%s8223_s1 + $0xeb0] sm:$0xff] }
  0xe3   :  { %5100 = vmatpush3.msra.mxu0 %v433_v28  ;;  %5135 = vmatpush3.msra.mxu1 %v465_v29  ;;  %v532_v25 = vld [vmem:[%s8223_s1 + $0xf48] sm:$0xff]  ;;  %v547_v27 = vld [vmem:[%s8223_s1 + $0xfc0] sm:$0xff] }
  0xe4   :  { %5101 = vmatprep.subr.mxu0 %v448_v30  ;;  %5136 = vmatprep.subr.mxu1 %v480_v31  ;;  %v499_v28 = vld [vmem:[%s8223_s1 + $0xe40] sm:$0xff]  ;;  %v514_v30 = vld [vmem:[%s8223_s1 + $0xeb8] sm:$0xff] }
  0xe5   :  { %5102 = vmatpush3.msra.mxu0 %v432_v32  ;;  %5137 = vmatpush3.msra.mxu1 %v464_v33  ;;  %v531_v29 = vld [vmem:[%s8223_s1 + $0xf40] sm:$0xff]  ;;  %v546_v31 = vld [vmem:[%s8223_s1 + $0xfb8] sm:$0xff] }
  0xe6   :  { %5103 = vmatprep.subr.mxu0 %v447_v35  ;;  %5138 = vmatprep.subr.mxu1 %v479_v36  ;;  %v498_v32 = vld [vmem:[%s8223_s1 + $0xe38] sm:$0xff]  ;;  %v545_v35 = vld [vmem:[%s8223_s1 + $0xfb0] sm:$0xff] }
  0xe7   :  { %5104 = vmatpush3.msra.mxu0 %v431_v37  ;;  %5139 = vmatpush3.msra.mxu1 %v463_v38  ;;  %v530_v33 = vld [vmem:[%s8223_s1 + $0xf38] sm:$0xff]  ;;  %v497_v36 = vld [vmem:[%s8223_s1 + $0xe30] sm:$0xff]  ;;  %v512_v38 = vld [vmem:[%s8223_s1 + $0xea8] sm:$0xff] }
  0xe8   :  { %5105 = vmatprep.subr.mxu0 %v446_v39  ;;  %5140 = vmatprep.subr.mxu1 %v478_v40  ;;  %v529_v37 = vld [vmem:[%s8223_s1 + $0xf30] sm:$0xff]  ;;  %v544_v39 = vld [vmem:[%s8223_s1 + $0xfa8] sm:$0xff]  ;;  %v42_v40 = vld [vmem:[%s8222_s0 + $0x38] sm:$0xff] }
  0xe9   :  { %5106 = vmatpush3.msra.mxu0 %v430_v43  ;;  %5141 = vmatpush3.msra.mxu1 %v462_v44  ;;  %v528_v43 = vld [vmem:[%s8223_s1 + $0xf28] sm:$0xff]  ;;  %v511_v44 = vld [vmem:[%s8223_s1 + $0xea0] sm:$0xff] }
  0xea   :  { %5107 = vmatprep.subr.mxu0 %v445_v45  ;;  %5142 = vmatprep.subr.mxu1 %v477_v46  ;;  %v543_v45 = vld [vmem:[%s8223_s1 + $0xfa0] sm:$0xff] }
  0xeb   :  { %5108 = vmatpush3.msra.mxu0 %v429_v48  ;;  %5143 = vmatpush3.msra.mxu1 %v461_v49  ;;  %v495_v46 = vld [vmem:[%s8223_s1 + $0xe20] sm:$0xff]  ;;  %v689_v48 = vcombine.high %v42_v40, %v42_v40  ;;  %v510_v49 = vld [vmem:[%s8223_s1 + $0xe98] sm:$0xff] }
  0xec   :  { %5109 = vmatprep.subr.mxu0 %v444_v50  ;;  %5144 = vmatprep.subr.mxu1 %v476_v52  ;;  %v542_v50 = vld [vmem:[%s8223_s1 + $0xf98] sm:$0xff] }
  0xed   :  { %5110 = vmatpush3.msra.mxu0 %v428_v54  ;;  %5145 = vmatpush3.msra.mxu1 %v460_v55  ;;  %v494_v52 = vld [vmem:[%s8223_s1 + $0xe18] sm:$0xff]  ;;  %v509_v54 = vld [vmem:[%s8223_s1 + $0xe90] sm:$0xff] }
  0xee   :  { %5111 = vmatprep.subr.mxu0 %v443_v56  ;;  %5146 = vmatprep.subr.mxu1 %v475_v57  ;;  %v541_v55 = vld [vmem:[%s8223_s1 + $0xf90] sm:$0xff]  ;;  %v696_v56 = vrot.slane %v42_v40, %v5520_v51 }
  0xef   :  { %5112 = vmatpush3.msra.mxu0 %v427_v59  ;;  %1642 = vmatprep.mubr.f32.mxu0 %v687_v58  ;;  %v493_v57 = vld [vmem:[%s8223_s1 + $0xe10] sm:$0xff]  ;;  %v703_v59 = vrot.slane %v689_v48, %v5520_v51 }
  0xf0   :  { %5147 = vmatpush3.msra.mxu1 %v459_v60  ;;  %1643 = vmatmul.mubr.f32.vlgmr.msra.gmra.mxu0 %v679_v47  ;;  %v527_v47 = vld [vmem:[%s8223_s1 + $0xf20] sm:$0xff]  ;;  %v525_v58 = vld [vmem:[%s8223_s1 + $0xf10] sm:$0xff]  ;;  %v508_v60 = vld [vmem:[%s8223_s1 + $0xe88] sm:$0xff] }
  0xf1   :  { %1712 = vmatprep.mubr.f32.mxu1 %v688_v61  ;;  %5151 = vmatprep.subr.mxu0 %v522_v62  ;;  %v540_v61 = vld [vmem:[%s8223_s1 + $0xf88] sm:$0xff] }
  0xf2   :  { %5186 = vmatprep.subr.mxu1 %v554_v63  ;;  %1713 = vmatmul.mubr.f32.vlgmr.msra.gmra.mxu1 %v686_v53  ;;  %v526_v53 = vld [vmem:[%s8223_s1 + $0xf18] sm:$0xff]  ;;  %v492_v62 = vld [vmem:[%s8223_s1 + $0xe08] sm:$0xff] }
  0xf3   :  { %5152 = vmatpush3.msra.mxu0 %v506_v0  ;;  %5187 = vmatpush3.msra.mxu1 %v538_v1  ;;  %v524_v63 = vld [vmem:[%s8223_s1 + $0xf08] sm:$0xff]  ;;  %v507_v0 = vld [vmem:[%s8223_s1 + $0xe80] sm:$0xff] }
  0xf4   :  { %5153 = vmatprep.subr.mxu0 %v521_v2  ;;  %5188 = vmatprep.subr.mxu1 %v553_v3  ;;  %v539_v1 = vld [vmem:[%s8223_s1 + $0xf80] sm:$0xff]  ;;  %v704_v2 = vcombine.high %v696_v56, %v696_v56 }
  0xf5   :  { %5154 = vmatpush3.msra.mxu0 %v505_v4  ;;  %5189 = vmatpush3.msra.mxu1 %v537_v5  ;;  %v491_v3 = vld [vmem:[%s8223_s1 + $0xe00] sm:$0xff]  ;;  %v705_v4 = vcombine.high %v703_v59, %v703_v59 }
  0xf6   :  { %5155 = vmatprep.subr.mxu0 %v520_v6  ;;  %5190 = vmatprep.subr.mxu1 %v552_v7  ;;  %v523_v5 = vld [vmem:[%s8223_s1 + $0xf00] sm:$0xff]  ;;  %v1996_v6 = vld [vmem:[%s8227_s5 + $0x308] sm:$0xff]  ;;  %v1998_v7 = vld [vmem:[%s8227_s5 + $0x318] sm:$0xff] }
  0xf7   :  { %5156 = vmatpush3.msra.mxu0 %v504_v8  ;;  %5191 = vmatpush3.msra.mxu1 %v536_v9  ;;  %v1995_v8 = vld [vmem:[%s8227_s5 + $0x300] sm:$0xff]  ;;  %v1997_v9 = vld [vmem:[%s8227_s5 + $0x310] sm:$0xff] }
  0xf8   :  { %5157 = vmatprep.subr.mxu0 %v519_v10  ;;  %5192 = vmatprep.subr.mxu1 %v551_v11  ;;  %v1964_v10 = vld [vmem:[%s8227_s5 + $0x208] sm:$0xff]  ;;  %v1966_v11 = vld [vmem:[%s8227_s5 + $0x218] sm:$0xff] }
  0xf9   :  { %5158 = vmatpush3.msra.mxu0 %v503_v12  ;;  %5193 = vmatpush3.msra.mxu1 %v535_v13  ;;  %v1963_v12 = vld [vmem:[%s8227_s5 + $0x200] sm:$0xff]  ;;  %v1965_v13 = vld [vmem:[%s8227_s5 + $0x210] sm:$0xff] }
  0xfa   :  { %5159 = vmatprep.subr.mxu0 %v518_v14  ;;  %5194 = vmatprep.subr.mxu1 %v550_v15  ;;  %v1932_v14 = vld [vmem:[%s8227_s5 + $0x108] sm:$0xff]  ;;  %v1934_v15 = vld [vmem:[%s8227_s5 + $0x118] sm:$0xff] }
  0xfb   :  { %5160 = vmatpush3.msra.mxu0 %v502_v16  ;;  %5195 = vmatpush3.msra.mxu1 %v534_v17  ;;  %v1931_v16 = vld [vmem:[%s8227_s5 + $0x100] sm:$0xff]  ;;  %v1933_v17 = vld [vmem:[%s8227_s5 + $0x110] sm:$0xff] }
  0xfc   :  { %5161 = vmatprep.subr.mxu0 %v517_v18  ;;  %5196 = vmatprep.subr.mxu1 %v549_v19  ;;  %v1900_v18 = vld [vmem:[%s8227_s5 + $0x8] sm:$0xff]  ;;  %v1902_v19 = vld [vmem:[%s8227_s5 + $0x18] sm:$0xff] }
  0xfd   :  { %5162 = vmatpush3.msra.mxu0 %v501_v20  ;;  %5197 = vmatpush3.msra.mxu1 %v533_v21  ;;  %v1899_v20 = vld [vmem:[%s8227_s5] sm:$0xff]  ;;  %v1901_v21 = vld [vmem:[%s8227_s5 + $0x10] sm:$0xff] }
  0xfe   :  { %5163 = vmatprep.subr.mxu0 %v516_v22  ;;  %5198 = vmatprep.subr.mxu1 %v548_v23  ;;  %v2000_v22 = vld [vmem:[%s8227_s5 + $0x328] sm:$0xff]  ;;  %v2002_v23 = vld [vmem:[%s8227_s5 + $0x338] sm:$0xff] }
  0xff   :  { %5164 = vmatpush3.msra.mxu0 %v500_v24  ;;  %5199 = vmatpush3.msra.mxu1 %v532_v25  ;;  %v5322_v24 = vmov 0.0   ;;  %v4693_v25 = vpop.f32.mrf.mxu0 }
 0x100   :  { %5165 = vmatprep.subr.mxu0 %v515_v26  ;;  %5200 = vmatprep.subr.mxu1 %v547_v27  ;;  %v4728_v26 = vpop.f32.mrf.mxu1 }
 0x101   :  { %5166 = vmatpush3.msra.mxu0 %v499_v28  ;;  %5201 = vmatpush3.msra.mxu1 %v531_v29  ;;  %v4694_v27 = vpop.f32.mrf.mxu0 }
 0x102   :  { %5167 = vmatprep.subr.mxu0 %v514_v30  ;;  %5202 = vmatprep.subr.mxu1 %v546_v31  ;;  %v4695_v29 = vadd.f32 %v4694_v27, %v4693_v25  ;;  %v4642_v30 = vld [vmem:[%s8224_s2] ss:$0 sm:$0xff]  ;;  %v4729_v31 = vpop.f32.mrf.mxu1 }
 0x103   :  { %5168 = vmatpush3.msra.mxu0 %v498_v32  ;;  %5203 = vmatpush3.msra.mxu1 %v530_v33 }
 0x104   :  { %5169 = vmatprep.subr.mxu0 %v513_v34  ;;  %5204 = vmatprep.subr.mxu1 %v545_v35  ;;  %v805_v34 = vadd.f32 %v4695_v29, %v4642_v30  ;;  %v4730_v35 = vadd.f32 %v4729_v31, %v4728_v26 }
 0x105   :  { %5170 = vmatpush3.msra.mxu0 %v497_v36  ;;  %5205 = vmatpush3.msra.mxu1 %v529_v37 }
 0x106   :  { %5171 = vmatprep.subr.mxu0 %v512_v38  ;;  %5206 = vmatprep.subr.mxu1 %v544_v39  ;;  %v4763_v28 = vpop.f32.mrf.mxu0  ;;  %v875_v39 = vadd.f32 %v4730_v35, %v805_v34 }
 0x107   :  { %5172 = vmatpush3.msra.mxu0 %v496_v41  ;;  %5207 = vmatpush3.msra.mxu1 %v528_v43 }
 0x108   :  { %5173 = vmatprep.subr.mxu0 %v511_v44  ;;  %5208 = vmatprep.subr.mxu1 %v543_v45  ;;  %v4798_v32 = vpop.f32.mrf.mxu1  ;;  %v4764_v33 = vpop.f32.mrf.mxu0 }
 0x109   :  { %5174 = vmatpush3.msra.mxu0 %v495_v46  ;;  %5209 = vmatpush3.msra.mxu1 %v527_v47  ;;  %v4765_v37 = vadd.f32 %v4764_v33, %v4763_v28 }
 0x10a   :  { %5175 = vmatprep.subr.mxu0 %v510_v49  ;;  %5210 = vmatprep.subr.mxu1 %v542_v50  ;;  %v4799_v38 = vpop.f32.mrf.mxu1 }
 0x10b   :  { %5176 = vmatpush3.msra.mxu0 %v494_v52  ;;  %5211 = vmatpush3.msra.mxu1 %v526_v53  ;;  %v945_v43 = vadd.f32 %v4765_v37, %v875_v39  ;;  %v4800_v44 = vadd.f32 %v4799_v38, %v4798_v32 }
 0x10c   :  { %5177 = vmatprep.subr.mxu0 %v509_v54  ;;  %5212 = vmatprep.subr.mxu1 %v541_v55 }
 0x10d   :  { %5178 = vmatpush3.msra.mxu0 %v493_v57  ;;  %5213 = vmatpush3.msra.mxu1 %v525_v58  ;;  %v1015_v48 = vadd.f32 %v4800_v44, %v945_v43 }
 0x10e   :  { %5179 = vmatprep.subr.mxu0 %v508_v60  ;;  %5214 = vmatprep.subr.mxu1 %v540_v61 }
 0x10f   :  { %5180 = vmatpush3.msra.mxu0 %v492_v62  ;;  %5215 = vmatpush3.msra.mxu1 %v524_v63 }
 0x110   :  { %5181 = vmatprep.subr.mxu0 %v507_v0  ;;  %5216 = vmatprep.subr.mxu1 %v539_v1 }
 0x111   :  { %5182 = vmatpush3.msra.mxu0 %v491_v3  ;;  %1782 = vmatprep.mubr.f32.mxu0 %v704_v2 }
 0x112   :  { %5217 = vmatpush3.msra.mxu1 %v523_v5  ;;  %1852 = vmatprep.mubr.f32.mxu1 %v705_v4 }
 0x113   :  { %1783 = vmatmul.mubr.f32.vlgmr.msra.gmra.mxu0 %v696_v56  ;;  %1853 = vmatmul.mubr.f32.vlgmr.msra.gmra.mxu1 %v703_v59 }
 0x114   :  { %2223 = vmatprep.subr.mxu0 %v1996_v6  ;;  %2294 = vmatprep.subr.mxu1 %v1998_v7 }
 0x115   :  { %2224 = vmatpush1.msra.mxu0 %v1995_v8  ;;  %2295 = vmatpush1.msra.mxu1 %v1997_v9 }
 0x116   :  { %2225 = vmatprep.subr.mxu0 %v1964_v10  ;;  %2296 = vmatprep.subr.mxu1 %v1966_v11 }
 0x117   :  { %2226 = vmatpush1.msra.mxu0 %v1963_v12  ;;  %2297 = vmatpush1.msra.mxu1 %v1965_v13 }
 0x118   :  { %2227 = vmatprep.subr.mxu0 %v1932_v14  ;;  %2298 = vmatprep.subr.mxu1 %v1934_v15 }
 0x119   :  { %2228 = vmatpush1.msra.mxu0 %v1931_v16  ;;  %2299 = vmatpush1.msra.mxu1 %v1933_v17 }
 0x11a   :  { %2229 = vmatprep.subr.mxu0 %v1900_v18  ;;  %2300 = vmatprep.subr.mxu1 %v1902_v19 }
 0x11b   :  { %2230 = vmatpush1.msra.mxu0 %v1899_v20  ;;  %2301 = vmatpush1.msra.mxu1 %v1901_v21 }
 0x11c   :  { %2263 = vmatprep.mubr.f32.mxu0 %v5322_v24  ;;  %2334 = vmatprep.mubr.f32.mxu1 %v5322_v24 }
 0x11d   :  { %2365 = vmatprep.subr.mxu0 %v2000_v22  ;;  %2436 = vmatprep.subr.mxu1 %v2002_v23 }
 0x128   :  { %v4833_v36 = vpop.f32.mrf.mxu0 }
 0x12a   :  { %v4868_v40 = vpop.f32.mrf.mxu1  ;;  %v4834_v41 = vpop.f32.mrf.mxu0 }
 0x12b   :  { %v4835_v46 = vadd.f32 %v4834_v41, %v4833_v36 }
 0x12c   :  { %v4869_v47 = vpop.f32.mrf.mxu1 }
 0x12d   :  { %v1085_v52 = vadd.f32 %v4835_v46, %v1015_v48  ;;  %v4870_v53 = vadd.f32 %v4869_v47, %v4868_v40 }
 0x12f   :  { %v1155_v57 = vadd.f32 %v4870_v53, %v1085_v52  ;;  %v4644_v53 = vld [vmem:[%s8226_s4] ss:$0 sm:$0xff] }
 0x14a   :  { %v4903_v45 = vpop.f32.mrf.mxu0 }
 0x14c   :  { %v4938_v49 = vpop.f32.mrf.mxu1  ;;  %v4904_v50 = vpop.f32.mrf.mxu0 }
 0x14d   :  { %v4905_v55 = vadd.f32 %v4904_v50, %v4903_v45  ;;  %v4643_v50 = vld [vmem:[%s8225_s3] ss:$0 sm:$0xff] }
 0x14e   :  { %v4939_v56 = vpop.f32.mrf.mxu1 }
 0x14f   :  { %v1225_v60 = vadd.f32 %v4905_v55, %v1155_v57  ;;  %v4940_v61 = vadd.f32 %v4939_v56, %v4938_v49  ;;  %v1999_v57 = vld [vmem:[%s8227_s5 + $0x320] sm:$0xff] }
 0x151   :  { %v1295_v1 = vadd.f32 %v4940_v61, %v1225_v60  ;;  %v1970_v60 = vld [vmem:[%s8227_s5 + $0x238] sm:$0xff]  ;;  %v1967_v61 = vld [vmem:[%s8227_s5 + $0x220] sm:$0xff] }
 0x16c   :  { %v4973_v54 = vpop.f32.mrf.mxu0 }
 0x16e   :  { %v5008_v58 = vpop.f32.mrf.mxu1  ;;  %v4974_v59 = vpop.f32.mrf.mxu0 }
 0x16f   :  { %v4975_v63 = vadd.f32 %v4974_v59, %v4973_v54  ;;  %v1968_v59 = vld [vmem:[%s8227_s5 + $0x228] sm:$0xff] }
 0x170   :  { %v5009_v0 = vpop.f32.mrf.mxu1 }
 0x171   :  { %v1365_v4 = vadd.f32 %v4975_v63, %v1295_v1  ;;  %v5010_v5 = vadd.f32 %v5009_v0, %v5008_v58  ;;  %v2001_v58 = vld [vmem:[%s8227_s5 + $0x330] sm:$0xff]  ;;  %v1936_v63 = vld [vmem:[%s8227_s5 + $0x128] sm:$0xff]  ;;  %v1938_v0 = vld [vmem:[%s8227_s5 + $0x138] sm:$0xff] }
 0x172   :  { %v1935_v1 = vld [vmem:[%s8227_s5 + $0x120] sm:$0xff] }
 0x173   :  { %v1435_v9 = vadd.f32 %v5010_v5, %v1365_v4  ;;  %v1906_v4 = vld [vmem:[%s8227_s5 + $0x38] sm:$0xff]  ;;  %v1903_v5 = vld [vmem:[%s8227_s5 + $0x20] sm:$0xff] }
 0x18e   :  { %v5043_v62 = vpop.f32.mrf.mxu0 }
 0x190   :  { %v5078_v2 = vpop.f32.mrf.mxu1  ;;  %v5044_v3 = vpop.f32.mrf.mxu0 }
 0x191   :  { %v5045_v7 = vadd.f32 %v5044_v3, %v5043_v62  ;;  %v1969_v62 = vld [vmem:[%s8227_s5 + $0x230] sm:$0xff]  ;;  %v1904_v3 = vld [vmem:[%s8227_s5 + $0x28] sm:$0xff] }
 0x192   :  { %v5079_v8 = vpop.f32.mrf.mxu1 }
 0x193   :  { %v1505_v12 = vadd.f32 %v5045_v7, %v1435_v9  ;;  %v5080_v13 = vadd.f32 %v5079_v8, %v5078_v2  ;;  %v1937_v2 = vld [vmem:[%s8227_s5 + $0x130] sm:$0xff]  ;;  %v2004_v7 = vld [vmem:[%s8227_s5 + $0x348] sm:$0xff]  ;;  %v2006_v8 = vld [vmem:[%s8227_s5 + $0x358] sm:$0xff] }
 0x194   :  { %v2003_v9 = vld [vmem:[%s8227_s5 + $0x340] sm:$0xff] }
 0x195   :  { %v1575_v16 = vadd.f32 %v5080_v13, %v1505_v12  ;;  %v1974_v12 = vld [vmem:[%s8227_s5 + $0x258] sm:$0xff]  ;;  %v1971_v13 = vld [vmem:[%s8227_s5 + $0x240] sm:$0xff] }
 0x1b0   :  { %v5113_v6 = vpop.f32.mrf.mxu0 }
 0x1b2   :  { %v5148_v10 = vpop.f32.mrf.mxu1  ;;  %v5114_v11 = vpop.f32.mrf.mxu0 }
 0x1b3   :  { %v5115_v14 = vadd.f32 %v5114_v11, %v5113_v6  ;;  %v1905_v6 = vld [vmem:[%s8227_s5 + $0x30] sm:$0xff]  ;;  %v1972_v11 = vld [vmem:[%s8227_s5 + $0x248] sm:$0xff] }
 0x1b4   :  { %v5149_v15 = vpop.f32.mrf.mxu1 }
 0x1b5   :  { %v1645_v17 = vadd.f32 %v5115_v14, %v1575_v16  ;;  %v5150_v18 = vadd.f32 %v5149_v15, %v5148_v10  ;;  %v2005_v10 = vld [vmem:[%s8227_s5 + $0x350] sm:$0xff]  ;;  %v1940_v15 = vld [vmem:[%s8227_s5 + $0x148] sm:$0xff]  ;;  %v1942_v16 = vld [vmem:[%s8227_s5 + $0x158] sm:$0xff] }
 0x1b6   :  { %v1973_v14 = vld [vmem:[%s8227_s5 + $0x250] sm:$0xff] }
 0x1b7   :  { %v1715_v23 = vadd.f32 %v5150_v18, %v1645_v17  ;;  %v1939_v17 = vld [vmem:[%s8227_s5 + $0x140] sm:$0xff]  ;;  %v1941_v18 = vld [vmem:[%s8227_s5 + $0x150] sm:$0xff] }
 0x1d3   :  { %v5183_v19 = vpop.f32.mrf.mxu0  ;;  %v5218_v20 = vpop.f32.mrf.mxu1 }
 0x1d5   :  { %v5184_v21 = vpop.f32.mrf.mxu0  ;;  %v5219_v22 = vpop.f32.mrf.mxu1 }
 0x1d6   :  { %v5185_v25 = vadd.f32 %v5184_v21, %v5183_v19  ;;  %v5220_v27 = vadd.f32 %v5219_v22, %v5218_v20  ;;  %v1908_v19 = vld [vmem:[%s8227_s5 + $0x48] sm:$0xff]  ;;  %v1910_v20 = vld [vmem:[%s8227_s5 + $0x58] sm:$0xff]  ;;  %v1907_v21 = vld [vmem:[%s8227_s5 + $0x40] sm:$0xff] }
 0x1d7   :  { %v1909_v22 = vld [vmem:[%s8227_s5 + $0x50] sm:$0xff] }
 0x1d8   :  { %v1785_v26 = vadd.f32 %v5185_v25, %v1715_v23  ;;  %v2008_v23 = vld [vmem:[%s8227_s5 + $0x368] sm:$0xff]  ;;  %v2010_v25 = vld [vmem:[%s8227_s5 + $0x378] sm:$0xff] }
 0x1da   :  { %v1855_v28 = vadd.f32 %v5220_v27, %v1785_v26  ;;  %v2007_v26 = vld [vmem:[%s8227_s5 + $0x360] sm:$0xff]  ;;  %v2009_v27 = vld [vmem:[%s8227_s5 + $0x370] sm:$0xff] }
 0x1dc   :  { %v1860_v29 = vsel %vm1858_vm0, %v1855_v28, 0.0  ;;  %1859 = vst.msk [vmem:[#allocation2] sm:$0x3] %vm1858_vm0, %v1855_v28 }
 0x1dd   :  { %v1861_v30 = vrot.slane %v1860_v29, 4 }
 0x1df   :  { %v1862_v31 = vadd.f32 %v1861_v30, %v1860_v29  ;;  %v1978_v29 = vld [vmem:[%s8227_s5 + $0x278] sm:$0xff]  ;;  %v1975_v30 = vld [vmem:[%s8227_s5 + $0x260] sm:$0xff] }
 0x1e1   :  { %v1863_v32 = vrot.slane %v1862_v31, 2 }
 0x1e3   :  { %v1864_v33 = vadd.f32 %v1863_v32, %v1862_v31  ;;  %v1977_v31 = vld [vmem:[%s8227_s5 + $0x270] sm:$0xff]  ;;  %v1944_v32 = vld [vmem:[%s8227_s5 + $0x168] sm:$0xff] }
 0x1e5   :  { %v1865_v34 = vrot.slane %v1864_v33, 1 }
 0x1e7   :  { %v1866_v35 = vadd.f32 %v1865_v34, %v1864_v33  ;;  %v1946_v33 = vld [vmem:[%s8227_s5 + $0x178] sm:$0xff]  ;;  %v1943_v34 = vld [vmem:[%s8227_s5 + $0x160] sm:$0xff] }
 0x1e9   :  { %v1868_v36 = vmul.f32 0.5, %v1866_v35  ;;  %v1945_v35 = vld [vmem:[%s8227_s5 + $0x170] sm:$0xff] }
 0x1eb   :  { %v1869_v37 = vsub.f32 %v1855_v28, %v1868_v36  ;;  %v1976_v28 = vld [vmem:[%s8227_s5 + $0x268] sm:$0xff] }
 0x1ec   :  { %v1912_v36 = vld [vmem:[%s8227_s5 + $0x68] sm:$0xff] }
 0x1ed   :  { %v1870_v38 = vmul.f32 %v1869_v37, %v1869_v37 }
 0x1ef   :  { %v1871_v39 = vsel %vm1858_vm0, %v1870_v38, 0.0  ;;  %v1911_v38 = vld [vmem:[%s8227_s5 + $0x60] sm:$0xff] }
 0x1f0   :  { %v1872_v40 = vrot.slane %v1871_v39, 4 }
 0x1f2   :  { %v1873_v41 = vadd.f32 %v1872_v40, %v1871_v39  ;;  %v1913_v39 = vld [vmem:[%s8227_s5 + $0x70] sm:$0xff]  ;;  %v2012_v40 = vld [vmem:[%s8227_s5 + $0x388] sm:$0xff] }
 0x1f4   :  { %v1874_v43 = vrot.slane %v1873_v41, 2 }
 0x1f6   :  { %v1875_v44 = vadd.f32 %v1874_v43, %v1873_v41  ;;  %v2014_v41 = vld [vmem:[%s8227_s5 + $0x398] sm:$0xff]  ;;  %v2011_v43 = vld [vmem:[%s8227_s5 + $0x380] sm:$0xff] }
 0x1f8   :  { %v1876_v45 = vrot.slane %v1875_v44, 1 }
 0x1fa   :  { %v1877_v46 = vadd.f32 %v1876_v45, %v1875_v44  ;;  %v2013_v44 = vld [vmem:[%s8227_s5 + $0x390] sm:$0xff]  ;;  %v1980_v45 = vld [vmem:[%s8227_s5 + $0x288] sm:$0xff] }
 0x1fc   :  { %v1878_v47 = vmul.f32 0.5, %v1877_v46  ;;  %v1982_v46 = vld [vmem:[%s8227_s5 + $0x298] sm:$0xff] }
 0x1fe   :  { %v1879_v48 = vadd.f32 0.8, %v1878_v47  ;;  %v1979_v47 = vld [vmem:[%s8227_s5 + $0x280] sm:$0xff] }
 0x200   :  { %5232 = vrsqrt.f32 %v1879_v48  ;;  %v1981_v48 = vld [vmem:[%s8227_s5 + $0x290] sm:$0xff] }
 0x20d   :  { %v5233_v49 = vpop.eup %5232 }
 0x20e   :  { %v1881_v52 = vmul.f32 %v5233_v49, %v1869_v37  ;;  %v1914_v37 = vld [vmem:[%s8227_s5 + $0x78] sm:$0xff]  ;;  %v1948_v49 = vld [vmem:[%s8227_s5 + $0x188] sm:$0xff] }
 0x210   :  { %v1889_v54 = vmul.f32 %v4643_v50, %v1881_v52  ;;  %v1950_v50 = vld [vmem:[%s8227_s5 + $0x198] sm:$0xff]  ;;  %v1947_v52 = vld [vmem:[%s8227_s5 + $0x180] sm:$0xff] }
 0x212   :  { %v1897_v55 = vadd.f32 %v4644_v53, %v1889_v54  ;;  %v1949_v53 = vld [vmem:[%s8227_s5 + $0x190] sm:$0xff]  ;;  %v1916_v54 = vld [vmem:[%s8227_s5 + $0x88] sm:$0xff] }
 0x214   :  { %v7025_v56 = vmax.f32 %v1897_v55, 0.0  ;;  %v1918_v55 = vld [vmem:[%s8227_s5 + $0x98] sm:$0xff] }
 0x216   :  { %4645 = vmatmul.mubr.msk.f32.vlgmr.msra.gmra.mxu0 %vm2195_vm1, %v7025_v56  ;;  %4646 = vmatmul.mubr.msk.f32.vlgmr.msra.gmra.mxu1 %vm2195_vm1, %v7025_v56 }
 0x217   :  { %2366 = vmatpush1.msra.mxu0 %v1999_v57  ;;  %2437 = vmatpush1.msra.mxu1 %v2001_v58  ;;  %v1915_v57 = vld [vmem:[%s8227_s5 + $0x80] sm:$0xff]  ;;  %v1917_v58 = vld [vmem:[%s8227_s5 + $0x90] sm:$0xff] }
 0x218   :  { %2367 = vmatprep.subr.mxu0 %v1968_v59  ;;  %2438 = vmatprep.subr.mxu1 %v1970_v60  ;;  %v2016_v59 = vld [vmem:[%s8227_s5 + $0x3a8] sm:$0xff]  ;;  %v2018_v60 = vld [vmem:[%s8227_s5 + $0x3b8] sm:$0xff] }
 0x219   :  { %2368 = vmatpush1.msra.mxu0 %v1967_v61  ;;  %2439 = vmatpush1.msra.mxu1 %v1969_v62  ;;  %v2015_v61 = vld [vmem:[%s8227_s5 + $0x3a0] sm:$0xff]  ;;  %v2017_v62 = vld [vmem:[%s8227_s5 + $0x3b0] sm:$0xff] }
 0x21a   :  { %2369 = vmatprep.subr.mxu0 %v1936_v63  ;;  %2440 = vmatprep.subr.mxu1 %v1938_v0  ;;  %v1984_v63 = vld [vmem:[%s8227_s5 + $0x2a8] sm:$0xff]  ;;  %v1986_v0 = vld [vmem:[%s8227_s5 + $0x2b8] sm:$0xff] }
 0x21b   :  { %2370 = vmatpush1.msra.mxu0 %v1935_v1  ;;  %2441 = vmatpush1.msra.mxu1 %v1937_v2  ;;  %v1983_v1 = vld [vmem:[%s8227_s5 + $0x2a0] sm:$0xff]  ;;  %v1985_v2 = vld [vmem:[%s8227_s5 + $0x2b0] sm:$0xff] }
 0x21c   :  { %2371 = vmatprep.subr.mxu0 %v1904_v3  ;;  %2442 = vmatprep.subr.mxu1 %v1906_v4  ;;  %v1952_v3 = vld [vmem:[%s8227_s5 + $0x1a8] sm:$0xff]  ;;  %v1954_v4 = vld [vmem:[%s8227_s5 + $0x1b8] sm:$0xff] }
 0x21d   :  { %2372 = vmatpush1.msra.mxu0 %v1903_v5  ;;  %2405 = vmatprep.mubr.f32.mxu0 %v5322_v24  ;;  %v1951_v5 = vld [vmem:[%s8227_s5 + $0x1a0] sm:$0xff] }
 0x21e   :  { %2443 = vmatpush1.msra.mxu1 %v1905_v6  ;;  %2476 = vmatprep.mubr.f32.mxu1 %v5322_v24  ;;  %v1953_v6 = vld [vmem:[%s8227_s5 + $0x1b0] sm:$0xff] }
 0x21f   :  { %4647 = vmatmul.mubr.msk.f32.vlgmr.msra.gmra.mxu0 %vm2195_vm1, %v7025_v56  ;;  %4648 = vmatmul.mubr.msk.f32.vlgmr.msra.gmra.mxu1 %vm2195_vm1, %v7025_v56 }
 0x220   :  { %2507 = vmatprep.subr.mxu0 %v2004_v7  ;;  %2578 = vmatprep.subr.mxu1 %v2006_v8  ;;  %v1920_v7 = vld [vmem:[%s8227_s5 + $0xa8] sm:$0xff]  ;;  %v1922_v8 = vld [vmem:[%s8227_s5 + $0xb8] sm:$0xff] }
 0x221   :  { %2508 = vmatpush1.msra.mxu0 %v2003_v9  ;;  %2579 = vmatpush1.msra.mxu1 %v2005_v10  ;;  %v1919_v9 = vld [vmem:[%s8227_s5 + $0xa0] sm:$0xff]  ;;  %v1921_v10 = vld [vmem:[%s8227_s5 + $0xb0] sm:$0xff] }
 0x222   :  { %2509 = vmatprep.subr.mxu0 %v1972_v11  ;;  %2580 = vmatprep.subr.mxu1 %v1974_v12  ;;  %v2020_v11 = vld [vmem:[%s8227_s5 + $0x3c8] sm:$0xff]  ;;  %v2022_v12 = vld [vmem:[%s8227_s5 + $0x3d8] sm:$0xff] }
 0x223   :  { %2510 = vmatpush1.msra.mxu0 %v1971_v13  ;;  %2581 = vmatpush1.msra.mxu1 %v1973_v14  ;;  %v2019_v13 = vld [vmem:[%s8227_s5 + $0x3c0] sm:$0xff]  ;;  %v2021_v14 = vld [vmem:[%s8227_s5 + $0x3d0] sm:$0xff] }
 0x224   :  { %2511 = vmatprep.subr.mxu0 %v1940_v15  ;;  %2582 = vmatprep.subr.mxu1 %v1942_v16  ;;  %v1988_v15 = vld [vmem:[%s8227_s5 + $0x2c8] sm:$0xff]  ;;  %v1990_v16 = vld [vmem:[%s8227_s5 + $0x2d8] sm:$0xff] }
 0x225   :  { %2512 = vmatpush1.msra.mxu0 %v1939_v17  ;;  %2583 = vmatpush1.msra.mxu1 %v1941_v18  ;;  %v1987_v17 = vld [vmem:[%s8227_s5 + $0x2c0] sm:$0xff]  ;;  %v1989_v18 = vld [vmem:[%s8227_s5 + $0x2d0] sm:$0xff] }
 0x226   :  { %2513 = vmatprep.subr.mxu0 %v1908_v19  ;;  %2584 = vmatprep.subr.mxu1 %v1910_v20  ;;  %v1956_v19 = vld [vmem:[%s8227_s5 + $0x1c8] sm:$0xff]  ;;  %v1958_v20 = vld [vmem:[%s8227_s5 + $0x1d8] sm:$0xff] }
 0x227   :  { %2514 = vmatpush1.msra.mxu0 %v1907_v21  ;;  %2547 = vmatprep.mubr.f32.mxu0 %v5322_v24  ;;  %v1955_v21 = vld [vmem:[%s8227_s5 + $0x1c0] sm:$0xff] }
 0x228   :  { %2585 = vmatpush1.msra.mxu1 %v1909_v22  ;;  %2618 = vmatprep.mubr.f32.mxu1 %v5322_v24  ;;  %v1957_v22 = vld [vmem:[%s8227_s5 + $0x1d0] sm:$0xff] }
 0x229   :  { %4649 = vmatmul.mubr.msk.f32.vlgmr.msra.gmra.mxu0 %vm2195_vm1, %v7025_v56  ;;  %4650 = vmatmul.mubr.msk.f32.vlgmr.msra.gmra.mxu1 %vm2195_vm1, %v7025_v56 }
 0x22a   :  { %2649 = vmatprep.subr.mxu0 %v2008_v23  ;;  %2720 = vmatprep.subr.mxu1 %v2010_v25  ;;  %v1924_v23 = vld [vmem:[%s8227_s5 + $0xc8] sm:$0xff]  ;;  %v1926_v25 = vld [vmem:[%s8227_s5 + $0xd8] sm:$0xff] }
 0x22b   :  { %2650 = vmatpush1.msra.mxu0 %v2007_v26  ;;  %2721 = vmatpush1.msra.mxu1 %v2009_v27  ;;  %v1923_v26 = vld [vmem:[%s8227_s5 + $0xc0] sm:$0xff]  ;;  %v1925_v27 = vld [vmem:[%s8227_s5 + $0xd0] sm:$0xff] }
 0x22c   :  { %2651 = vmatprep.subr.mxu0 %v1976_v28  ;;  %2722 = vmatprep.subr.mxu1 %v1978_v29  ;;  %v2024_v28 = vld [vmem:[%s8227_s5 + $0x3e8] sm:$0xff]  ;;  %v2026_v29 = vld [vmem:[%s8227_s5 + $0x3f8] sm:$0xff] }
 0x22d   :  { %2652 = vmatpush1.msra.mxu0 %v1975_v30  ;;  %2723 = vmatpush1.msra.mxu1 %v1977_v31  ;;  %v2023_v30 = vld [vmem:[%s8227_s5 + $0x3e0] sm:$0xff]  ;;  %v2025_v31 = vld [vmem:[%s8227_s5 + $0x3f0] sm:$0xff] }
 0x22e   :  { %2653 = vmatprep.subr.mxu0 %v1944_v32  ;;  %2724 = vmatprep.subr.mxu1 %v1946_v33  ;;  %v1992_v32 = vld [vmem:[%s8227_s5 + $0x2e8] sm:$0xff]  ;;  %v1994_v33 = vld [vmem:[%s8227_s5 + $0x2f8] sm:$0xff] }
 0x22f   :  { %2654 = vmatpush1.msra.mxu0 %v1943_v34  ;;  %2725 = vmatpush1.msra.mxu1 %v1945_v35  ;;  %v1991_v34 = vld [vmem:[%s8227_s5 + $0x2e0] sm:$0xff]  ;;  %v1993_v35 = vld [vmem:[%s8227_s5 + $0x2f0] sm:$0xff] }
 0x230   :  { %2655 = vmatprep.subr.mxu0 %v1912_v36  ;;  %2726 = vmatprep.subr.mxu1 %v1914_v37  ;;  %v1960_v36 = vld [vmem:[%s8227_s5 + $0x1e8] sm:$0xff]  ;;  %v1962_v37 = vld [vmem:[%s8227_s5 + $0x1f8] sm:$0xff] }
 0x231   :  { %2656 = vmatpush1.msra.mxu0 %v1911_v38  ;;  %2689 = vmatprep.mubr.f32.mxu0 %v5322_v24  ;;  %v1959_v38 = vld [vmem:[%s8227_s5 + $0x1e0] sm:$0xff] }
 0x232   :  { %2727 = vmatpush1.msra.mxu1 %v1913_v39  ;;  %2760 = vmatprep.mubr.f32.mxu1 %v5322_v24  ;;  %v1961_v39 = vld [vmem:[%s8227_s5 + $0x1f0] sm:$0xff] }
 0x233   :  { %4651 = vmatmul.mubr.msk.f32.vlgmr.msra.gmra.mxu0 %vm2195_vm1, %v7025_v56  ;;  %4652 = vmatmul.mubr.msk.f32.vlgmr.msra.gmra.mxu1 %vm2195_vm1, %v7025_v56 }
 0x234   :  { %2791 = vmatprep.subr.mxu0 %v2012_v40  ;;  %2862 = vmatprep.subr.mxu1 %v2014_v41  ;;  %v1928_v40 = vld [vmem:[%s8227_s5 + $0xe8] sm:$0xff]  ;;  %v1930_v41 = vld [vmem:[%s8227_s5 + $0xf8] sm:$0xff] }
 0x235   :  { %2792 = vmatpush1.msra.mxu0 %v2011_v43  ;;  %2863 = vmatpush1.msra.mxu1 %v2013_v44  ;;  %v1927_v43 = vld [vmem:[%s8227_s5 + $0xe0] sm:$0xff]  ;;  %v1929_v44 = vld [vmem:[%s8227_s5 + $0xf0] sm:$0xff] }
 0x236   :  { %2793 = vmatprep.subr.mxu0 %v1980_v45  ;;  %2864 = vmatprep.subr.mxu1 %v1982_v46  ;;  %v7404_v45 = vsub.s32 0, %v5493_v42  ;;  %v7407_v46 = vsub.s32 2, %v5493_v42 }
 0x237   :  { %2794 = vmatpush1.msra.mxu0 %v1979_v47  ;;  %2865 = vmatpush1.msra.mxu1 %v1981_v48  ;;  %v7410_v47 = vsub.s32 1, %v5493_v42  ;;  %v7415_v48 = vld [vmem:[%s8228_s6] sm:$0xff] }
 0x238   :  { %2795 = vmatprep.subr.mxu0 %v1948_v49  ;;  %2866 = vmatprep.subr.mxu1 %v1950_v50  ;;  %v7421_v49 = vsub.s32 4, %v5493_v42  ;;  %v7427_v50 = vsub.s32 5, %v5493_v42 }
 0x239   :  { %2796 = vmatpush1.msra.mxu0 %v1947_v52  ;;  %2867 = vmatpush1.msra.mxu1 %v1949_v53  ;;  %v7430_v52 = vsub.s32 7, %v5493_v42  ;;  %v7435_v53 = vld [vmem:[%s8228_s6 + $0x8] sm:$0xff] }
 0x23a   :  { %2797 = vmatprep.subr.mxu0 %v1916_v54  ;;  %2868 = vmatprep.subr.mxu1 %v1918_v55  ;;  %v2038_v54 = vrot.slane %v7415_v48, %v7404_v45  ;;  %v7442_v55 = vld [vmem:[%s8229_s7] sm:$0xff] }
 0x23b   :  { %2798 = vmatpush1.msra.mxu0 %v1915_v57  ;;  %2831 = vmatprep.mubr.f32.mxu0 %v5322_v24  ;;  %v7447_v57 = vld [vmem:[%s8230_s8] sm:$0xff] }
 0x23c   :  { %2869 = vmatpush1.msra.mxu1 %v1917_v58  ;;  %2902 = vmatprep.mubr.f32.mxu1 %v5322_v24  ;;  %v2042_v58 = vrot.slane %v7415_v48, %v7410_v47 }
 0x23d   :  { %4653 = vmatmul.mubr.msk.f32.vlgmr.msra.gmra.mxu0 %vm2195_vm1, %v7025_v56  ;;  %4654 = vmatmul.mubr.msk.f32.vlgmr.msra.gmra.mxu1 %vm2195_vm1, %v7025_v56 }
 0x23e   :  { %2933 = vmatprep.subr.mxu0 %v2016_v59  ;;  %3004 = vmatprep.subr.mxu1 %v2018_v60  ;;  %v2054_v60 = vrot.slane %v7415_v48, %v7421_v49 }
 0x23f   :  { %2934 = vmatpush1.msra.mxu0 %v2015_v61  ;;  %3005 = vmatpush1.msra.mxu1 %v2017_v62  ;;  %v2058_v62 = vrot.slane %v7415_v48, %v7427_v50 }
 0x240   :  { %2935 = vmatprep.subr.mxu0 %v1984_v63  ;;  %3006 = vmatprep.subr.mxu1 %v1986_v0  ;;  %v2066_v63 = vrot.slane %v7415_v48, %v7430_v52  ;;  %v2070_v0 = vrot.slane %v7435_v53, %v7404_v45 }
 0x241   :  { %2936 = vmatpush1.msra.mxu0 %v1983_v1  ;;  %3007 = vmatpush1.msra.mxu1 %v1985_v2  ;;  %v2078_v1 = vrot.slane %v7435_v53, %v7407_v46  ;;  %v2074_v2 = vrot.slane %v7435_v53, %v7410_v47 }
 0x242   :  { %2937 = vmatprep.subr.mxu0 %v1952_v3  ;;  %3008 = vmatprep.subr.mxu1 %v1954_v4  ;;  %v4019_v3 = vrot.slane %v7442_v55, %v7404_v45 }
 0x243   :  { %2938 = vmatpush1.msra.mxu0 %v1951_v5  ;;  %3009 = vmatpush1.msra.mxu1 %v1953_v6  ;;  %v2086_v6 = vrot.slane %v7435_v53, %v7421_v49 }
 0x244   :  { %2939 = vmatprep.subr.mxu0 %v1920_v7  ;;  %3010 = vmatprep.subr.mxu1 %v1922_v8 }
 0x245   :  { %2940 = vmatpush1.msra.mxu0 %v1919_v9  ;;  %2973 = vmatprep.mubr.f32.mxu0 %v5322_v24  ;;  %v4027_v9 = vrot.slane %v7442_v55, %v7407_v46 }
 0x246   :  { %3011 = vmatpush1.msra.mxu1 %v1921_v10  ;;  %3044 = vmatprep.mubr.f32.mxu1 %v5322_v24 }
 0x247   :  { %4655 = vmatmul.mubr.msk.f32.vlgmr.msra.gmra.mxu0 %vm2195_vm1, %v7025_v56  ;;  %4656 = vmatmul.mubr.msk.f32.vlgmr.msra.gmra.mxu1 %vm2195_vm1, %v7025_v56 }
 0x248   :  { %3075 = vmatprep.subr.mxu0 %v2020_v11  ;;  %3146 = vmatprep.subr.mxu1 %v2022_v12 }
 0x249   :  { %3076 = vmatpush1.msra.mxu0 %v2019_v13  ;;  %3147 = vmatpush1.msra.mxu1 %v2021_v14 }
 0x24a   :  { %3077 = vmatprep.subr.mxu0 %v1988_v15  ;;  %3148 = vmatprep.subr.mxu1 %v1990_v16 }
 0x24b   :  { %3078 = vmatpush1.msra.mxu0 %v1987_v17  ;;  %3149 = vmatpush1.msra.mxu1 %v1989_v18 }
 0x24c   :  { %3079 = vmatprep.subr.mxu0 %v1956_v19  ;;  %3150 = vmatprep.subr.mxu1 %v1958_v20 }
 0x24d   :  { %3080 = vmatpush1.msra.mxu0 %v1955_v21  ;;  %3151 = vmatpush1.msra.mxu1 %v1957_v22 }
 0x24e   :  { %3081 = vmatprep.subr.mxu0 %v1924_v23  ;;  %3152 = vmatprep.subr.mxu1 %v1926_v25 }
 0x24f   :  { %3082 = vmatpush1.msra.mxu0 %v1923_v26  ;;  %3115 = vmatprep.mubr.f32.mxu0 %v5322_v24 }
 0x250   :  { %3153 = vmatpush1.msra.mxu1 %v1925_v27  ;;  %3186 = vmatprep.mubr.f32.mxu1 %v5322_v24 }
 0x251   :  { %4657 = vmatmul.mubr.msk.f32.vlgmr.msra.gmra.mxu0 %vm2195_vm1, %v7025_v56  ;;  %4658 = vmatmul.mubr.msk.f32.vlgmr.msra.gmra.mxu1 %vm2195_vm1, %v7025_v56 }
 0x252   :  { %3217 = vmatprep.subr.mxu0 %v2024_v28  ;;  %3288 = vmatprep.subr.mxu1 %v2026_v29 }
 0x253   :  { %3218 = vmatpush1.msra.mxu0 %v2023_v30  ;;  %3289 = vmatpush1.msra.mxu1 %v2025_v31 }
 0x254   :  { %3219 = vmatprep.subr.mxu0 %v1992_v32  ;;  %3290 = vmatprep.subr.mxu1 %v1994_v33  ;;  %v7516_v32 = vld [vmem:[%s8228_s6 + $0x10] sm:$0xff] }
 0x255   :  { %3220 = vmatpush1.msra.mxu0 %v1991_v34  ;;  %3291 = vmatpush1.msra.mxu1 %v1993_v35 }
 0x256   :  { %3221 = vmatprep.subr.mxu0 %v1960_v36  ;;  %3292 = vmatprep.subr.mxu1 %v1962_v37 }
 0x257   :  { %3222 = vmatpush1.msra.mxu0 %v1959_v38  ;;  %3293 = vmatpush1.msra.mxu1 %v1961_v39 }
 0x258   :  { %3223 = vmatprep.subr.mxu0 %v1928_v40  ;;  %3294 = vmatprep.subr.mxu1 %v1930_v41  ;;  %v7529_v41 = vld [vmem:[%s8229_s7 + $0x8] sm:$0xff] }
 0x259   :  { %3224 = vmatpush1.msra.mxu0 %v1927_v43  ;;  %3257 = vmatprep.mubr.f32.mxu0 %v5322_v24 }
 0x25a   :  { %3295 = vmatpush1.msra.mxu1 %v1929_v44  ;;  %3328 = vmatprep.mubr.f32.mxu1 %v5322_v24  ;;  %v7418_v24 = vsub.s32 3, %v5493_v42 }
 0x25b   :  { %4659 = vmatmul.mubr.msk.f32.vlgmr.msra.gmra.mxu0 %vm2195_vm1, %v7025_v56  ;;  %4660 = vmatmul.mubr.msk.f32.vlgmr.msra.gmra.mxu1 %vm2195_vm1, %v7025_v56  ;;  %v7424_v56 = vsub.s32 6, %v5493_v42  ;;  %v2046_v42 = vrot.slane %v7415_v48, %v7407_v46 }
 0x25c   :  { %v2050_v59 = vrot.slane %v7415_v48, %v7418_v24  ;;  %v2082_v5 = vrot.slane %v7435_v53, %v7418_v24 }
 0x25d   :  { %v2062_v61 = vrot.slane %v7415_v48, %v7424_v56 }
 0x2d6   :  { %v2265_v7 = vpop.f32.mrf.mxu0  ;;  %v2336_v8 = vpop.f32.mrf.mxu1 }
 0x2d7   :  { %v7485_v13 = vadd.f32 %v2265_v7, %v2038_v54  ;;  %v7487_v14 = vadd.f32 %v2336_v8, %v2046_v42 }
 0x2d8   :  { %v2267_v17 = vpop.f32.mrf.mxu0  ;;  %v2338_v18 = vpop.f32.mrf.mxu1 }
 0x2d9   :  { %v3336_v23 = vsel %vm3335_vm2, %v7485_v13, 0.0  ;;  %v3350_v25 = vsel %vm3335_vm2, %v7487_v14, 0.0  ;;  %v7505_v26 = vadd.f32 %v2267_v17, %v2042_v58  ;;  %v7507_v27 = vadd.f32 %v2338_v18, %v2050_v59  ;;  %v7542_v17 = vld [vmem:[%s8230_s8 + $0x8] sm:$0xff] }
 0x2da   :  { %v3337_v28 = vrot.slane %v3336_v23, 4  ;;  %v3351_v29 = vrot.slane %v3350_v25, 4 }
 0x2db   :  { %v3343_v33 = vsel %vm3335_vm2, %v7505_v26, 0.0  ;;  %v3357_v34 = vsel %vm3335_vm2, %v7507_v27, 0.0 }
 0x2dc   :  { %v3338_v37 = vadd.f32 %v3337_v28, %v3336_v23  ;;  %v3352_v38 = vadd.f32 %v3351_v29, %v3350_v25  ;;  %v3344_v39 = vrot.slane %v3343_v33, 4  ;;  %v3358_v40 = vrot.slane %v3357_v34, 4 }
 0x2de   :  { %v3339_v58 = vrot.slane %v3338_v37, 2  ;;  %v3353_v59 = vrot.slane %v3352_v38, 2  ;;  %v3345_v7 = vadd.f32 %v3344_v39, %v3343_v33  ;;  %v3359_v8 = vadd.f32 %v3358_v40, %v3357_v34 }
 0x2df   :  { %v2407_v18 = vpop.f32.mrf.mxu0  ;;  %v2478_v23 = vpop.f32.mrf.mxu1 }
 0x2e0   :  { %v3340_v34 = vadd.f32 %v3339_v58, %v3338_v37  ;;  %v3354_v39 = vadd.f32 %v3353_v59, %v3352_v38  ;;  %v3346_v40 = vrot.slane %v3345_v7, 2  ;;  %v3360_v42 = vrot.slane %v3359_v8, 2 }
 0x2e1   :  { %v7555_v54 = vadd.f32 %v2407_v18, %v2054_v60  ;;  %v7560_v25 = vadd.f32 %v2478_v23, %v2062_v61  ;;  %v2409_v28 = vpop.f32.mrf.mxu0  ;;  %v2480_v36 = vpop.f32.mrf.mxu1 }
 0x2e2   :  { %v3341_v38 = vrot.slane %v3340_v34, 1  ;;  %v3355_v58 = vrot.slane %v3354_v39, 1  ;;  %v3347_v59 = vadd.f32 %v3346_v40, %v3345_v7  ;;  %v3361_v33 = vadd.f32 %v3360_v42, %v3359_v8 }
 0x2e3   :  { %v3364_v60 = vsel %vm3335_vm2, %v7555_v54, 0.0  ;;  %v3378_v18 = vsel %vm3335_vm2, %v7560_v25, 0.0  ;;  %v7573_v61 = vadd.f32 %v2409_v28, %v2058_v62  ;;  %v7578_v23 = vadd.f32 %v2480_v36, %v2066_v63 }
 0x2e4   :  { %v3342_v37 = vadd.f32 %v3341_v38, %v3340_v34  ;;  %v3356_v29 = vadd.f32 %v3355_v58, %v3354_v39  ;;  %v3348_v7 = vrot.slane %v3347_v59, 1  ;;  %v3362_v42 = vrot.slane %v3361_v33, 1 }
 0x2e5   :  { %v3365_v8 = vrot.slane %v3364_v60, 4  ;;  %v3379_v40 = vrot.slane %v3378_v18, 4  ;;  %v3371_v44 = vsel %vm3335_vm2, %v7573_v61, 0.0  ;;  %v3385_v35 = vsel %vm3335_vm2, %v7578_v23, 0.0 }
 0x2e6   :  { %v3560_v43 = vmul.f32 0.5, %v3342_v37  ;;  %v3562_v62 = vmul.f32 0.5, %v3356_v29  ;;  %v3349_v28 = vadd.f32 %v3348_v7, %v3347_v59  ;;  %v3363_v30 = vadd.f32 %v3362_v42, %v3361_v33 }
 0x2e7   :  { %v3366_v31 = vadd.f32 %v3365_v8, %v3364_v60  ;;  %v3380_v48 = vadd.f32 %v3379_v40, %v3378_v18  ;;  %v3372_v63 = vrot.slane %v3371_v44, 4  ;;  %v3386_v36 = vrot.slane %v3385_v35, 4 }
 0x2e8   :  { %v7585_v34 = vsub.f32 %v7485_v13, %v3560_v43  ;;  %v7588_v39 = vsub.f32 %v7487_v14, %v3562_v62  ;;  %v3561_v38 = vmul.f32 0.5, %v3349_v28  ;;  %v3563_v58 = vmul.f32 0.5, %v3363_v30 }
 0x2e9   :  { %v3367_v20 = vrot.slane %v3366_v31, 2  ;;  %v3381_v21 = vrot.slane %v3380_v48, 2  ;;  %v3373_v19 = vadd.f32 %v3372_v63, %v3371_v44  ;;  %v3387_v22 = vadd.f32 %v3386_v36, %v3385_v35 }
 0x2ea   :  { %v3624_v29 = vmul.f32 %v7585_v34, %v7585_v34  ;;  %v3626_v33 = vmul.f32 %v7588_v39, %v7588_v39  ;;  %v7595_v37 = vsub.f32 %v7505_v26, %v3561_v38  ;;  %v7598_v13 = vsub.f32 %v7507_v27, %v3563_v58 }
 0x2eb   :  { %v3368_v14 = vadd.f32 %v3367_v20, %v3366_v31  ;;  %v3382_v43 = vadd.f32 %v3381_v21, %v3380_v48  ;;  %v3374_v59 = vrot.slane %v3373_v19, 2  ;;  %v3388_v30 = vrot.slane %v3387_v22, 2 }
 0x2ec   :  { %v3656_v60 = vsel %vm3335_vm2, %v3624_v29, 0.0  ;;  %v3670_v35 = vsel %vm3335_vm2, %v3626_v33, 0.0  ;;  %v3625_v44 = vmul.f32 %v7595_v37, %v7595_v37  ;;  %v3627_v18 = vmul.f32 %v7598_v13, %v7598_v13 }
 0x2ed   :  { %v3657_v7 = vrot.slane %v3656_v60, 4  ;;  %v3671_v26 = vrot.slane %v3670_v35, 4  ;;  %v3369_v42 = vrot.slane %v3368_v14, 1  ;;  %v3383_v8 = vrot.slane %v3382_v43, 1 }
 0x2ee   :  { %v3663_v27 = vsel %vm3335_vm2, %v3625_v44, 0.0  ;;  %v3677_v20 = vsel %vm3335_vm2, %v3627_v18, 0.0  ;;  %v3375_v21 = vadd.f32 %v3374_v59, %v3373_v19  ;;  %v3389_v31 = vadd.f32 %v3388_v30, %v3387_v22 }
 0x2ef   :  { %v3658_v40 = vadd.f32 %v3657_v7, %v3656_v60  ;;  %v3672_v62 = vadd.f32 %v3671_v26, %v3670_v35  ;;  %v3664_v28 = vrot.slane %v3663_v27, 4  ;;  %v3678_v48 = vrot.slane %v3677_v20, 4 }
 0x2f0   :  { %v3370_v63 = vadd.f32 %v3369_v42, %v3368_v14  ;;  %v3384_v36 = vadd.f32 %v3383_v8, %v3382_v43  ;;  %v3376_v38 = vrot.slane %v3375_v21, 1  ;;  %v3390_v58 = vrot.slane %v3389_v31, 1 }
 0x2f1   :  { %v3659_v29 = vrot.slane %v3658_v40, 2  ;;  %v3673_v33 = vrot.slane %v3672_v62, 2  ;;  %v3665_v16 = vadd.f32 %v3664_v28, %v3663_v27  ;;  %v3679_v12 = vadd.f32 %v3678_v48, %v3677_v20 }
 0x2f2   :  { %v3564_v15 = vmul.f32 0.5, %v3370_v63  ;;  %v3566_v10 = vmul.f32 0.5, %v3384_v36  ;;  %v3377_v11 = vadd.f32 %v3376_v38, %v3375_v21  ;;  %v3391_v44 = vadd.f32 %v3390_v58, %v3389_v31  ;;  %v2549_v63 = vpop.f32.mrf.mxu0 }
 0x2f3   :  { %v3660_v4 = vadd.f32 %v3659_v29, %v3658_v40  ;;  %v3674_v18 = vadd.f32 %v3673_v33, %v3672_v62  ;;  %v3666_v19 = vrot.slane %v3665_v16, 2  ;;  %v3680_v22 = vrot.slane %v3679_v12, 2 }
 0x2f4   :  { %v7609_v59 = vsub.f32 %v7555_v54, %v3564_v15  ;;  %v7612_v14 = vsub.f32 %v7560_v25, %v3566_v10  ;;  %v3565_v43 = vmul.f32 0.5, %v3377_v11  ;;  %v3567_v30 = vmul.f32 0.5, %v3391_v44 }
 0x2f5   :  { %v3661_v60 = vrot.slane %v3660_v4, 1  ;;  %v3675_v35 = vrot.slane %v3674_v18, 1  ;;  %v3667_v7 = vadd.f32 %v3666_v19, %v3665_v16  ;;  %v3681_v26 = vadd.f32 %v3680_v22, %v3679_v12  ;;  %v2620_v22 = vpop.f32.mrf.mxu1 }
 0x2f6   :  { %v3628_v42 = vmul.f32 %v7609_v59, %v7609_v59  ;;  %v3630_v8 = vmul.f32 %v7612_v14, %v7612_v14  ;;  %v7619_v27 = vsub.f32 %v7573_v61, %v3565_v43  ;;  %v7622_v15 = vsub.f32 %v7578_v23, %v3567_v30 }
 0x2f7   :  { %v3662_v10 = vadd.f32 %v3661_v60, %v3660_v4  ;;  %v3676_v54 = vadd.f32 %v3675_v35, %v3674_v18  ;;  %v3668_v11 = vrot.slane %v3667_v7, 1  ;;  %v3682_v25 = vrot.slane %v3681_v26, 1 }
 0x2f8   :  { %v3684_v20 = vsel %vm3335_vm2, %v3628_v42, 0.0  ;;  %v3698_v12 = vsel %vm3335_vm2, %v3630_v8, 0.0  ;;  %v3629_v16 = vmul.f32 %v7619_v27, %v7619_v27  ;;  %v3631_v21 = vmul.f32 %v7622_v15, %v7622_v15  ;;  %v2551_v42 = vpop.f32.mrf.mxu0 }
 0x2f9   :  { %v3880_v31 = vmul.f32 0.5, %v3662_v10  ;;  %v3882_v61 = vmul.f32 0.5, %v3676_v54  ;;  %v3669_v40 = vadd.f32 %v3668_v11, %v3667_v7  ;;  %v3683_v62 = vadd.f32 %v3682_v25, %v3681_v26 }
 0x2fa   :  { %v3685_v23 = vrot.slane %v3684_v20, 4  ;;  %v3699_v28 = vrot.slane %v3698_v12, 4  ;;  %v3691_v4 = vsel %vm3335_vm2, %v3629_v16, 0.0  ;;  %v3705_v48 = vsel %vm3335_vm2, %v3631_v21, 0.0 }
 0x2fb   :  { %v3912_v36 = vadd.f32 1e-05, %v3880_v31  ;;  %v3914_v38 = vadd.f32 1e-05, %v3882_v61  ;;  %v3881_v58 = vmul.f32 0.5, %v3669_v40  ;;  %v3883_v29 = vmul.f32 0.5, %v3683_v62 }
 0x2fc   :  { %v3686_v33 = vadd.f32 %v3685_v23, %v3684_v20  ;;  %v3700_v44 = vadd.f32 %v3699_v28, %v3698_v12  ;;  %v3692_v18 = vrot.slane %v3691_v4, 4  ;;  %v3706_v19 = vrot.slane %v3705_v48, 4  ;;  %v2622_v20 = vpop.f32.mrf.mxu1 }
 0x2fd   :  { %5234 = vrsqrt.f32 %v3912_v36  ;;  %v3913_v43 = vadd.f32 1e-05, %v3881_v58  ;;  %v3915_v30 = vadd.f32 1e-05, %v3883_v29  ;;  %v7635_v60 = vadd.f32 %v2549_v63, %v2070_v0 }
 0x2fe   :  { %5236 = vrsqrt.f32 %v3914_v38  ;;  %v3687_v35 = vrot.slane %v3686_v33, 2  ;;  %v3701_v7 = vrot.slane %v3700_v44, 2  ;;  %v3693_v26 = vadd.f32 %v3692_v18, %v3691_v4 }
 0x2ff   :  { %5238 = vrsqrt.f32 %v3913_v43  ;;  %v3707_v8 = vadd.f32 %v3706_v19, %v3705_v48  ;;  %v3392_v10 = vsel %vm3335_vm2, %v7635_v60, 0.0  ;;  %v7642_v54 = vadd.f32 %v2620_v22, %v2078_v1 }
 0x300   :  { %5240 = vrsqrt.f32 %v3915_v30  ;;  %v3688_v11 = vadd.f32 %v3687_v35, %v3686_v33  ;;  %v3702_v25 = vadd.f32 %v3701_v7, %v3700_v44  ;;  %v3694_v0 = vrot.slane %v3693_v26, 2 }
 0x301   :  { %v3708_v12 = vrot.slane %v3707_v8, 2  ;;  %v3393_v16 = vrot.slane %v3392_v10, 4  ;;  %v3406_v21 = vsel %vm3335_vm2, %v7642_v54, 0.0  ;;  %v7649_v31 = vadd.f32 %v2551_v42, %v2074_v2 }
 0x302   :  { %v3689_v61 = vrot.slane %v3688_v11, 1  ;;  %v3703_v40 = vrot.slane %v3702_v25, 1  ;;  %v3695_v62 = vadd.f32 %v3694_v0, %v3693_v26  ;;  %v3407_v1 = vrot.slane %v3406_v21, 4 }
 0x303   :  { %v3709_v23 = vadd.f32 %v3708_v12, %v3707_v8  ;;  %v3394_v28 = vadd.f32 %v3393_v16, %v3392_v10  ;;  %v3399_v4 = vsel %vm3335_vm2, %v7649_v31, 0.0  ;;  %v7656_v48 = vadd.f32 %v2622_v20, %v2082_v5  ;;  %v2691_v5 = vpop.f32.mrf.mxu0 }
 0x304   :  { %v3690_v63 = vadd.f32 %v3689_v61, %v3688_v11  ;;  %v3704_v36 = vadd.f32 %v3703_v40, %v3702_v25  ;;  %v3696_v38 = vrot.slane %v3695_v62, 1  ;;  %v3408_v58 = vadd.f32 %v3407_v1, %v3406_v21 }
 0x305   :  { %v3710_v2 = vrot.slane %v3709_v23, 1  ;;  %v3395_v29 = vrot.slane %v3394_v28, 2  ;;  %v3400_v33 = vrot.slane %v3399_v4, 4  ;;  %v3413_v44 = vsel %vm3335_vm2, %v7656_v48, 0.0 }
 0x306   :  { %v3884_v18 = vmul.f32 0.5, %v3690_v63  ;;  %v3886_v19 = vmul.f32 0.5, %v3704_v36  ;;  %v3697_v22 = vadd.f32 %v3696_v38, %v3695_v62  ;;  %v3409_v43 = vrot.slane %v3408_v58, 2 }
 0x307   :  { %v3711_v30 = vadd.f32 %v3710_v2, %v3709_v23  ;;  %v3396_v35 = vadd.f32 %v3395_v29, %v3394_v28  ;;  %v3401_v7 = vadd.f32 %v3400_v33, %v3399_v4  ;;  %v3414_v26 = vrot.slane %v3413_v44, 4 }
 0x308   :  { %v3916_v42 = vadd.f32 1e-05, %v3884_v18  ;;  %v3918_v8 = vadd.f32 1e-05, %v3886_v19  ;;  %v3885_v10 = vmul.f32 0.5, %v3697_v22  ;;  %v3410_v11 = vadd.f32 %v3409_v43, %v3408_v58 }
 0x309   :  { %v3887_v25 = vmul.f32 0.5, %v3711_v30  ;;  %v3397_v0 = vrot.slane %v3396_v35, 1  ;;  %v3402_v20 = vrot.slane %v3401_v7, 2  ;;  %v3415_v12 = vadd.f32 %v3414_v26, %v3413_v44 }
 0x30a   :  { %v5235_v16 = vpop.eup %5234  ;;  %5242 = vrsqrt.f32 %v3916_v42  ;;  %v3917_v21 = vadd.f32 1e-05, %v3885_v10  ;;  %v3411_v61 = vrot.slane %v3410_v11, 1  ;;  %v7663_v40 = vadd.f32 %v2691_v5, %v2086_v6 }
 0x30b   :  { %v5237_v62 = vpop.eup %5236  ;;  %v3976_v1 = vmul.f32 %v5235_v16, %v7585_v34  ;;  %5244 = vrsqrt.f32 %v3918_v8  ;;  %v3919_v23 = vadd.f32 1e-05, %v3887_v25  ;;  %v3398_v28 = vadd.f32 %v3397_v0, %v3396_v35 }
 0x30c   :  { %v5239_v4 = vpop.eup %5238  ;;  %v3978_v63 = vmul.f32 %v5237_v62, %v7588_v39  ;;  %5246 = vrsqrt.f32 %v3917_v21  ;;  %v3412_v36 = vadd.f32 %v3411_v61, %v3410_v11  ;;  %v3403_v38 = vadd.f32 %v3402_v20, %v3401_v7 }
 0x30d   :  { %v5241_v58 = vpop.eup %5240  ;;  %v4176_v2 = vmul.f32 %v4019_v3, %v3976_v1  ;;  %v3977_v6 = vmul.f32 %v5239_v4, %v7595_v37  ;;  %5248 = vrsqrt.f32 %v3919_v23  ;;  %v3568_v29 = vmul.f32 0.5, %v3398_v28  ;;  %v2762_v1 = vpop.f32.mrf.mxu1 }
 0x30e   :  { %v4178_v34 = vmul.f32 %v4027_v9, %v3978_v63  ;;  %v3979_v33 = vmul.f32 %v5241_v58, %v7598_v13  ;;  %v3570_v44 = vmul.f32 0.5, %v3412_v36  ;;  %v3404_v39 = vrot.slane %v3403_v38, 1 }
 0x30f   :  { %v8233_v18 = vrot.slane %v7447_v57, %v7404_v45  ;;  %v8234_v22 = vrot.slane %v7442_v55, %v7410_v47  ;;  %v7682_v37 = vsub.f32 %v7635_v60, %v3568_v29  ;;  %v3416_v43 = vrot.slane %v3415_v12, 2 }
 0x310   :  { %v8235_v30 = vrot.slane %v7447_v57, %v7407_v46  ;;  %v8236_v13 = vrot.slane %v7442_v55, %v7418_v24  ;;  %v7691_v7 = vsub.f32 %v7642_v54, %v3570_v44  ;;  %v3405_v26 = vadd.f32 %v3404_v39, %v3403_v38 }
 0x311   :  { %v4376_v19 = vadd.f32 %v8233_v18, %v4176_v2  ;;  %v4177_v3 = vmul.f32 %v8234_v22, %v3977_v6  ;;  %v8237_v42 = vrot.slane %v7447_v57, %v7410_v47  ;;  %v3632_v60 = vmul.f32 %v7682_v37, %v7682_v37 }
 0x312   :  { %v4378_v9 = vadd.f32 %v8235_v30, %v4178_v34  ;;  %v4179_v35 = vmul.f32 %v8236_v13, %v3979_v33  ;;  %v3417_v10 = vadd.f32 %v3416_v43, %v3415_v12  ;;  %v8238_v25 = vrot.slane %v7447_v57, %v7418_v24 }
 0x313   :  { %v4408_v5 = vmax.f32 %v4376_v19, 0.0  ;;  %v4377_v8 = vadd.f32 %v8237_v42, %v4177_v3  ;;  %v3634_v20 = vmul.f32 %v7691_v7, %v7691_v7  ;;  %v3569_v54 = vmul.f32 0.5, %v3405_v26 }
 0x314   :  { %v4410_v11 = vmax.f32 %v4378_v9, 0.0  ;;  %v4379_v0 = vadd.f32 %v8238_v25, %v4179_v35  ;;  %v3712_v21 = vsel %vm3335_vm2, %v3632_v60, 0.0  ;;  %v3418_v61 = vrot.slane %v3417_v10, 1 }
 0x315   :  { %v4409_v16 = vmax.f32 %v4377_v8, 0.0  ;;  %v3420_v62 = vsel %vm3335_vm2, %v7663_v40, 0.0  ;;  %v3713_v28 = vrot.slane %v3712_v21, 4  ;;  %v3726_v12 = vsel %vm3335_vm2, %v3634_v20, 0.0 }
 0x316   :  { %v4411_v23 = vmax.f32 %v4379_v0, 0.0  ;;  %v7708_v4 = vsub.f32 %v7649_v31, %v3569_v54  ;;  %v3727_v36 = vrot.slane %v3726_v12, 4  ;;  %v3419_v38 = vadd.f32 %v3418_v61, %v3417_v10 }
 0x317   :  { %v4472_v63 = vcombine.low %v4408_v5, %v4409_v16  ;;  %v3421_v58 = vrot.slane %v3420_v62, 4  ;;  %v3714_v6 = vadd.f32 %v3713_v28, %v3712_v21  ;;  %v8239_v34 = vrot.slane %v7435_v53, %v7424_v56  ;;  %v5243_v44 = vpop.eup %5242 }
 0x318   :  { %v4473_v2 = vcombine.low %v4410_v11, %v4411_v23  ;;  %v3633_v29 = vmul.f32 %v7708_v4, %v7708_v4  ;;  %v3728_v18 = vadd.f32 %v3727_v36, %v3726_v12  ;;  %v3571_v31 = vmul.f32 0.5, %v3419_v38  ;;  %v5245_v22 = vpop.eup %5244 }
 0x319   :  { %v7715_v33 = vadd.f32 %v2762_v1, %v8239_v34  ;;  %v4480_v39 = vrot.slane %v4472_v63, %v5520_v51  ;;  %v3422_v19 = vadd.f32 %v3421_v58, %v3420_v62  ;;  %v3980_v43 = vmul.f32 %v5243_v44, %v7609_v59  ;;  %v5247_v13 = vpop.eup %5246 }
 0x31a   :  { %v4487_v3 = vrot.slane %v4473_v2, %v5520_v51  ;;  %v3715_v30 = vrot.slane %v3714_v6, 2  ;;  %v3719_v9 = vsel %vm3335_vm2, %v3633_v29, 0.0  ;;  %v3982_v35 = vmul.f32 %v5245_v22, %v7612_v14  ;;  %v5249_v8 = vpop.eup %5248 }
 0x31b   :  { %v3729_v26 = vrot.slane %v3728_v18, 2  ;;  %v3720_v5 = vrot.slane %v3719_v9, 4  ;;  %v7723_v42 = vsub.f32 %v7656_v48, %v3571_v31  ;;  %v8240_v10 = vrot.slane %v7442_v55, %v7421_v49 }
 0x31c   :  { %v4488_v60 = vcombine.low %v4480_v39, %v4487_v3  ;;  %v3981_v25 = vmul.f32 %v5247_v13, %v7619_v27  ;;  %v3716_v59 = vadd.f32 %v3715_v30, %v3714_v6  ;;  %v8241_v0 = vrot.slane %v7442_v55, %v7424_v56 }
 0x31d   :  { %v4180_v11 = vmul.f32 %v8240_v10, %v3980_v43  ;;  %v3983_v14 = vmul.f32 %v5249_v8, %v7622_v15  ;;  %v3730_v54 = vadd.f32 %v3729_v26, %v3728_v18  ;;  %v3721_v16 = vadd.f32 %v3720_v5, %v3719_v9  ;;  %v2693_v10 = vpop.f32.mrf.mxu0 }
 0x31e   :  { %v4182_v20 = vmul.f32 %v8241_v0, %v3982_v35  ;;  %4616 = vst [vmem:[%s8231_s9] sm:$0xff] %v4488_v60  ;;  %v8242_v48 = vrot.slane %v7447_v57, %v7421_v49  ;;  %v8243_v27 = vrot.slane %v7442_v55, %v7427_v50  ;;  %v3717_v62 = vrot.slane %v3716_v59, 1  ;;  %v2764_v0 = vpop.f32.mrf.mxu1 }
 0x31f   :  { %v3635_v1 = vmul.f32 %v7723_v42, %v7723_v42  ;;  %v8244_v15 = vrot.slane %v7447_v57, %v7424_v56  ;;  %v8245_v28 = vrot.slane %v7442_v55, %v7430_v52  ;;  %v3731_v63 = vrot.slane %v3730_v54, 1 }
 0x320   :  { %v4380_v21 = vadd.f32 %v8242_v48, %v4180_v11  ;;  %v4181_v61 = vmul.f32 %v8243_v27, %v3981_v25  ;;  %v3722_v36 = vrot.slane %v3721_v16, 2  ;;  %v8246_v58 = vrot.slane %v7447_v57, %v7427_v50 }
 0x321   :  { %v4382_v23 = vadd.f32 %v8244_v15, %v4182_v20  ;;  %v4183_v12 = vmul.f32 %v8245_v28, %v3983_v14  ;;  %v3718_v6 = vadd.f32 %v3717_v62, %v3716_v59  ;;  %v3733_v29 = vsel %vm3335_vm2, %v3635_v1, 0.0 }
 0x322   :  { %v4412_v38 = vmax.f32 %v4380_v21, 0.0  ;;  %v4381_v2 = vadd.f32 %v8246_v58, %v4181_v61  ;;  %v8247_v44 = vrot.slane %v7447_v57, %v7430_v52  ;;  %v3732_v18 = vadd.f32 %v3731_v63, %v3730_v54 }
 0x323   :  { %v4414_v34 = vmax.f32 %v4382_v23, 0.0  ;;  %v3723_v31 = vadd.f32 %v3722_v36, %v3721_v16  ;;  %v3888_v55 = vmul.f32 0.5, %v3718_v6  ;;  %v3734_v3 = vrot.slane %v3733_v29, 4  ;;  %v2833_v16 = vpop.f32.mrf.mxu0 }
 0x324   :  { %v4383_v39 = vadd.f32 %v8247_v44, %v4183_v12  ;;  %v4413_v22 = vmax.f32 %v4381_v2, 0.0  ;;  %v3423_v43 = vrot.slane %v3422_v19, 2  ;;  %v3890_v9 = vmul.f32 0.5, %v3732_v18 }
 0x325   :  { %v3724_v13 = vrot.slane %v3723_v31, 1  ;;  %v3434_v35 = vsel %vm3335_vm2, %v7715_v33, 0.0  ;;  %v3920_v5 = vadd.f32 1e-05, %v3888_v55  ;;  %v3735_v8 = vadd.f32 %v3734_v3, %v3733_v29 }
 0x326   :  { %v4415_v30 = vmax.f32 %v4383_v39, 0.0  ;;  %v4489_v26 = vcombine.low %v4412_v38, %v4413_v22  ;;  %v3424_v60 = vadd.f32 %v3423_v43, %v3422_v19  ;;  %v3922_v57 = vadd.f32 1e-05, %v3890_v9  ;;  %v2904_v39 = vpop.f32.mrf.mxu1 }
 0x327   :  { %v3725_v25 = vadd.f32 %v3724_v13, %v3723_v31  ;;  %v3435_v59 = vrot.slane %v3434_v35, 4  ;;  %5250 = vrsqrt.f32 %v3920_v5  ;;  %v3736_v14 = vrot.slane %v3735_v8, 2 }
 0x328   :  { %v4490_v11 = vcombine.low %v4414_v34, %v4415_v30  ;;  %v4497_v20 = vrot.slane %v4489_v26, %v5520_v51  ;;  %v3425_v54 = vrot.slane %v3424_v60, 1  ;;  %5252 = vrsqrt.f32 %v3922_v57 }
 0x329   :  { %v3889_v21 = vmul.f32 0.5, %v3725_v25  ;;  %v3436_v27 = vadd.f32 %v3435_v59, %v3434_v35  ;;  %v3737_v61 = vadd.f32 %v3736_v14, %v3735_v8  ;;  %v8248_v19 = vrot.slane %v7435_v53, %v7427_v50 }
 0x32a   :  { %v4504_v48 = vrot.slane %v4490_v11, %v5520_v51  ;;  %v3426_v62 = vadd.f32 %v3425_v54, %v3424_v60  ;;  %v8249_v15 = vrot.slane %v7435_v53, %v7430_v52  ;;  %v8250_v36 = vrot.slane %v7516_v32, %v7404_v45 }
 0x32b   :  { %v7764_v1 = vadd.f32 %v2693_v10, %v8248_v19  ;;  %v3921_v12 = vadd.f32 1e-05, %v3889_v21  ;;  %v3437_v63 = vrot.slane %v3436_v27, 2  ;;  %v3738_v58 = vrot.slane %v3737_v61, 1 }
 0x32c   :  { %v7769_v23 = vadd.f32 %v2764_v0, %v8249_v15  ;;  %v4505_v28 = vcombine.low %v4497_v20, %v4504_v48  ;;  %v7774_v38 = vadd.f32 %v2833_v16, %v8250_v36  ;;  %v3572_v2 = vmul.f32 0.5, %v3426_v62  ;;  %v2835_v48 = vpop.f32.mrf.mxu0 }
 0x32d   :  { %v3427_v6 = vsel %vm3335_vm2, %v7764_v1, 0.0  ;;  %5254 = vrsqrt.f32 %v3921_v12  ;;  %v3438_v53 = vadd.f32 %v3437_v63, %v3436_v27  ;;  %v4055_v18 = vrot.slane %v7529_v41, %v7410_v47 }
 0x32e   :  { %v3441_v29 = vsel %vm3335_vm2, %v7769_v23, 0.0  ;;  %4617 = vst [vmem:[%s8231_s9 + $0x8] sm:$0xff] %v4505_v28  ;;  %v3428_v34 = vrot.slane %v3427_v6, 4  ;;  %v3739_v31 = vadd.f32 %v3738_v58, %v3737_v61  ;;  %v7786_v22 = vsub.f32 %v7663_v40, %v3572_v2 }
 0x32f   :  { %v3442_v44 = vrot.slane %v3441_v29, 4  ;;  %v3448_v55 = vsel %vm3335_vm2, %v7774_v38, 0.0  ;;  %v3439_v3 = vrot.slane %v3438_v53, 1  ;;  %v4255_v13 = vrot.slane %v7542_v17, %v7410_v47 }
 0x330   :  { %v3429_v43 = vadd.f32 %v3428_v34, %v3427_v6  ;;  %v3449_v9 = vrot.slane %v3448_v55, 4  ;;  %v3891_v35 = vmul.f32 0.5, %v3739_v31  ;;  %v3636_v26 = vmul.f32 %v7786_v22, %v7786_v22 }
 0x331   :  { %v3443_v30 = vadd.f32 %v3442_v44, %v3441_v29  ;;  %v8251_v5 = vrot.slane %v7516_v32, %v7407_v46  ;;  %v3440_v40 = vadd.f32 %v3439_v3, %v3438_v53  ;;  %v2114_v0 = vrot.slane %v7516_v32, %v7418_v24 }
 0x332   :  { %v3430_v60 = vrot.slane %v3429_v43, 2  ;;  %v3450_v11 = vadd.f32 %v3449_v9, %v3448_v55  ;;  %v3923_v57 = vadd.f32 1e-05, %v3891_v35  ;;  %v3740_v25 = vsel %vm3335_vm2, %v3636_v26, 0.0 }
 0x333   :  { %v7797_v8 = vadd.f32 %v2904_v39, %v8251_v5  ;;  %v3444_v10 = vrot.slane %v3443_v30, 2  ;;  %v3741_v20 = vrot.slane %v3740_v25, 4  ;;  %v3574_v14 = vmul.f32 0.5, %v3440_v40 }
 0x334   :  { %v3431_v54 = vadd.f32 %v3430_v60, %v3429_v43  ;;  %5256 = vrsqrt.f32 %v3923_v57  ;;  %v4063_v21 = vrot.slane %v7529_v41, %v7418_v24  ;;  %v3451_v27 = vrot.slane %v3450_v11, 2  ;;  %v5251_v62 = vpop.eup %5250 }
 0x335   :  { %v3462_v59 = vsel %vm3335_vm2, %v7797_v8, 0.0  ;;  %v3445_v16 = vadd.f32 %v3444_v10, %v3443_v30  ;;  %v3742_v19 = vadd.f32 %v3741_v20, %v3740_v25  ;;  %v7807_v15 = vsub.f32 %v7715_v33, %v3574_v14  ;;  %v5253_v63 = vpop.eup %5252 }
 0x336   :  { %v3463_v61 = vrot.slane %v3462_v59, 4  ;;  %v3432_v28 = vrot.slane %v3431_v54, 1  ;;  %v3984_v36 = vmul.f32 %v5251_v62, %v7682_v37  ;;  %v3452_v58 = vadd.f32 %v3451_v27, %v3450_v11 }
 0x337   :  { %v3446_v12 = vrot.slane %v3445_v16, 1  ;;  %v8252_v6 = vrot.slane %v7516_v32, %v7410_v47  ;;  %v3986_v53 = vmul.f32 %v5253_v63, %v7691_v7  ;;  %v3743_v34 = vrot.slane %v3742_v19, 2 }
 0x338   :  { %v3464_v2 = vadd.f32 %v3463_v61, %v3462_v59  ;;  %v3638_v44 = vmul.f32 %v7807_v15, %v7807_v15  ;;  %v3433_v33 = vadd.f32 %v3432_v28, %v3431_v54  ;;  %v8253_v39 = vrot.slane %v7529_v41, %v7404_v45 }
 0x339   :  { %v7813_v29 = vadd.f32 %v2835_v48, %v8252_v6  ;;  %v4263_v37 = vrot.slane %v7542_v17, %v7418_v24  ;;  %v3447_v55 = vadd.f32 %v3446_v12, %v3445_v16  ;;  %v3453_v3 = vrot.slane %v3452_v58, 1 }
 0x33a   :  { %v4184_v31 = vmul.f32 %v8253_v39, %v3984_v36  ;;  %v8254_v43 = vrot.slane %v7529_v41, %v7407_v46  ;;  %v3744_v9 = vadd.f32 %v3743_v34, %v3742_v19  ;;  %v3754_v7 = vsel %vm3335_vm2, %v3638_v44, 0.0  ;;  %v5255_v26 = vpop.eup %5254 }
 0x33b   :  { %v3573_v35 = vmul.f32 0.5, %v3433_v33  ;;  %v3755_v5 = vrot.slane %v3754_v7, 4  ;;  %v3575_v40 = vmul.f32 0.5, %v3447_v55  ;;  %v3454_v60 = vadd.f32 %v3453_v3, %v3452_v58 }
 0x33c   :  { %v4186_v30 = vmul.f32 %v8254_v43, %v3986_v53  ;;  %v3465_v10 = vrot.slane %v3464_v2, 2  ;;  %v3985_v11 = vmul.f32 %v5255_v26, %v7708_v4  ;;  %v3745_v57 = vrot.slane %v3744_v9, 1 }
 0x33d   :  { %v7829_v25 = vsub.f32 %v7764_v1, %v3573_v35  ;;  %v3455_v59 = vsel %vm3335_vm2, %v7813_v29, 0.0  ;;  %v8255_v20 = vrot.slane %v7542_v17, %v7404_v45  ;;  %v3756_v54 = vadd.f32 %v3755_v5, %v3754_v7 }
 0x33e   :  { %v7837_v16 = vsub.f32 %v7769_v23, %v3575_v40  ;;  %v3576_v48 = vmul.f32 0.5, %v3454_v60  ;;  %v8256_v27 = vrot.slane %v7542_v17, %v7407_v46  ;;  %v4185_v1 = vmul.f32 %v4055_v18, %v3985_v11 }
 0x33f   :  { %v4384_v14 = vadd.f32 %v8255_v20, %v4184_v31  ;;  %v3746_v61 = vadd.f32 %v3745_v57, %v3744_v9  ;;  %v3637_v62 = vmul.f32 %v7829_v25, %v7829_v25  ;;  %v3757_v19 = vrot.slane %v3756_v54, 2 }
 0x340   :  { %v4386_v4 = vadd.f32 %v8256_v27, %v4186_v30  ;;  %v3639_v28 = vmul.f32 %v7837_v16, %v7837_v16  ;;  %v7850_v23 = vsub.f32 %v7774_v38, %v3576_v48  ;;  %v3466_v12 = vadd.f32 %v3465_v10, %v3464_v2 }
 0x341   :  { %v4385_v63 = vadd.f32 %v4255_v13, %v4185_v1  ;;  %v3892_v36 = vmul.f32 0.5, %v3746_v61  ;;  %v3747_v58 = vsel %vm3335_vm2, %v3637_v62, 0.0  ;;  %v3456_v18 = vrot.slane %v3455_v59, 4  ;;  %v5257_v33 = vpop.eup %5256 }
 0x342   :  { %v3758_v6 = vadd.f32 %v3757_v19, %v3756_v54  ;;  %v3748_v53 = vrot.slane %v3747_v58, 4  ;;  %v3761_v34 = vsel %vm3335_vm2, %v3639_v28, 0.0  ;;  %v3640_v44 = vmul.f32 %v7850_v23, %v7850_v23 }
 0x343   :  { %v4417_v39 = vmax.f32 %v4385_v63, 0.0  ;;  %v3924_v38 = vadd.f32 1e-05, %v3892_v36  ;;  %v3762_v31 = vrot.slane %v3761_v34, 4  ;;  %v3467_v2 = vrot.slane %v3466_v12, 1  ;;  %v2906_v63 = vpop.f32.mrf.mxu1 }
 0x344   :  { %v3987_v55 = vmul.f32 %v5257_v33, %v7723_v42  ;;  %v3759_v3 = vrot.slane %v3758_v6, 1  ;;  %v3749_v13 = vadd.f32 %v3748_v53, %v3747_v58  ;;  %v3768_v43 = vsel %vm3335_vm2, %v3640_v44, 0.0 }
 0x345   :  { %v4416_v30 = vmax.f32 %v4384_v14, 0.0  ;;  %5258 = vrsqrt.f32 %v3924_v38  ;;  %v3763_v9 = vadd.f32 %v3762_v31, %v3761_v34  ;;  %v3769_v7 = vrot.slane %v3768_v43, 4 }
 0x346   :  { %v4187_v35 = vmul.f32 %v4063_v21, %v3987_v55  ;;  %v3760_v26 = vadd.f32 %v3759_v3, %v3758_v6  ;;  %v3750_v5 = vrot.slane %v3749_v13, 2  ;;  %v3468_v40 = vadd.f32 %v3467_v2, %v3466_v12 }
 0x347   :  { %v4506_v60 = vcombine.low %v4416_v30, %v4417_v39  ;;  %v3764_v10 = vrot.slane %v3763_v9, 2  ;;  %v3770_v11 = vadd.f32 %v3769_v7, %v3768_v43  ;;  %v3457_v57 = vadd.f32 %v3456_v18, %v3455_v59 }
 0x348   :  { %v4387_v42 = vadd.f32 %v4263_v37, %v4187_v35  ;;  %v3894_v20 = vmul.f32 0.5, %v3760_v26  ;;  %v3751_v54 = vadd.f32 %v3750_v5, %v3749_v13  ;;  %v3578_v48 = vmul.f32 0.5, %v3468_v40  ;;  %v2975_v13 = vpop.f32.mrf.mxu0 }
 0x349   :  { %v4418_v27 = vmax.f32 %v4386_v4, 0.0  ;;  %v3765_v14 = vadd.f32 %v3764_v10, %v3763_v9  ;;  %v3771_v1 = vrot.slane %v3770_v11, 2  ;;  %v3458_v61 = vrot.slane %v3457_v57, 2 }
 0x34a   :  { %v4419_v62 = vmax.f32 %v4387_v42, 0.0  ;;  %v3926_v19 = vadd.f32 1e-05, %v3894_v20  ;;  %v3752_v28 = vrot.slane %v3751_v54, 1  ;;  %v7865_v21 = vsub.f32 %v7797_v8, %v3578_v48  ;;  %v3046_v42 = vpop.f32.mrf.mxu1 }
 0x34b   :  { %v4514_v12 = vrot.slane %v4506_v60, %v5520_v51  ;;  %v3766_v36 = vrot.slane %v3765_v14, 1  ;;  %v3772_v58 = vadd.f32 %v3771_v1, %v3770_v11  ;;  %v3459_v59 = vadd.f32 %v3458_v61, %v3457_v57 }
 0x34c   :  { %v4507_v37 = vcombine.low %v4418_v27, %v4419_v62  ;;  %5260 = vrsqrt.f32 %v3926_v19  ;;  %v3753_v18 = vadd.f32 %v3752_v28, %v3751_v54  ;;  %v3642_v4 = vmul.f32 %v7865_v21, %v7865_v21 }
 0x34d   :  { %v3767_v6 = vadd.f32 %v3766_v36, %v3765_v14  ;;  %v3773_v53 = vrot.slane %v3772_v58, 1  ;;  %v3460_v34 = vrot.slane %v3459_v59, 1  ;;  %v7873_v8 = vadd.f32 %v2906_v63, %v2114_v0  ;;  %v2977_v63 = vpop.f32.mrf.mxu0 }
 0x34e   :  { %v4521_v44 = vrot.slane %v4507_v37, %v5520_v51  ;;  %v3893_v33 = vmul.f32 0.5, %v3753_v18  ;;  %v3782_v39 = vsel %vm3335_vm2, %v3642_v4, 0.0  ;;  %v2118_v38 = vrot.slane %v7516_v32, %v7421_v49 }
 0x34f   :  { %v4067_v31 = vrot.slane %v7529_v41, %v7421_v49  ;;  %v3895_v2 = vmul.f32 0.5, %v3767_v6  ;;  %v3783_v55 = vrot.slane %v3782_v39, 4  ;;  %v3461_v3 = vadd.f32 %v3460_v34, %v3459_v59 }
 0x350   :  { %v4522_v43 = vcombine.low %v4514_v12, %v4521_v44  ;;  %v3925_v30 = vadd.f32 1e-05, %v3893_v33  ;;  %v3469_v0 = vsel %vm3335_vm2, %v7873_v8, 0.0  ;;  %v2126_v9 = vrot.slane %v7516_v32, %v7424_v56 }
 0x351   :  { %v3927_v7 = vadd.f32 1e-05, %v3895_v2  ;;  %v3774_v35 = vadd.f32 %v3773_v53, %v3772_v58  ;;  %v3784_v26 = vadd.f32 %v3783_v55, %v3782_v39  ;;  %v3577_v5 = vmul.f32 0.5, %v3461_v3 }
 0x352   :  { %v5259_v40 = vpop.eup %5258  ;;  %4618 = vst [vmem:[%s8231_s9 + $0x10] sm:$0xff] %v4522_v43  ;;  %v4267_v60 = vrot.slane %v7542_v17, %v7421_v49  ;;  %5262 = vrsqrt.f32 %v3925_v30  ;;  %v3470_v10 = vrot.slane %v3469_v0, 4  ;;  %v7890_v11 = vadd.f32 %v2975_v13, %v2118_v38 }
 0x353   :  { %5264 = vrsqrt.f32 %v3927_v7  ;;  %v3785_v57 = vrot.slane %v3784_v26, 2  ;;  %v2122_v20 = vrot.slane %v7516_v32, %v7427_v50  ;;  %v2130_v54 = vrot.slane %v7516_v32, %v7430_v52  ;;  %v5298_v7 = vld [vmem:[%s8230_s8 + $0x8] sm:$0xff] }
 0x354   :  { %v4075_v48 = vrot.slane %v7529_v41, %v7424_v56  ;;  %v7899_v27 = vsub.f32 %v7813_v29, %v3577_v5  ;;  %v3471_v14 = vadd.f32 %v3470_v10, %v3469_v0  ;;  %v3476_v1 = vsel %vm3335_vm2, %v7890_v11, 0.0 }
 0x355   :  { %v3988_v61 = vmul.f32 %v5259_v40, %v7786_v22  ;;  %v3896_v62 = vmul.f32 0.5, %v3774_v35  ;;  %v3786_v19 = vadd.f32 %v3785_v57, %v3784_v26  ;;  %v3477_v28 = vrot.slane %v3476_v1, 4 }
 0x356   :  { %v4275_v12 = vrot.slane %v7542_v17, %v7424_v56  ;;  %v3641_v36 = vmul.f32 %v7899_v27, %v7899_v27  ;;  %v3472_v58 = vrot.slane %v3471_v14, 2  ;;  %v7908_v59 = vadd.f32 %v3046_v42, %v2126_v9 }
 0x357   :  { %v4071_v29 = vrot.slane %v7529_v41, %v7427_v50  ;;  %v4079_v37 = vrot.slane %v7529_v41, %v7430_v52  ;;  %v3787_v22 = vrot.slane %v3786_v19, 1  ;;  %v3478_v18 = vadd.f32 %v3477_v28, %v3476_v1 }
 0x358   :  { %v3775_v4 = vsel %vm3335_vm2, %v3641_v36, 0.0  ;;  %v3473_v6 = vadd.f32 %v3472_v58, %v3471_v14  ;;  %v3490_v17 = vsel %vm3335_vm2, %v7908_v59, 0.0  ;;  %v7917_v53 = vadd.f32 %v2977_v63, %v2122_v20 }
 0x359   :  { %v5261_v34 = vpop.eup %5260  ;;  %v4188_v44 = vmul.f32 %v4067_v31, %v3988_v61  ;;  %v3928_v33 = vadd.f32 1e-05, %v3896_v62  ;;  %v3776_v39 = vrot.slane %v3775_v4, 4  ;;  %v3479_v38 = vrot.slane %v3478_v18, 2 }
 0x35a   :  { %v3990_v2 = vmul.f32 %v5261_v34, %v7807_v15  ;;  %v3474_v55 = vrot.slane %v3473_v6, 1  ;;  %v3491_v3 = vrot.slane %v3490_v17, 4  ;;  %v3483_v41 = vsel %vm3335_vm2, %v7917_v53, 0.0 }
 0x35b   :  { %v3788_v13 = vadd.f32 %v3787_v22, %v3786_v19  ;;  %v3777_v43 = vadd.f32 %v3776_v39, %v3775_v4  ;;  %v3480_v30 = vadd.f32 %v3479_v38, %v3478_v18  ;;  %v3484_v0 = vrot.slane %v3483_v41, 4 }
 0x35c   :  { %v4190_v9 = vmul.f32 %v4075_v48, %v3990_v2  ;;  %v4271_v31 = vrot.slane %v5298_v7, %v7427_v50  ;;  %v3475_v35 = vadd.f32 %v3474_v55, %v3473_v6  ;;  %v3492_v26 = vadd.f32 %v3491_v3, %v3490_v17 }
 0x35d   :  { %v4279_v15 = vrot.slane %v5298_v7, %v7430_v52  ;;  %v3778_v5 = vrot.slane %v3777_v43, 2  ;;  %v3481_v40 = vrot.slane %v3480_v30, 1  ;;  %v3485_v10 = vadd.f32 %v3484_v0, %v3483_v41 }
 0x35e   :  { %v4388_v57 = vadd.f32 %v4267_v60, %v4188_v44  ;;  %5266 = vrsqrt.f32 %v3928_v33  ;;  %v3579_v42 = vmul.f32 0.5, %v3475_v35  ;;  %v3493_v20 = vrot.slane %v3492_v26, 2 }
 0x35f   :  { %v5263_v14 = vpop.eup %5262  ;;  %v3898_v1 = vmul.f32 0.5, %v3788_v13  ;;  %v3779_v48 = vadd.f32 %v3778_v5, %v3777_v43  ;;  %v3482_v61 = vadd.f32 %v3481_v40, %v3480_v30  ;;  %v3486_v62 = vrot.slane %v3485_v10, 2 }
 0x360   :  { %v5265_v19 = vpop.eup %5264  ;;  %v4390_v28 = vadd.f32 %v4275_v12, %v4190_v9  ;;  %v3989_v63 = vmul.f32 %v5263_v14, %v7829_v25  ;;  %v7929_v36 = vsub.f32 %v7873_v8, %v3579_v42  ;;  %v3494_v58 = vadd.f32 %v3493_v20, %v3492_v26 }
 0x361   :  { %v3991_v60 = vmul.f32 %v5265_v19, %v7837_v16  ;;  %v3780_v22 = vrot.slane %v3779_v48, 1  ;;  %v3580_v18 = vmul.f32 0.5, %v3482_v61  ;;  %v3487_v4 = vadd.f32 %v3486_v62, %v3485_v10 }
 0x362   :  { %v4420_v6 = vmax.f32 %v4388_v57, 0.0  ;;  %v4189_v17 = vmul.f32 %v4071_v29, %v3989_v63  ;;  %v3643_v34 = vmul.f32 %v7929_v36, %v7929_v36  ;;  %v3495_v12 = vrot.slane %v3494_v58, 1 }
 0x363   :  { %5310 = shalt.err (!%p5307_p4)
}
 0x364   :  { %4635 = dma.vmem_to_hbm [thread:$0]  %s4633_s21, 32, %s8232_s10, [#allocation3]   ;;  %v4191_v25 = vmul.f32 %v4079_v37, %v3991_v60  ;;  %v3930_v16 = vadd.f32 1e-05, %v3898_v1  ;;  %v3781_v8 = vadd.f32 %v3780_v22, %v3779_v48  ;;  %v7938_v29 = vsub.f32 %v7890_v11, %v3580_v18  ;;  %v3048_v2 = vpop.f32.mrf.mxu1  ;;  %v7944_v37 = vld [vmem:[%s8229_s7 + $0x10] sm:$0xff] }
 0x365   :  { %v4389_v44 = vadd.f32 %v4271_v31, %v4189_v17  ;;  %v3789_v33 = vsel %vm3335_vm2, %v3643_v34, 0.0  ;;  %v3496_v39 = vadd.f32 %v3495_v12, %v3494_v58  ;;  %v3488_v38 = vrot.slane %v3487_v4, 1  ;;  %v7963_v32 = vld [vmem:[%s8230_s8 + $0x10] sm:$0xff] }
 0x366   :  { %v4422_v55 = vmax.f32 %v4390_v28, 0.0  ;;  %v4391_v3 = vadd.f32 %v4279_v15, %v4191_v25  ;;  %v3897_v41 = vmul.f32 0.5, %v3781_v8  ;;  %v3790_v13 = vrot.slane %v3789_v33, 4 }
 0x367   :  { %v4421_v43 = vmax.f32 %v4389_v44, 0.0  ;;  %v3644_v11 = vmul.f32 %v7938_v29, %v7938_v29  ;;  %v3582_v30 = vmul.f32 0.5, %v3496_v39  ;;  %v3489_v0 = vadd.f32 %v3488_v38, %v3487_v4  ;;  %v7981_v4 = vld [vmem:[%s8228_s6 + $0x18] sm:$0xff] }
 0x368   :  { %v4423_v9 = vmax.f32 %v4391_v3, 0.0  ;;  %v3929_v7 = vadd.f32 1e-05, %v3897_v41  ;;  %v3791_v31 = vadd.f32 %v3790_v13, %v3789_v33  ;;  %v7951_v35 = vadd.f32 %v3048_v2, %v2130_v54  ;;  %v3117_v33 = vpop.f32.mrf.mxu0 }
 0x369   :  { %v4523_v26 = vcombine.low %v4420_v6, %v4421_v43  ;;  %v3796_v15 = vsel %vm3335_vm2, %v3644_v11, 0.0  ;;  %v7955_v5 = vsub.f32 %v7908_v59, %v3582_v30  ;;  %v3581_v40 = vmul.f32 0.5, %v3489_v0 }
 0x36a   :  { %v4524_v10 = vcombine.low %v4422_v55, %v4423_v9  ;;  %v4083_v57 = vrot.slane %v7944_v37, %v7404_v45  ;;  %5268 = vrsqrt.f32 %v3929_v7  ;;  %v3792_v42 = vrot.slane %v3791_v31, 2 }
 0x36b   :  { %v4531_v20 = vrot.slane %v4523_v26, %v5520_v51  ;;  %v3797_v54 = vrot.slane %v3796_v15, 4  ;;  %v3646_v14 = vmul.f32 %v7955_v5, %v7955_v5  ;;  %v7968_v59 = vsub.f32 %v7917_v53, %v3581_v40  ;;  %v5267_v1 = vpop.eup %5266  ;;  %v3188_v40 = vpop.f32.mrf.mxu1 }
 0x36c   :  { %v4538_v48 = vrot.slane %v4524_v10, %v5520_v51  ;;  %5270 = vrsqrt.f32 %v3930_v16  ;;  %v3793_v61 = vadd.f32 %v3792_v42, %v3791_v31  ;;  %v3497_v62 = vsel %vm3335_vm2, %v7951_v35, 0.0 }
 0x36d   :  { %v3798_v19 = vadd.f32 %v3797_v54, %v3796_v15  ;;  %v3810_v28 = vsel %vm3335_vm2, %v3646_v14, 0.0  ;;  %v3645_v63 = vmul.f32 %v7968_v59, %v7968_v59  ;;  %v3498_v58 = vrot.slane %v3497_v62, 4 }
 0x36e   :  { %v4539_v60 = vcombine.low %v4531_v20, %v4538_v48  ;;  %v4283_v53 = vrot.slane %v7963_v32, %v7404_v45  ;;  %v3794_v22 = vrot.slane %v3793_v61, 1  ;;  %v3811_v18 = vrot.slane %v3810_v28, 4 }
 0x36f   :  { %v4091_v6 = vrot.slane %v7944_v37, %v7407_v46  ;;  %v3799_v17 = vrot.slane %v3798_v19, 2  ;;  %v3803_v34 = vsel %vm3335_vm2, %v3645_v63, 0.0  ;;  %v3499_v12 = vadd.f32 %v3498_v58, %v3497_v62 }
 0x370   :  { %4619 = vst [vmem:[%s8231_s9 + $0x18] sm:$0xff] %v4539_v60  ;;  %v4291_v25 = vrot.slane %v7963_v32, %v7407_v46  ;;  %v3795_v16 = vadd.f32 %v3794_v22, %v3793_v61  ;;  %v3812_v8 = vadd.f32 %v3811_v18, %v3810_v28  ;;  %v3804_v44 = vrot.slane %v3803_v34, 4 }
 0x371   :  { %v4087_v39 = vrot.slane %v7944_v37, %v7410_v47  ;;  %v3800_v38 = vadd.f32 %v3799_v17, %v3798_v19  ;;  %v3500_v2 = vrot.slane %v3499_v12, 2  ;;  %v2134_v55 = vrot.slane %v7981_v4, %v7404_v45 }
 0x372   :  { %v4287_v3 = vrot.slane %v7963_v32, %v7410_v47  ;;  %v3899_v41 = vmul.f32 0.5, %v3795_v16  ;;  %v3813_v13 = vrot.slane %v3812_v8, 2  ;;  %v3805_v43 = vadd.f32 %v3804_v44, %v3803_v34 }
 0x373   :  { %v4095_v11 = vrot.slane %v7944_v37, %v7418_v24  ;;  %v3801_v30 = vrot.slane %v3800_v38, 1  ;;  %v3501_v0 = vadd.f32 %v3500_v2, %v3499_v12  ;;  %v7999_v9 = vadd.f32 %v3117_v33, %v2134_v55  ;;  %v3119_v2 = vpop.f32.mrf.mxu0 }
 0x374   :  { %v3931_v7 = vadd.f32 1e-05, %v3899_v41  ;;  %v4295_v31 = vrot.slane %v7963_v32, %v7418_v24  ;;  %v3814_v26 = vadd.f32 %v3813_v13, %v3812_v8  ;;  %v3806_v15 = vrot.slane %v3805_v43, 2 }
 0x375   :  { %v3802_v10 = vadd.f32 %v3801_v30, %v3800_v38  ;;  %v3502_v42 = vrot.slane %v3501_v0, 1  ;;  %v3504_v20 = vsel %vm3335_vm2, %v7999_v9, 0.0  ;;  %v2142_v54 = vrot.slane %v7981_v4, %v7407_v46 }
 0x376   :  { %5272 = vrsqrt.f32 %v3931_v7  ;;  %v3815_v14 = vrot.slane %v3814_v26, 1  ;;  %v3807_v48 = vadd.f32 %v3806_v15, %v3805_v43  ;;  %v3505_v61 = vrot.slane %v3504_v20, 4 }
 0x377   :  { %v5269_v62 = vpop.eup %5268  ;;  %v3992_v19 = vmul.f32 %v5267_v1, %v7850_v23  ;;  %v3900_v28 = vmul.f32 0.5, %v3802_v10  ;;  %v3503_v63 = vadd.f32 %v3502_v42, %v3501_v0  ;;  %v8008_v58 = vadd.f32 %v3188_v40, %v2142_v54 }
 0x378   :  { %v3993_v60 = vmul.f32 %v5269_v62, %v7899_v27  ;;  %v3816_v22 = vadd.f32 %v3815_v14, %v3814_v26  ;;  %v3808_v18 = vrot.slane %v3807_v48, 1  ;;  %v3506_v17 = vadd.f32 %v3505_v61, %v3504_v20 }
 0x379   :  { %v5271_v34 = vpop.eup %5270  ;;  %v3932_v12 = vadd.f32 1e-05, %v3900_v28  ;;  %v4099_v16 = vrot.slane %v7944_v37, %v7421_v49  ;;  %v3583_v8 = vmul.f32 0.5, %v3503_v63  ;;  %v3518_v44 = vsel %vm3335_vm2, %v8008_v58, 0.0 }
 0x37a   :  { %v4193_v33 = vmul.f32 %v4087_v39, %v3993_v60  ;;  %v3902_v23 = vmul.f32 0.5, %v3816_v22  ;;  %v3809_v1 = vadd.f32 %v3808_v18, %v3807_v48  ;;  %v3507_v38 = vrot.slane %v3506_v17, 2 }
 0x37b   :  { %v4299_v27 = vrot.slane %v7963_v32, %v7421_v49  ;;  %v8018_v55 = vsub.f32 %v7951_v35, %v3583_v8  ;;  %v3519_v41 = vrot.slane %v3518_v44, 4  ;;  %v2138_v13 = vrot.slane %v7981_v4, %v7410_v47 }
 0x37c   :  { %v4192_v43 = vmul.f32 %v4083_v57, %v3992_v19  ;;  %5274 = vrsqrt.f32 %v3932_v12  ;;  %v3901_v39 = vmul.f32 0.5, %v3809_v1  ;;  %v3508_v30 = vadd.f32 %v3507_v38, %v3506_v17  ;;  %v3259_v1 = vpop.f32.mrf.mxu0 }
 0x37d   :  { %v3994_v0 = vmul.f32 %v5271_v34, %v7865_v21  ;;  %v3647_v7 = vmul.f32 %v8018_v55, %v8018_v55  ;;  %v3520_v26 = vadd.f32 %v3519_v41, %v3518_v44  ;;  %v8028_v15 = vadd.f32 %v3119_v2, %v2138_v13 }
 0x37e   :  { %v4393_v35 = vadd.f32 %v4287_v3, %v4193_v33  ;;  %v3934_v40 = vadd.f32 1e-05, %v3902_v23  ;;  %v3933_v10 = vadd.f32 1e-05, %v3901_v39  ;;  %v3509_v42 = vrot.slane %v3508_v30, 1  ;;  %v3190_v3 = vpop.f32.mrf.mxu1 }
 0x37f   :  { %v4107_v20 = vrot.slane %v7944_v37, %v7424_v56  ;;  %v3817_v57 = vsel %vm3335_vm2, %v3647_v7, 0.0  ;;  %v3521_v54 = vrot.slane %v3520_v26, 2  ;;  %v3511_v14 = vsel %vm3335_vm2, %v8028_v15, 0.0 }
 0x380   :  { %v4392_v21 = vadd.f32 %v4283_v53, %v4192_v43  ;;  %5276 = vrsqrt.f32 %v3933_v10  ;;  %v3818_v48 = vrot.slane %v3817_v57, 4  ;;  %v3510_v61 = vadd.f32 %v3509_v42, %v3508_v30 }
 0x381   :  { %v4194_v62 = vmul.f32 %v4091_v6, %v3994_v0  ;;  %v3522_v19 = vadd.f32 %v3521_v54, %v3520_v26  ;;  %v3512_v28 = vrot.slane %v3511_v14, 4  ;;  %v2146_v63 = vrot.slane %v7981_v4, %v7418_v24 }
 0x382   :  { %v4425_v60 = vmax.f32 %v4393_v35, 0.0  ;;  %5278 = vrsqrt.f32 %v3934_v40  ;;  %v3819_v22 = vadd.f32 %v3818_v48, %v3817_v57  ;;  %v3584_v18 = vmul.f32 0.5, %v3510_v61 }
 0x383   :  { %v5273_v17 = vpop.eup %5272  ;;  %v3523_v34 = vrot.slane %v3522_v19, 1  ;;  %v3513_v53 = vadd.f32 %v3512_v28, %v3511_v14  ;;  %v8043_v12 = vadd.f32 %v3190_v3, %v2146_v63  ;;  %v2150_v8 = vrot.slane %v7981_v4, %v7421_v49 }
 0x384   :  { %v4424_v44 = vmax.f32 %v4392_v21, 0.0  ;;  %v3995_v6 = vmul.f32 %v5273_v17, %v7929_v36  ;;  %v3820_v33 = vrot.slane %v3819_v22, 2  ;;  %v8049_v23 = vsub.f32 %v7999_v9, %v3584_v18 }
 0x385   :  { %v4394_v38 = vadd.f32 %v4291_v25, %v4194_v62  ;;  %v3524_v2 = vadd.f32 %v3523_v34, %v3522_v19  ;;  %v3514_v41 = vrot.slane %v3513_v53, 2  ;;  %v3525_v13 = vsel %vm3335_vm2, %v8043_v12, 0.0 }
 0x386   :  { %v4195_v43 = vmul.f32 %v4095_v11, %v3995_v6  ;;  %v3821_v39 = vadd.f32 %v3820_v33, %v3819_v22  ;;  %v3648_v36 = vmul.f32 %v8049_v23, %v8049_v23  ;;  %v3526_v9 = vrot.slane %v3525_v13, 4 }
 0x387   :  { %v4540_v30 = vcombine.low %v4424_v44, %v4425_v60  ;;  %v3586_v0 = vmul.f32 0.5, %v3524_v2  ;;  %v3515_v7 = vadd.f32 %v3514_v41, %v3513_v53  ;;  %v8061_v26 = vadd.f32 %v3259_v1, %v2150_v8 }
 0x388   :  { %v4395_v25 = vadd.f32 %v4295_v31, %v4195_v43  ;;  %v3822_v35 = vrot.slane %v3821_v39, 1  ;;  %v3824_v40 = vsel %vm3335_vm2, %v3648_v36, 0.0  ;;  %v3527_v10 = vadd.f32 %v3526_v9, %v3525_v13 }
 0x389   :  { %v5275_v42 = vpop.eup %5274  ;;  %v4103_v11 = vrot.slane %v7944_v37, %v7427_v50  ;;  %v3825_v57 = vrot.slane %v3824_v40, 4  ;;  %v8070_v54 = vsub.f32 %v8008_v58, %v3586_v0  ;;  %v3516_v14 = vrot.slane %v3515_v7, 1 }
 0x38a   :  { %v4426_v21 = vmax.f32 %v4394_v38, 0.0  ;;  %v4427_v48 = vmax.f32 %v4395_v25, 0.0  ;;  %v3823_v61 = vadd.f32 %v3822_v35, %v3821_v39  ;;  %v3528_v3 = vrot.slane %v3527_v10, 2 }
 0x38b   :  { %v3826_v62 = vadd.f32 %v3825_v57, %v3824_v40  ;;  %v3650_v31 = vmul.f32 %v8070_v54, %v8070_v54  ;;  %v3517_v19 = vadd.f32 %v3516_v14, %v3515_v7  ;;  %v3532_v28 = vsel %vm3335_vm2, %v8061_v26, 0.0  ;;  %v3330_v7 = vpop.f32.mrf.mxu1 }
 0x38c   :  { %v4548_v63 = vrot.slane %v4540_v30, %v5520_v51  ;;  %v4541_v60 = vcombine.low %v4426_v21, %v4427_v48  ;;  %v3996_v22 = vmul.f32 %v5275_v42, %v7938_v29  ;;  %v3903_v58 = vmul.f32 0.5, %v3823_v61 }
 0x38d   :  { %v5277_v18 = vpop.eup %5276  ;;  %v3827_v17 = vrot.slane %v3826_v62, 2  ;;  %v3838_v34 = vsel %vm3335_vm2, %v3650_v31, 0.0  ;;  %v3585_v53 = vmul.f32 0.5, %v3517_v19  ;;  %v3529_v8 = vadd.f32 %v3528_v3, %v3527_v10 }
 0x38e   :  { %v4555_v44 = vrot.slane %v4541_v60, %v5520_v51  ;;  %v3997_v6 = vmul.f32 %v5277_v18, %v7968_v59  ;;  %v3935_v33 = vadd.f32 1e-05, %v3903_v58  ;;  %v3533_v1 = vrot.slane %v3532_v28, 4 }
 0x38f   :  { %v5279_v38 = vpop.eup %5278  ;;  %v4303_v2 = vrot.slane %v7963_v32, %v7427_v50  ;;  %v3828_v41 = vadd.f32 %v3827_v17, %v3826_v62  ;;  %v3839_v13 = vrot.slane %v3838_v34, 4  ;;  %v8084_v29 = vsub.f32 %v8028_v15, %v3585_v53 }
 0x390   :  { %v4556_v43 = vcombine.low %v4548_v63, %v4555_v44  ;;  %v4196_v39 = vmul.f32 %v4099_v16, %v3996_v22  ;;  %v4197_v36 = vmul.f32 %v4103_v11, %v3997_v6  ;;  %5280 = vrsqrt.f32 %v3935_v33  ;;  %v3261_v6 = vpop.f32.mrf.mxu0 }
 0x391   :  { %v3829_v9 = vrot.slane %v3828_v41, 1  ;;  %v3840_v59 = vadd.f32 %v3839_v13, %v3838_v34  ;;  %v3649_v30 = vmul.f32 %v8084_v29, %v8084_v29  ;;  %v3530_v0 = vrot.slane %v3529_v8, 1 }
 0x392   :  { %4620 = vst [vmem:[%s8231_s9 + $0x20] sm:$0xff] %v4556_v43  ;;  %v3998_v15 = vmul.f32 %v5279_v38, %v7955_v5  ;;  %v4307_v25 = vrot.slane %v7963_v32, %v7424_v56  ;;  %v3534_v35 = vadd.f32 %v3533_v1, %v3532_v28  ;;  %v2158_v16 = vrot.slane %v7981_v4, %v7424_v56 }
 0x393   :  { %v3830_v40 = vadd.f32 %v3829_v9, %v3828_v41  ;;  %v3841_v10 = vrot.slane %v3840_v59, 2  ;;  %v3831_v42 = vsel %vm3335_vm2, %v3649_v30, 0.0  ;;  %v3531_v11 = vadd.f32 %v3530_v0, %v3529_v8 }
 0x394   :  { %v4396_v57 = vadd.f32 %v4299_v27, %v4196_v39  ;;  %v3832_v14 = vrot.slane %v3831_v42, 4  ;;  %v3535_v21 = vrot.slane %v3534_v35, 2  ;;  %v8103_v48 = vadd.f32 %v3330_v7, %v2158_v16 }
 0x395   :  { %v4397_v5 = vadd.f32 %v4303_v2, %v4197_v36  ;;  %v4111_v61 = vrot.slane %v7944_v37, %v7430_v52  ;;  %v3842_v3 = vadd.f32 %v3841_v10, %v3840_v59  ;;  %v3587_v62 = vmul.f32 0.5, %v3531_v11  ;;  %v3332_v59 = vpop.f32.mrf.mxu1 }
 0x396   :  { %v4198_v31 = vmul.f32 %v4107_v20, %v3998_v15  ;;  %v3833_v19 = vadd.f32 %v3832_v14, %v3831_v42  ;;  %v3536_v28 = vadd.f32 %v3535_v21, %v3534_v35  ;;  %v3546_v63 = vsel %vm3335_vm2, %v8103_v48, 0.0 }
 0x397   :  { %v3904_v27 = vmul.f32 0.5, %v3830_v40  ;;  %v3843_v60 = vrot.slane %v3842_v3, 1  ;;  %v8113_v22 = vsub.f32 %v8043_v12, %v3587_v62  ;;  %v3547_v58 = vrot.slane %v3546_v63, 4 }
 0x398   :  { %v4428_v18 = vmax.f32 %v4396_v57, 0.0  ;;  %v4311_v17 = vrot.slane %v7963_v32, %v7430_v52  ;;  %v3834_v34 = vrot.slane %v3833_v19, 2  ;;  %v3537_v53 = vrot.slane %v3536_v28, 1 }
 0x399   :  { %v4429_v8 = vmax.f32 %v4397_v5, 0.0  ;;  %v3844_v37 = vadd.f32 %v3843_v60, %v3842_v3  ;;  %v3651_v20 = vmul.f32 %v8113_v22, %v8113_v22  ;;  %v3548_v44 = vadd.f32 %v3547_v58, %v3546_v63 }
 0x39a   :  { %v4398_v33 = vadd.f32 %v4307_v25, %v4198_v31  ;;  %v3835_v1 = vadd.f32 %v3834_v34, %v3833_v19  ;;  %v3538_v38 = vadd.f32 %v3537_v53, %v3536_v28  ;;  %v2154_v12 = vrot.slane %v7981_v4, %v7427_v50 }
 0x39b   :  { %v3936_v2 = vadd.f32 1e-05, %v3904_v27  ;;  %v3906_v41 = vmul.f32 0.5, %v3844_v37  ;;  %v3845_v13 = vsel %vm3335_vm2, %v3651_v20, 0.0  ;;  %v3549_v32 = vrot.slane %v3548_v44, 2 }
 0x39c   :  { %v3836_v43 = vrot.slane %v3835_v1, 1  ;;  %v3846_v39 = vrot.slane %v3845_v13, 4  ;;  %v3588_v36 = vmul.f32 0.5, %v3538_v38  ;;  %v8122_v9 = vadd.f32 %v3261_v6, %v2154_v12 }
 0x39d   :  { %v5281_v30 = vpop.eup %5280  ;;  %v4557_v0 = vcombine.low %v4428_v18, %v4429_v8  ;;  %v3938_v7 = vadd.f32 1e-05, %v3906_v41  ;;  %v3550_v15 = vadd.f32 %v3549_v32, %v3548_v44  ;;  %v2162_v25 = vrot.slane %v7981_v4, %v7430_v52 }
 0x39e   :  { %v3999_v35 = vmul.f32 %v5281_v30, %v8018_v55  ;;  %v3837_v16 = vadd.f32 %v3836_v43, %v3835_v1  ;;  %v3847_v40 = vadd.f32 %v3846_v39, %v3845_v13  ;;  %v8128_v10 = vsub.f32 %v8061_v26, %v3588_v36 }
 0x39f   :  { %5282 = vrsqrt.f32 %v3936_v2  ;;  %v3551_v42 = vrot.slane %v3550_v15, 1  ;;  %v3539_v11 = vsel %vm3335_vm2, %v8122_v9, 0.0  ;;  %v8132_v57 = vadd.f32 %v3332_v59, %v2162_v25 }
 0x3a0   :  { %v4199_v14 = vmul.f32 %v4111_v61, %v3999_v35  ;;  %v3905_v21 = vmul.f32 0.5, %v3837_v16  ;;  %v3848_v5 = vrot.slane %v3847_v40, 2  ;;  %v3652_v4 = vmul.f32 %v8128_v10, %v8128_v10 }
 0x3a1   :  { %5284 = vrsqrt.f32 %v3938_v7  ;;  %v3552_v55 = vadd.f32 %v3551_v42, %v3550_v15  ;;  %v3540_v3 = vrot.slane %v3539_v11, 4  ;;  %v3553_v26 = vsel %vm3335_vm2, %v8132_v57, 0.0  ;;  %v8153_v15 = vld [vmem:[%s8229_s7 + $0x18] sm:$0xff] }
 0x3a2   :  { %v4399_v62 = vadd.f32 %v4311_v17, %v4199_v14  ;;  %v3937_v31 = vadd.f32 1e-05, %v3905_v21  ;;  %v3849_v19 = vadd.f32 %v3848_v5, %v3847_v40  ;;  %v3852_v28 = vsel %vm3335_vm2, %v3652_v4, 0.0  ;;  %v8158_v42 = vld [vmem:[%s8230_s8 + $0x18] sm:$0xff] }
 0x3a3   :  { %v3853_v63 = vrot.slane %v3852_v28, 4  ;;  %v3590_v27 = vmul.f32 0.5, %v3552_v55  ;;  %v3541_v60 = vadd.f32 %v3540_v3, %v3539_v11  ;;  %v3554_v61 = vrot.slane %v3553_v26, 4 }
 0x3a4   :  { %v4430_v58 = vmax.f32 %v4398_v33, 0.0  ;;  %v4431_v18 = vmax.f32 %v4399_v62, 0.0  ;;  %5286 = vrsqrt.f32 %v3937_v31  ;;  %v3850_v34 = vrot.slane %v3849_v19, 1 }
 0x3a5   :  { %v3854_v53 = vadd.f32 %v3853_v63, %v3852_v28  ;;  %v8140_v8 = vsub.f32 %v8103_v48, %v3590_v27  ;;  %v3542_v37 = vrot.slane %v3541_v60, 2  ;;  %v3555_v20 = vadd.f32 %v3554_v61, %v3553_v26 }
 0x3a6   :  { %v4565_v17 = vrot.slane %v4557_v0, %v5520_v51  ;;  %v4558_v44 = vcombine.low %v4430_v58, %v4431_v18  ;;  %v3851_v6 = vadd.f32 %v3850_v34, %v3849_v19  ;;  %v4115_v5 = vrot.slane %v8153_v15, %v7404_v45 }
 0x3a7   :  { %v3855_v1 = vrot.slane %v3854_v53, 2  ;;  %v3654_v38 = vmul.f32 %v8140_v8, %v8140_v8  ;;  %v3543_v12 = vadd.f32 %v3542_v37, %v3541_v60  ;;  %v3556_v41 = vrot.slane %v3555_v20, 2 }
 0x3a8   :  { %v4572_v33 = vrot.slane %v4558_v44, %v5520_v51  ;;  %v3907_v2 = vmul.f32 0.5, %v3851_v6  ;;  %v4119_v3 = vrot.slane %v8153_v15, %v7410_v47  ;;  %v4315_v19 = vrot.slane %v8158_v42, %v7404_v45 }
 0x3a9   :  { %v3856_v13 = vadd.f32 %v3855_v1, %v3854_v53  ;;  %v3866_v32 = vsel %vm3335_vm2, %v3654_v38, 0.0  ;;  %v3544_v48 = vrot.slane %v3543_v12, 1  ;;  %v3557_v59 = vadd.f32 %v3556_v41, %v3555_v20 }
 0x3aa   :  { %v4573_v43 = vcombine.low %v4565_v17, %v4572_v33  ;;  %v3939_v39 = vadd.f32 1e-05, %v3907_v2  ;;  %v3867_v36 = vrot.slane %v3866_v32, 4  ;;  %v4123_v28 = vrot.slane %v8153_v15, %v7407_v46 }
 0x3ab   :  { %v3857_v30 = vrot.slane %v3856_v13, 1  ;;  %v3545_v0 = vadd.f32 %v3544_v48, %v3543_v12  ;;  %v3558_v35 = vrot.slane %v3557_v59, 1  ;;  %v4127_v38 = vrot.slane %v8153_v15, %v7418_v24 }
 0x3ac   :  { %v5283_v7 = vpop.eup %5282  ;;  %4621 = vst [vmem:[%s8231_s9 + $0x28] sm:$0xff] %v4573_v43  ;;  %5288 = vrsqrt.f32 %v3939_v39  ;;  %v3868_v25 = vadd.f32 %v3867_v36, %v3866_v32  ;;  %v4327_v48 = vrot.slane %v8158_v42, %v7418_v24 }
 0x3ad   :  { %v3589_v16 = vmul.f32 0.5, %v3545_v0  ;;  %v3559_v14 = vadd.f32 %v3558_v35, %v3557_v59  ;;  %v4000_v21 = vmul.f32 %v5283_v7, %v8049_v23  ;;  %v3858_v4 = vadd.f32 %v3857_v30, %v3856_v13 }
 0x3ae   :  { %v5285_v40 = vpop.eup %5284  ;;  %v3869_v11 = vrot.slane %v3868_v25, 2 }
 0x3af   :  { %v8164_v55 = vsub.f32 %v8122_v9, %v3589_v16  ;;  %v3591_v62 = vmul.f32 0.5, %v3559_v14  ;;  %v4319_v9 = vrot.slane %v8158_v42, %v7410_v47  ;;  %v4200_v61 = vmul.f32 %v4115_v5, %v4000_v21 }
 0x3b0   :  { %v3870_v26 = vadd.f32 %v3869_v11, %v3868_v25  ;;  %v4002_v58 = vmul.f32 %v5285_v40, %v8070_v54  ;;  %v3908_v18 = vmul.f32 0.5, %v3858_v4 }
 0x3b1   :  { %v5287_v31 = vpop.eup %5286  ;;  %v3653_v23 = vmul.f32 %v8164_v55, %v8164_v55  ;;  %v8178_v60 = vsub.f32 %v8132_v57, %v3591_v62  ;;  %v4400_v44 = vadd.f32 %v4315_v19, %v4200_v61  ;;  %v4323_v57 = vrot.slane %v8158_v42, %v7407_v46 }
 0x3b2   :  { %v4001_v63 = vmul.f32 %v5287_v31, %v8084_v29  ;;  %v3871_v27 = vrot.slane %v3870_v26, 1  ;;  %v4202_v54 = vmul.f32 %v4123_v28, %v4002_v58  ;;  %v3940_v12 = vadd.f32 1e-05, %v3908_v18 }
 0x3b3   :  { %v3859_v45 = vsel %vm3335_vm2, %v3653_v23, 0.0  ;;  %v3655_v20 = vmul.f32 %v8178_v60, %v8178_v60  ;;  %v4432_v39 = vmax.f32 %v4400_v44, 0.0  ;;  %v4331_v58 = vrot.slane %v8158_v42, %v7421_v49 }
 0x3b4   :  { %v4201_v34 = vmul.f32 %v4119_v3, %v4001_v63  ;;  %v3872_v53 = vadd.f32 %v3871_v27, %v3870_v26  ;;  %v3860_v37 = vrot.slane %v3859_v45, 4  ;;  %v4402_v59 = vadd.f32 %v4323_v57, %v4202_v54 }
 0x3b5   :  { %v3873_v47 = vsel %vm3335_vm2, %v3655_v20, 0.0  ;;  %5290 = vrsqrt.f32 %v3940_v12  ;;  %v4131_v63 = vrot.slane %v8153_v15, %v7421_v49  ;;  %v4139_v27 = vrot.slane %v8153_v15, %v7424_v56 }
 0x3b6   :  { %v4401_v29 = vadd.f32 %v4319_v9, %v4201_v34  ;;  %v3861_v17 = vadd.f32 %v3860_v37, %v3859_v45  ;;  %v3910_v6 = vmul.f32 0.5, %v3872_v53  ;;  %v3874_v1 = vrot.slane %v3873_v47, 4 }
 0x3b7   :  { %v4434_v11 = vmax.f32 %v4402_v59, 0.0  ;;  %v4135_v18 = vrot.slane %v8153_v15, %v7427_v50  ;;  %v4143_v37 = vrot.slane %v8153_v15, %v7430_v52 }
 0x3b8   :  { %v3862_v33 = vrot.slane %v3861_v17, 2  ;;  %v3875_v41 = vadd.f32 %v3874_v1, %v3873_v47  ;;  %v4433_v13 = vmax.f32 %v4401_v29, 0.0  ;;  %v3942_v36 = vadd.f32 1e-05, %v3910_v6 }
 0x3b9   :  { %v5289_v2 = vpop.eup %5288  ;;  %v4343_v47 = vrot.slane %v8158_v42, %v7430_v52 }
 0x3ba   :  { %v4003_v32 = vmul.f32 %v5289_v2, %v8113_v22  ;;  %v3863_v43 = vadd.f32 %v3862_v33, %v3861_v17  ;;  %v3876_v46 = vrot.slane %v3875_v41, 2  ;;  %v4574_v25 = vcombine.low %v4432_v39, %v4433_v13 }
 0x3bb   :  { %5292 = vrsqrt.f32 %v3942_v36 }
 0x3bc   :  { %v4203_v30 = vmul.f32 %v4127_v38, %v4003_v32  ;;  %v3864_v0 = vrot.slane %v3863_v43, 1  ;;  %v3877_v7 = vadd.f32 %v3876_v46, %v3875_v41  ;;  %v4582_v24 = vrot.slane %v4574_v25, %v5520_v51 }
 0x3be   :  { %v4403_v35 = vadd.f32 %v4327_v48, %v4203_v30  ;;  %v3865_v16 = vadd.f32 %v3864_v0, %v3863_v43  ;;  %v3878_v40 = vrot.slane %v3877_v7, 1 }
 0x3c0   :  { %v4435_v14 = vmax.f32 %v4403_v35, 0.0  ;;  %v3909_v22 = vmul.f32 0.5, %v3865_v16  ;;  %v3879_v21 = vadd.f32 %v3878_v40, %v3877_v7 }
 0x3c2   :  { %v4575_v5 = vcombine.low %v4434_v11, %v4435_v14  ;;  %v3941_v4 = vadd.f32 1e-05, %v3909_v22  ;;  %v3911_v3 = vmul.f32 0.5, %v3879_v21  ;;  %v5291_v19 = vpop.eup %5290 }
 0x3c3   :  { %v4004_v23 = vmul.f32 %v5291_v19, %v8128_v10  ;;  %v4335_v10 = vrot.slane %v8158_v42, %v7427_v50 }
 0x3c4   :  { %v4589_v26 = vrot.slane %v4575_v5, %v5520_v51  ;;  %5294 = vrsqrt.f32 %v3941_v4  ;;  %v3943_v62 = vadd.f32 1e-05, %v3911_v3 }
 0x3c5   :  { %v4204_v61 = vmul.f32 %v4131_v63, %v4004_v23 }
 0x3c6   :  { %v4590_v31 = vcombine.low %v4582_v24, %v4589_v26  ;;  %5296 = vrsqrt.f32 %v3943_v62 }
 0x3c7   :  { %v4404_v29 = vadd.f32 %v4331_v58, %v4204_v61 }
 0x3c8   :  { %4622 = vst [vmem:[%s8231_s9 + $0x30] sm:$0xff] %v4590_v31  ;;  %v5293_v28 = vpop.eup %5292 }
 0x3c9   :  { %v4006_v9 = vmul.f32 %v5293_v28, %v8140_v8  ;;  %v4339_v8 = vrot.slane %v8158_v42, %v7424_v56  ;;  %v4436_v6 = vmax.f32 %v4404_v29, 0.0 }
 0x3cb   :  { %v4206_v53 = vmul.f32 %v4139_v27, %v4006_v9 }
 0x3d1   :  { %v5295_v45 = vpop.eup %5294 }
 0x3d2   :  { %v4005_v34 = vmul.f32 %v5295_v45, %v8164_v55  ;;  %v4406_v55 = vadd.f32 %v4339_v8, %v4206_v53 }
 0x3d3   :  { %v5297_v20 = vpop.eup %5296 }
 0x3d4   :  { %v4205_v17 = vmul.f32 %v4135_v18, %v4005_v34  ;;  %v4007_v49 = vmul.f32 %v5297_v20, %v8178_v60  ;;  %v4438_v38 = vmax.f32 %v4406_v55, 0.0 }
 0x3d6   :  { %v4405_v44 = vadd.f32 %v4335_v10, %v4205_v17  ;;  %v4207_v57 = vmul.f32 %v4143_v37, %v4007_v49 }
 0x3d8   :  { %v4437_v50 = vmax.f32 %v4405_v44, 0.0  ;;  %v4407_v1 = vadd.f32 %v4343_v47, %v4207_v57 }
 0x3da   :  { %v4591_v54 = vcombine.low %v4436_v6, %v4437_v50  ;;  %v4439_v56 = vmax.f32 %v4407_v1, 0.0 }
 0x3dc   :  { %v4599_v12 = vrot.slane %v4591_v54, %v5520_v51  ;;  %v4592_v15 = vcombine.low %v4438_v38, %v4439_v56 }
 0x3de   :  { %v4606_v33 = vrot.slane %v4592_v15, %v5520_v51 }
 0x3e0   :  { %v4607_v2 = vcombine.low %v4599_v12, %v4606_v33 }
 0x3e2   :  { %4623 = vst [vmem:[%s8231_s9 + $0x38] sm:$0xff] %v4607_v2 }
 0x3e3   :  { %5319 = dma.done.wait [#allocation3], 32  }
 0x3e4   :  { %5320 = vsyncadd [#allocation3], 4294967264 }
 0x3e5   :  { %4641 = vsyncpa [#allocation3], 1 }

</bundles_post_ra>
